<compile_context>
chip_gen: v7x
topology: tpu7x:2x2x1
jax: 0.10.0
libtpu: 0.0.40
codegen_flags: <defaults>
</compile_context>

<pallas_src>
import functools

import jax
import jax.numpy as jnp
from jax.experimental import pallas as pl
from jax.experimental.pallas import tpu as pltpu

# MXU operands are bf16 (native single-pass MXU path on v5e/v6e/v7x, ~3x fewer
# passes than emulated f32xf32); all accumulation, bias and BN stats stay f32.
MXU_DTYPE = jnp.bfloat16
# Inter-layer activation storage (halves HBM read+write per layer; free on
# v6e/v7x, slightly more VPU convert work on v5e -- flip to float32 there if
# the converts ever show up as VALU pressure).
ACT_DTYPE = jnp.bfloat16
LANE = 128


def _round_up(x, m):
    return (x + m - 1) // m * m


@functools.lru_cache(maxsize=None)
def _vmem_limit_bytes():
    # Device-aware scoped-VMEM budget: ~3/4 of physical VMEM (128 MiB on
    # v5e/v6e, 64 MiB on v7x) instead of a hard-coded per-chip constant.
    try:
        cap = getattr(pltpu.get_tpu_info(), "vmem_capacity_bytes", None)
        if cap:
            return int(cap) * 3 // 4
    except Exception:
        pass
    return 64 * 1024 * 1024


def _elu(v):
    # clamp before expm1 so the dead branch can't overflow
    return jnp.where(v > 0, v, jnp.expm1(jnp.minimum(v, 0.0)))


# ----------------------------------------------------------------------------
# Kernel A: fused [input BN+ELU] -> spatial conv -> temporal conv -> BN stats
# ----------------------------------------------------------------------------
def _make_fused_layer_kernel(kh, kw, kt, W, S_in, S_out, cin, cout, D,
                             apply_input_act):
    Do = D - kt + 1
    span = Do * S_out
    taps = [(i, j) for i in range(kh) for j in range(kw)]

    def kernel(x_ref, ws_ref, wt_ref, beff_ref, mask_ref, scl_ref, sft_ref,
               y_ref, stat_ref, xact_ref, slab_ref, s_ref, acc_ref):
        # ---- previous layer's BatchNorm (scale/shift) + ELU applied ONCE to
        #      the whole (cin, D*S_in) block, then cast to bf16 for the MXU ----
        xin = x_ref[0]
        if apply_input_act:
            xin = xin.astype(jnp.float32) * scl_ref[...] + sft_ref[...]
            xin = _elu(xin)
        xact_ref[...] = xin.astype(xact_ref.dtype)

        # ---- spatial conv: ONE (cout, kh*kw*cin)@(kh*kw*cin, S_out) matmul
        #      per frame; kh*kw taps folded into the contraction via an im2col
        #      slab built from lane-shifted window slices (double-buffered) ----
        ws = ws_ref[...]                                    # hoisted weight load
        for d in range(D):                                  # static frame unroll
            f0 = d * S_in
            sel = d % 2
            for t, (i, j) in enumerate(taps):
                base = f0 + i * W + j
                slab_ref[sel, t * cin:(t + 1) * cin, :] = \
                    xact_ref[:, base:base + S_out]
            s_ref[:, d * S_out:(d + 1) * S_out] = jnp.dot(
                ws, slab_ref[sel],
                preferred_element_type=jnp.float32).astype(s_ref.dtype)

        # ---- temporal conv: kt wide matmuls over ALL Do output frames at once
        #      (weight LHS reused, N = Do*S_out lanes), f32 VMEM accumulator ----
        acc_ref[...] = jnp.dot(wt_ref[0], s_ref[:, 0:span],
                               preferred_element_type=jnp.float32)
        for t in range(1, kt):
            acc_ref[...] += jnp.dot(wt_ref[t],
                                    s_ref[:, t * S_out:t * S_out + span],
                                    preferred_element_type=jnp.float32)

        # ---- fused bias -> store -> masked BN batch statistics (all f32) ----
        beff = beff_ref[...]                                # (cout, 1), hoisted
        mask = mask_ref[...] > 0.0                          # (1, S_out), hoisted
        ssum = jnp.zeros((cout, 1), jnp.float32)
        ssq = jnp.zeros((cout, 1), jnp.float32)
        for dd in range(Do):
            o = acc_ref[:, dd * S_out:(dd + 1) * S_out] + beff
            y_ref[0, :, dd * S_out:(dd + 1) * S_out] = o.astype(y_ref.dtype)
            # where-masking (not o*mask): Inf/NaN garbage lanes cannot poison stats
            om = jnp.where(mask, o, 0.0)
            ssum = ssum + jnp.sum(om, axis=1, keepdims=True)
            ssq = ssq + jnp.sum(om * om, axis=1, keepdims=True)
        stat_ref[0] = jnp.concatenate([ssum, ssq], axis=1)  # (cout, 2)

    return kernel


def fused_layer_pallas(x, ws, wt, beff, mask, scale_in, shift_in, *,
                       kh, kw, kt, W, D, S_in, S_out, cin, cout,
                       apply_input_act):
    """x: (N, cin, D*S_in) -> y: (N, cout, Do*S_out), stats: (N, cout, 2)."""
    N = x.shape[0]
    Do = D - kt + 1
    K_sp = kh * kw * cin
    kernel = _make_fused_layer_kernel(kh, kw, kt, W, S_in, S_out, cin, cout, D,
                                      apply_input_act)
    return pl.pallas_call(
        kernel,
        out_shape=(jax.ShapeDtypeStruct((N, cout, Do * S_out), ACT_DTYPE),
                   jax.ShapeDtypeStruct((N, cout, 2), jnp.float32)),
        grid=(N,),
        in_specs=[
            pl.BlockSpec((1, cin, D * S_in), lambda n: (n, 0, 0)),
            pl.BlockSpec((cout, K_sp), lambda n: (0, 0)),
            pl.BlockSpec((kt, cout, cout), lambda n: (0, 0, 0)),
            pl.BlockSpec((cout, 1), lambda n: (0, 0)),
            pl.BlockSpec((1, S_out), lambda n: (0, 0)),
            pl.BlockSpec((cin, 1), lambda n: (0, 0)),
            pl.BlockSpec((cin, 1), lambda n: (0, 0)),
        ],
        out_specs=(
            pl.BlockSpec((1, cout, Do * S_out), lambda n: (n, 0, 0)),
            pl.BlockSpec((1, cout, 2), lambda n: (n, 0, 0)),
        ),
        scratch_shapes=[
            pltpu.VMEM((cin, D * S_in), MXU_DTYPE),      # activated input
            pltpu.VMEM((2, K_sp, S_out), MXU_DTYPE),     # im2col slab (2-buf)
            pltpu.VMEM((cout, D * S_out), MXU_DTYPE),    # spatial-conv output
            pltpu.VMEM((cout, Do * S_out), jnp.float32), # temporal accumulator
        ],
        compiler_params=pltpu.CompilerParams(
            dimension_semantics=("parallel",),   # shards N across v7x TCs
            vmem_limit_bytes=_vmem_limit_bytes()),
    )(x, ws, wt, beff, mask, scale_in, shift_in)


# ----------------------------------------------------------------------------
# Kernel B: final-layer BatchNorm (precomputed scale/shift) + ELU, lane-dense
# ----------------------------------------------------------------------------
def bn_elu_pallas(y, scale, shift):
    N, C, DS = y.shape

    def kernel(y_ref, scl_ref, sft_ref, o_ref):
        v = y_ref[0].astype(jnp.float32) * scl_ref[...] + sft_ref[...]
        o_ref[0] = _elu(v).astype(o_ref.dtype)

    return pl.pallas_call(
        kernel,
        out_shape=jax.ShapeDtypeStruct((N, C, DS), jnp.float32),
        grid=(N,),
        in_specs=[pl.BlockSpec((1, C, DS), lambda n: (n, 0, 0)),
                  pl.BlockSpec((C, 1), lambda n: (0, 0)),
                  pl.BlockSpec((C, 1), lambda n: (0, 0))],
        out_specs=pl.BlockSpec((1, C, DS), lambda n: (n, 0, 0)),
        compiler_params=pltpu.CompilerParams(
            dimension_semantics=("parallel",),
            vmem_limit_bytes=_vmem_limit_bytes()),
    )(y, scale, shift)


# ----------------------------------------------------------------------------
# Parameter construction (deterministic, mirrors the PyTorch __init__)
# ----------------------------------------------------------------------------
def xavier_normal(key, shape):
    # nn.init.xavier_normal_ on Conv3d weight (Cout, Cin, kd, kh, kw)
    cout, cin = shape[0], shape[1]
    receptive = 1
    for s in shape[2:]:
        receptive *= s
    fan_in, fan_out = cin * receptive, cout * receptive
    std = (2.0 / (fan_in + fan_out)) ** 0.5
    return std * jax.random.normal(key, shape, dtype=jnp.float32)


def make_params(key, input_channels, hidden_channels, spatial_input_kernel,
                temporal_input_kernel, spatial_hidden_kernel,
                temporal_hidden_kernel, layers):
    hidden_channels = [hidden_channels] * layers   # check_hyperparam_for_layers
    params = []
    cin = input_channels
    for l in range(layers):
        cout = hidden_channels[l]
        kh = kw = spatial_input_kernel if l == 0 else spatial_hidden_kernel
        kt = temporal_input_kernel if l == 0 else temporal_hidden_kernel
        key, k1, k2 = jax.random.split(key, 3)
        ws_torch = xavier_normal(k1, (cout, cin, 1, kh, kw))     # conv_spatial
        wt_torch = xavier_normal(k2, (cout, cout, kt, 1, 1))     # conv_temporal
        # kernel-side layouts (bf16 MXU operands):
        #   ws_k[co, (i*kw + j)*cin + ci] = ws_torch[co, ci, 0, i, j]
        #   wt_k[t, co, ci]               = wt_torch[co, ci, t, 0, 0]
        ws_k = jnp.transpose(ws_torch[:, :, 0], (0, 2, 3, 1)).reshape(
            cout, kh * kw * cin).astype(MXU_DTYPE)
        wt_k = jnp.transpose(wt_torch[:, :, :, 0, 0], (2, 0, 1)).astype(MXU_DTYPE)
        params.append(dict(
            kh=kh, kw=kw, kt=kt, cin=cin, cout=cout,
            ws_torch=ws_torch, wt_torch=wt_torch,
            ws_k=ws_k, wt_k=wt_k,
            bs=jnp.zeros((cout,), jnp.float32),     # init_conv -> bias = 0
            bt=jnp.zeros((cout,), jnp.float32),
            gamma=jnp.ones((cout,), jnp.float32),   # BatchNorm3d affine init
            beta=jnp.zeros((cout,), jnp.float32),
        ))
        cin = cout
    return params


# ----------------------------------------------------------------------------
# Forward pass (glue in plain JAX, hot path in Pallas)
# ----------------------------------------------------------------------------
def factorized3d_core_forward(x_ncdhw, params, eps=1e-5):
    N, C0, D, H, W = x_ncdhw.shape
    L = len(params)

    # valid output extents per layer boundary (stride=1, dilation=1, VALID)
    H_l, W_l = [H], [W]
    for p in params:
        H_l.append(H_l[-1] - p["kh"] + 1)
        W_l.append(W_l[-1] - p["kw"] + 1)

    # lane width per layer boundary: enough for all downstream window shifts,
    # rounded up to a multiple of 128 so every store / frame slice is lane-dense
    S = [0] * (L + 1)
    S[L] = _round_up(H_l[L] * W, LANE)
    for l in range(L - 1, -1, -1):
        S[l] = _round_up((params[l]["kh"] - 1) * W + (params[l]["kw"] - 1)
                         + S[l + 1], LANE)

    # NCDHW -> (N, C, D*S[0]): per-frame row-major spatial on the lane axis
    x = x_ncdhw.reshape(N, C0, D, H * W)
    x = jnp.pad(x, ((0, 0), (0, 0), (0, 0), (0, S[0] - H * W)))
    x = x.reshape(N, C0, D * S[0])

    D_cur = D
    scale = jnp.ones((C0, 1), jnp.float32)     # unused for layer 0
    shift = jnp.zeros((C0, 1), jnp.float32)

    for l, p in enumerate(params):
        kh, kw, kt = p["kh"], p["kw"], p["kt"]
        cin, cout = p["cin"], p["cout"]
        Do = D_cur - kt + 1
        H_out, Wv_out = H_l[l + 1], W_l[l + 1]
        S_in, S_out = S[l], S[l + 1]

        # fold conv_spatial bias through conv_temporal: b_eff = bt + Wt . bs
        wt3 = p["wt_torch"][:, :, :, 0, 0]               # (cout, cout, kt)
        b_eff = (p["bt"] + jnp.einsum("oct,c->o", wt3, p["bs"]))[:, None]

        # per-frame mask of valid (non-garbage / non-pad) spatial positions
        lane = jnp.arange(S_out)
        mask = ((lane < H_out * W) & ((lane % W) < Wv_out)
                ).astype(jnp.float32)[None, :]

        y, stats = fused_layer_pallas(
            x, p["ws_k"], p["wt_k"], b_eff, mask, scale, shift,
            kh=kh, kw=kw, kt=kt, W=W, D=D_cur, S_in=S_in, S_out=S_out,
            cin=cin, cout=cout, apply_input_act=(l > 0))

        # BatchNorm3d training-mode batch statistics (biased variance), folded
        # into per-channel scale/shift applied by the next kernel on load.
        # (E[x^2]-E[x]^2 is cancellation-prone for large means; fine at these
        #  scales / tolerances.)
        cnt = float(N * Do * H_out * Wv_out)
        mean = jnp.sum(stats[:, :, 0], axis=0) / cnt
        var = jnp.sum(stats[:, :, 1], axis=0) / cnt - mean * mean
        inv = p["gamma"] * jax.lax.rsqrt(var + eps)
        scale = inv[:, None]
        shift = (p["beta"] - mean * inv)[:, None]

        x = y
        D_cur = Do

    # final BN + ELU (earlier layers got it fused into the next layer's load)
    y = bn_elu_pallas(x, scale, shift)                    # (N, C_L, D_cur*S[L]) f32

    # strip lane padding / garbage columns and return NCDHW (no transpose needed)
    Cl = params[-1]["cout"]
    y = y.reshape(N, Cl, D_cur, S[L])[..., :H_l[L] * W]
    y = y.reshape(N, Cl, D_cur, H_l[L], W)[..., :W_l[L]]
    return y


# ----------------------------------------------------------------------------
# Pure-JAX f32 reference (lax.conv) to validate semantics
# ----------------------------------------------------------------------------
def _ref_conv3d(x, w, b):
    out = jax.lax.conv_general_dilated(
        x, w, window_strides=(1, 1, 1), padding="VALID",
        dimension_numbers=("NCDHW", "OIDHW", "NCDHW"),
        precision=jax.lax.Precision.HIGHEST)
    return out + b[None, :, None, None, None]


def reference_forward(x, params, eps=1e-5):
    y = x
    for p in params:
        y = _ref_conv3d(y, p["ws_torch"], p["bs"])
        y = _ref_conv3d(y, p["wt_torch"], p["bt"])
        mean = jnp.mean(y, axis=(0, 2, 3, 4), keepdims=True)
        var = jnp.mean((y - mean) ** 2, axis=(0, 2, 3, 4), keepdims=True)
        y = (y - mean) / jnp.sqrt(var + eps)
        y = y * p["gamma"][None, :, None, None, None] \
            + p["beta"][None, :, None, None, None]
        y = jax.nn.elu(y)
    return y


# ----------------------------------------------------------------------------
if __name__ == "__main__":
    key = jax.random.PRNGKey(0)
    kx, kp = jax.random.split(key)

    # Small config consistent with the module signature
    N, Cin, D, H, W = 2, 4, 8, 16, 16
    hidden_channels = 8
    layers = 3
    spatial_input_kernel = 3
    temporal_input_kernel = 3
    spatial_hidden_kernel = 3
    temporal_hidden_kernel = 3

    x = jax.random.normal(kx, (N, Cin, D, H, W), dtype=jnp.float32)
    params = make_params(kp, Cin, hidden_channels, spatial_input_kernel,
                         temporal_input_kernel, spatial_hidden_kernel,
                         temporal_hidden_kernel, layers)

    out = factorized3d_core_forward(x, params)
    out = jax.block_until_ready(out)

    ref = jax.block_until_ready(reference_forward(x, params))
    assert out.shape == ref.shape, (out.shape, ref.shape)
    # Tolerance reflects bf16 MXU operands + bf16 inter-layer activation storage
    # (f32 accumulation / BN stats) vs. the pure-f32 reference across 3 layers.
    assert jnp.allclose(out, ref, rtol=3e-2, atol=3e-2), \
        float(jnp.max(jnp.abs(out - ref)))

    print("KERNEL_OK")
</pallas_src>

<mosaic_0001>
module attributes {stable_mosaic.version = 11 : i64} {
  func.func @kernel(%arg0: i32, %arg1: memref<1x4x5120xf32, #tpu.memory_space<vmem>>, %arg2: memref<8x36xbf16, #tpu.memory_space<vmem>>, %arg3: memref<3x8x8xbf16, #tpu.memory_space<vmem>>, %arg4: memref<8x1xf32, #tpu.memory_space<vmem>>, %arg5: memref<1x512xf32, #tpu.memory_space<vmem>>, %arg6: memref<4x1xf32, #tpu.memory_space<vmem>>, %arg7: memref<4x1xf32, #tpu.memory_space<vmem>>, %arg8: memref<1x8x3072xbf16, #tpu.memory_space<vmem>>, %arg9: memref<1x8x2xf32, #tpu.memory_space<vmem>>, %arg10: memref<4x5120xbf16, #tpu.memory_space<vmem>>, %arg11: memref<2x36x512xbf16, #tpu.memory_space<vmem>>, %arg12: memref<8x4096xbf16, #tpu.memory_space<vmem>>, %arg13: memref<8x3072xf32, #tpu.memory_space<vmem>>) attributes {dimension_semantics = [#tpu.dimension_semantics<parallel>], iteration_bounds = array<i64: 2>, scalar_prefetch = 0 : i64, scratch_operands = 4 : i64, tpu.core_type = #tpu.core_type<tc>, window_params = [{transform_indices = @transform_0, window_bounds = array<i64: 1, 4, 5120>}, {pipeline_mode = #tpu.pipeline_mode<synchronous>, transform_indices = @transform_1, window_bounds = array<i64: 8, 36>}, {pipeline_mode = #tpu.pipeline_mode<synchronous>, transform_indices = @transform_2, window_bounds = array<i64: 3, 8, 8>}, {pipeline_mode = #tpu.pipeline_mode<synchronous>, transform_indices = @transform_3, window_bounds = array<i64: 8, 1>}, {pipeline_mode = #tpu.pipeline_mode<synchronous>, transform_indices = @transform_4, window_bounds = array<i64: 1, 512>}, {pipeline_mode = #tpu.pipeline_mode<synchronous>, transform_indices = @transform_5, window_bounds = array<i64: 4, 1>}, {pipeline_mode = #tpu.pipeline_mode<synchronous>, transform_indices = @transform_6, window_bounds = array<i64: 4, 1>}, {transform_indices = @transform_7, window_bounds = array<i64: 1, 8, 3072>}, {transform_indices = @transform_8, window_bounds = array<i64: 1, 8, 2>}]} {
    %c0 = arith.constant 0 : index
    %c0_0 = arith.constant 0 : index
    %c0_1 = arith.constant 0 : index
    %0 = vector.load %arg1[%c0, %c0_0, %c0_1] : memref<1x4x5120xf32, #tpu.memory_space<vmem>>, vector<1x4x5120xf32>
    %1 = vector.shape_cast %0 : vector<1x4x5120xf32> to vector<4x5120xf32>
    %2 = arith.truncf %1 : vector<4x5120xf32> to vector<4x5120xbf16>
    %c0_2 = arith.constant 0 : index
    %c0_3 = arith.constant 0 : index
    %3 = vector.load %arg10[%c0_2, %c0_3] : memref<4x5120xbf16, #tpu.memory_space<vmem>>, vector<4x5120xbf16>
    tpu.vector_store %arg10[%c0_2, %c0_3], %2 {strides = array<i32>} : memref<4x5120xbf16, #tpu.memory_space<vmem>>, vector<4x5120xbf16>,
    %c0_4 = arith.constant 0 : index
    %c0_5 = arith.constant 0 : index
    %4 = vector.load %arg2[%c0_4, %c0_5] : memref<8x36xbf16, #tpu.memory_space<vmem>>, vector<8x36xbf16>
    %c0_6 = arith.constant 0 : index
    %c0_7 = arith.constant 0 : index
    %5 = vector.load %arg10[%c0_6, %c0_7] : memref<4x5120xbf16, #tpu.memory_space<vmem>>, vector<4x512xbf16>
    %c0_8 = arith.constant 0 : index
    %c0_9 = arith.constant 0 : index
    %c0_10 = arith.constant 0 : index
    %6 = vector.load %arg11[%c0_8, %c0_9, %c0_10] : memref<2x36x512xbf16, #tpu.memory_space<vmem>>, vector<1x4x512xbf16>
    %7 = vector.shape_cast %6 : vector<1x4x512xbf16> to vector<4x512xbf16>
    %8 = vector.shape_cast %5 : vector<4x512xbf16> to vector<1x4x512xbf16>
    tpu.vector_store %arg11[%c0_8, %c0_9, %c0_10], %8 {strides = array<i32>} : memref<2x36x512xbf16, #tpu.memory_space<vmem>>, vector<1x4x512xbf16>,
    %c0_11 = arith.constant 0 : index
    %c1 = arith.constant 1 : index
    %9 = vector.load %arg10[%c0_11, %c1] : memref<4x5120xbf16, #tpu.memory_space<vmem>>, vector<4x512xbf16>
    %c0_12 = arith.constant 0 : index
    %c4 = arith.constant 4 : index
    %c0_13 = arith.constant 0 : index
    %10 = vector.load %arg11[%c0_12, %c4, %c0_13] : memref<2x36x512xbf16, #tpu.memory_space<vmem>>, vector<1x4x512xbf16>
    %11 = vector.shape_cast %10 : vector<1x4x512xbf16> to vector<4x512xbf16>
    %12 = vector.shape_cast %9 : vector<4x512xbf16> to vector<1x4x512xbf16>
    tpu.vector_store %arg11[%c0_12, %c4, %c0_13], %12 {strides = array<i32>} : memref<2x36x512xbf16, #tpu.memory_space<vmem>>, vector<1x4x512xbf16>,
    %c0_14 = arith.constant 0 : index
    %c2 = arith.constant 2 : index
    %13 = vector.load %arg10[%c0_14, %c2] : memref<4x5120xbf16, #tpu.memory_space<vmem>>, vector<4x512xbf16>
    %c0_15 = arith.constant 0 : index
    %c8 = arith.constant 8 : index
    %c0_16 = arith.constant 0 : index
    %14 = vector.load %arg11[%c0_15, %c8, %c0_16] : memref<2x36x512xbf16, #tpu.memory_space<vmem>>, vector<1x4x512xbf16>
    %15 = vector.shape_cast %14 : vector<1x4x512xbf16> to vector<4x512xbf16>
    %16 = vector.shape_cast %13 : vector<4x512xbf16> to vector<1x4x512xbf16>
    tpu.vector_store %arg11[%c0_15, %c8, %c0_16], %16 {strides = array<i32>} : memref<2x36x512xbf16, #tpu.memory_space<vmem>>, vector<1x4x512xbf16>,
    %c0_17 = arith.constant 0 : index
    %c16 = arith.constant 16 : index
    %17 = vector.load %arg10[%c0_17, %c16] : memref<4x5120xbf16, #tpu.memory_space<vmem>>, vector<4x512xbf16>
    %c0_18 = arith.constant 0 : index
    %c12 = arith.constant 12 : index
    %c0_19 = arith.constant 0 : index
    %18 = vector.load %arg11[%c0_18, %c12, %c0_19] : memref<2x36x512xbf16, #tpu.memory_space<vmem>>, vector<1x4x512xbf16>
    %19 = vector.shape_cast %18 : vector<1x4x512xbf16> to vector<4x512xbf16>
    %20 = vector.shape_cast %17 : vector<4x512xbf16> to vector<1x4x512xbf16>
    tpu.vector_store %arg11[%c0_18, %c12, %c0_19], %20 {strides = array<i32>} : memref<2x36x512xbf16, #tpu.memory_space<vmem>>, vector<1x4x512xbf16>,
    %c0_20 = arith.constant 0 : index
    %c17 = arith.constant 17 : index
    %21 = vector.load %arg10[%c0_20, %c17] : memref<4x5120xbf16, #tpu.memory_space<vmem>>, vector<4x512xbf16>
    %c0_21 = arith.constant 0 : index
    %c16_22 = arith.constant 16 : index
    %c0_23 = arith.constant 0 : index
    %22 = vector.load %arg11[%c0_21, %c16_22, %c0_23] : memref<2x36x512xbf16, #tpu.memory_space<vmem>>, vector<1x4x512xbf16>
    %23 = vector.shape_cast %22 : vector<1x4x512xbf16> to vector<4x512xbf16>
    %24 = vector.shape_cast %21 : vector<4x512xbf16> to vector<1x4x512xbf16>
    tpu.vector_store %arg11[%c0_21, %c16_22, %c0_23], %24 {strides = array<i32>} : memref<2x36x512xbf16, #tpu.memory_space<vmem>>, vector<1x4x512xbf16>,
    %c0_24 = arith.constant 0 : index
    %c18 = arith.constant 18 : index
    %25 = vector.load %arg10[%c0_24, %c18] : memref<4x5120xbf16, #tpu.memory_space<vmem>>, vector<4x512xbf16>
    %c0_25 = arith.constant 0 : index
    %c20 = arith.constant 20 : index
    %c0_26 = arith.constant 0 : index
    %26 = vector.load %arg11[%c0_25, %c20, %c0_26] : memref<2x36x512xbf16, #tpu.memory_space<vmem>>, vector<1x4x512xbf16>
    %27 = vector.shape_cast %26 : vector<1x4x512xbf16> to vector<4x512xbf16>
    %28 = vector.shape_cast %25 : vector<4x512xbf16> to vector<1x4x512xbf16>
    tpu.vector_store %arg11[%c0_25, %c20, %c0_26], %28 {strides = array<i32>} : memref<2x36x512xbf16, #tpu.memory_space<vmem>>, vector<1x4x512xbf16>,
    %c0_27 = arith.constant 0 : index
    %c32 = arith.constant 32 : index
    %29 = vector.load %arg10[%c0_27, %c32] : memref<4x5120xbf16, #tpu.memory_space<vmem>>, vector<4x512xbf16>
    %c0_28 = arith.constant 0 : index
    %c24 = arith.constant 24 : index
    %c0_29 = arith.constant 0 : index
    %30 = vector.load %arg11[%c0_28, %c24, %c0_29] : memref<2x36x512xbf16, #tpu.memory_space<vmem>>, vector<1x4x512xbf16>
    %31 = vector.shape_cast %30 : vector<1x4x512xbf16> to vector<4x512xbf16>
    %32 = vector.shape_cast %29 : vector<4x512xbf16> to vector<1x4x512xbf16>
    tpu.vector_store %arg11[%c0_28, %c24, %c0_29], %32 {strides = array<i32>} : memref<2x36x512xbf16, #tpu.memory_space<vmem>>, vector<1x4x512xbf16>,
    %c0_30 = arith.constant 0 : index
    %c33 = arith.constant 33 : index
    %33 = vector.load %arg10[%c0_30, %c33] : memref<4x5120xbf16, #tpu.memory_space<vmem>>, vector<4x512xbf16>
    %c0_31 = arith.constant 0 : index
    %c28 = arith.constant 28 : index
    %c0_32 = arith.constant 0 : index
    %34 = vector.load %arg11[%c0_31, %c28, %c0_32] : memref<2x36x512xbf16, #tpu.memory_space<vmem>>, vector<1x4x512xbf16>
    %35 = vector.shape_cast %34 : vector<1x4x512xbf16> to vector<4x512xbf16>
    %36 = vector.shape_cast %33 : vector<4x512xbf16> to vector<1x4x512xbf16>
    tpu.vector_store %arg11[%c0_31, %c28, %c0_32], %36 {strides = array<i32>} : memref<2x36x512xbf16, #tpu.memory_space<vmem>>, vector<1x4x512xbf16>,
    %c0_33 = arith.constant 0 : index
    %c34 = arith.constant 34 : index
    %37 = vector.load %arg10[%c0_33, %c34] : memref<4x5120xbf16, #tpu.memory_space<vmem>>, vector<4x512xbf16>
    %c0_34 = arith.constant 0 : index
    %c32_35 = arith.constant 32 : index
    %c0_36 = arith.constant 0 : index
    %38 = vector.load %arg11[%c0_34, %c32_35, %c0_36] : memref<2x36x512xbf16, #tpu.memory_space<vmem>>, vector<1x4x512xbf16>
    %39 = vector.shape_cast %38 : vector<1x4x512xbf16> to vector<4x512xbf16>
    %40 = vector.shape_cast %37 : vector<4x512xbf16> to vector<1x4x512xbf16>
    tpu.vector_store %arg11[%c0_34, %c32_35, %c0_36], %40 {strides = array<i32>} : memref<2x36x512xbf16, #tpu.memory_space<vmem>>, vector<1x4x512xbf16>,
    %c0_37 = arith.constant 0 : index
    %c0_38 = arith.constant 0 : index
    %c0_39 = arith.constant 0 : index
    %41 = vector.load %arg11[%c0_37, %c0_38, %c0_39] : memref<2x36x512xbf16, #tpu.memory_space<vmem>>, vector<1x36x512xbf16>
    %42 = vector.shape_cast %41 : vector<1x36x512xbf16> to vector<36x512xbf16>
    %cst = arith.constant dense<0.000000e+00> : vector<8x512xf32>
    %43 = tpu.matmul %4, %42, %cst {dimension_numbers = #tpu.dot_dimension_numbers<[1], [0], [0], [1], [0, 0, 1, 1], [], []>} : vector<8x36xbf16>, vector<36x512xbf16>, vector<8x512xf32> -> vector<8x512xf32>
    %44 = arith.truncf %43 : vector<8x512xf32> to vector<8x512xbf16>
    %c0_40 = arith.constant 0 : index
    %c0_41 = arith.constant 0 : index
    %45 = vector.load %arg12[%c0_40, %c0_41] : memref<8x4096xbf16, #tpu.memory_space<vmem>>, vector<8x512xbf16>
    tpu.vector_store %arg12[%c0_40, %c0_41], %44 {strides = array<i32>} : memref<8x4096xbf16, #tpu.memory_space<vmem>>, vector<8x512xbf16>,
    %c0_42 = arith.constant 0 : index
    %c640 = arith.constant 640 : index
    %46 = vector.load %arg10[%c0_42, %c640] : memref<4x5120xbf16, #tpu.memory_space<vmem>>, vector<4x512xbf16>
    %c1_43 = arith.constant 1 : index
    %c0_44 = arith.constant 0 : index
    %c0_45 = arith.constant 0 : index
    %47 = vector.load %arg11[%c1_43, %c0_44, %c0_45] : memref<2x36x512xbf16, #tpu.memory_space<vmem>>, vector<1x4x512xbf16>
    %48 = vector.shape_cast %47 : vector<1x4x512xbf16> to vector<4x512xbf16>
    %49 = vector.shape_cast %46 : vector<4x512xbf16> to vector<1x4x512xbf16>
    tpu.vector_store %arg11[%c1_43, %c0_44, %c0_45], %49 {strides = array<i32>} : memref<2x36x512xbf16, #tpu.memory_space<vmem>>, vector<1x4x512xbf16>,
    %c0_46 = arith.constant 0 : index
    %c641 = arith.constant 641 : index
    %50 = vector.load %arg10[%c0_46, %c641] : memref<4x5120xbf16, #tpu.memory_space<vmem>>, vector<4x512xbf16>
    %c1_47 = arith.constant 1 : index
    %c4_48 = arith.constant 4 : index
    %c0_49 = arith.constant 0 : index
    %51 = vector.load %arg11[%c1_47, %c4_48, %c0_49] : memref<2x36x512xbf16, #tpu.memory_space<vmem>>, vector<1x4x512xbf16>
    %52 = vector.shape_cast %51 : vector<1x4x512xbf16> to vector<4x512xbf16>
    %53 = vector.shape_cast %50 : vector<4x512xbf16> to vector<1x4x512xbf16>
    tpu.vector_store %arg11[%c1_47, %c4_48, %c0_49], %53 {strides = array<i32>} : memref<2x36x512xbf16, #tpu.memory_space<vmem>>, vector<1x4x512xbf16>,
    %c0_50 = arith.constant 0 : index
    %c642 = arith.constant 642 : index
    %54 = vector.load %arg10[%c0_50, %c642] : memref<4x5120xbf16, #tpu.memory_space<vmem>>, vector<4x512xbf16>
    %c1_51 = arith.constant 1 : index
    %c8_52 = arith.constant 8 : index
    %c0_53 = arith.constant 0 : index
    %55 = vector.load %arg11[%c1_51, %c8_52, %c0_53] : memref<2x36x512xbf16, #tpu.memory_space<vmem>>, vector<1x4x512xbf16>
    %56 = vector.shape_cast %55 : vector<1x4x512xbf16> to vector<4x512xbf16>
    %57 = vector.shape_cast %54 : vector<4x512xbf16> to vector<1x4x512xbf16>
    tpu.vector_store %arg11[%c1_51, %c8_52, %c0_53], %57 {strides = array<i32>} : memref<2x36x512xbf16, #tpu.memory_space<vmem>>, vector<1x4x512xbf16>,
    %c0_54 = arith.constant 0 : index
    %c656 = arith.constant 656 : index
    %58 = vector.load %arg10[%c0_54, %c656] : memref<4x5120xbf16, #tpu.memory_space<vmem>>, vector<4x512xbf16>
    %c1_55 = arith.constant 1 : index
    %c12_56 = arith.constant 12 : index
    %c0_57 = arith.constant 0 : index
    %59 = vector.load %arg11[%c1_55, %c12_56, %c0_57] : memref<2x36x512xbf16, #tpu.memory_space<vmem>>, vector<1x4x512xbf16>
    %60 = vector.shape_cast %59 : vector<1x4x512xbf16> to vector<4x512xbf16>
    %61 = vector.shape_cast %58 : vector<4x512xbf16> to vector<1x4x512xbf16>
    tpu.vector_store %arg11[%c1_55, %c12_56, %c0_57], %61 {strides = array<i32>} : memref<2x36x512xbf16, #tpu.memory_space<vmem>>, vector<1x4x512xbf16>,
    %c0_58 = arith.constant 0 : index
    %c657 = arith.constant 657 : index
    %62 = vector.load %arg10[%c0_58, %c657] : memref<4x5120xbf16, #tpu.memory_space<vmem>>, vector<4x512xbf16>
    %c1_59 = arith.constant 1 : index
    %c16_60 = arith.constant 16 : index
    %c0_61 = arith.constant 0 : index
    %63 = vector.load %arg11[%c1_59, %c16_60, %c0_61] : memref<2x36x512xbf16, #tpu.memory_space<vmem>>, vector<1x4x512xbf16>
    %64 = vector.shape_cast %63 : vector<1x4x512xbf16> to vector<4x512xbf16>
    %65 = vector.shape_cast %62 : vector<4x512xbf16> to vector<1x4x512xbf16>
    tpu.vector_store %arg11[%c1_59, %c16_60, %c0_61], %65 {strides = array<i32>} : memref<2x36x512xbf16, #tpu.memory_space<vmem>>, vector<1x4x512xbf16>,
    %c0_62 = arith.constant 0 : index
    %c658 = arith.constant 658 : index
    %66 = vector.load %arg10[%c0_62, %c658] : memref<4x5120xbf16, #tpu.memory_space<vmem>>, vector<4x512xbf16>
    %c1_63 = arith.constant 1 : index
    %c20_64 = arith.constant 20 : index
    %c0_65 = arith.constant 0 : index
    %67 = vector.load %arg11[%c1_63, %c20_64, %c0_65] : memref<2x36x512xbf16, #tpu.memory_space<vmem>>, vector<1x4x512xbf16>
    %68 = vector.shape_cast %67 : vector<1x4x512xbf16> to vector<4x512xbf16>
    %69 = vector.shape_cast %66 : vector<4x512xbf16> to vector<1x4x512xbf16>
    tpu.vector_store %arg11[%c1_63, %c20_64, %c0_65], %69 {strides = array<i32>} : memref<2x36x512xbf16, #tpu.memory_space<vmem>>, vector<1x4x512xbf16>,
    %c0_66 = arith.constant 0 : index
    %c672 = arith.constant 672 : index
    %70 = vector.load %arg10[%c0_66, %c672] : memref<4x5120xbf16, #tpu.memory_space<vmem>>, vector<4x512xbf16>
    %c1_67 = arith.constant 1 : index
    %c24_68 = arith.constant 24 : index
    %c0_69 = arith.constant 0 : index
    %71 = vector.load %arg11[%c1_67, %c24_68, %c0_69] : memref<2x36x512xbf16, #tpu.memory_space<vmem>>, vector<1x4x512xbf16>
    %72 = vector.shape_cast %71 : vector<1x4x512xbf16> to vector<4x512xbf16>
    %73 = vector.shape_cast %70 : vector<4x512xbf16> to vector<1x4x512xbf16>
    tpu.vector_store %arg11[%c1_67, %c24_68, %c0_69], %73 {strides = array<i32>} : memref<2x36x512xbf16, #tpu.memory_space<vmem>>, vector<1x4x512xbf16>,
    %c0_70 = arith.constant 0 : index
    %c673 = arith.constant 673 : index
    %74 = vector.load %arg10[%c0_70, %c673] : memref<4x5120xbf16, #tpu.memory_space<vmem>>, vector<4x512xbf16>
    %c1_71 = arith.constant 1 : index
    %c28_72 = arith.constant 28 : index
    %c0_73 = arith.constant 0 : index
    %75 = vector.load %arg11[%c1_71, %c28_72, %c0_73] : memref<2x36x512xbf16, #tpu.memory_space<vmem>>, vector<1x4x512xbf16>
    %76 = vector.shape_cast %75 : vector<1x4x512xbf16> to vector<4x512xbf16>
    %77 = vector.shape_cast %74 : vector<4x512xbf16> to vector<1x4x512xbf16>
    tpu.vector_store %arg11[%c1_71, %c28_72, %c0_73], %77 {strides = array<i32>} : memref<2x36x512xbf16, #tpu.memory_space<vmem>>, vector<1x4x512xbf16>,
    %c0_74 = arith.constant 0 : index
    %c674 = arith.constant 674 : index
    %78 = vector.load %arg10[%c0_74, %c674] : memref<4x5120xbf16, #tpu.memory_space<vmem>>, vector<4x512xbf16>
    %c1_75 = arith.constant 1 : index
    %c32_76 = arith.constant 32 : index
    %c0_77 = arith.constant 0 : index
    %79 = vector.load %arg11[%c1_75, %c32_76, %c0_77] : memref<2x36x512xbf16, #tpu.memory_space<vmem>>, vector<1x4x512xbf16>
    %80 = vector.shape_cast %79 : vector<1x4x512xbf16> to vector<4x512xbf16>
    %81 = vector.shape_cast %78 : vector<4x512xbf16> to vector<1x4x512xbf16>
    tpu.vector_store %arg11[%c1_75, %c32_76, %c0_77], %81 {strides = array<i32>} : memref<2x36x512xbf16, #tpu.memory_space<vmem>>, vector<1x4x512xbf16>,
    %c1_78 = arith.constant 1 : index
    %c0_79 = arith.constant 0 : index
    %c0_80 = arith.constant 0 : index
    %82 = vector.load %arg11[%c1_78, %c0_79, %c0_80] : memref<2x36x512xbf16, #tpu.memory_space<vmem>>, vector<1x36x512xbf16>
    %83 = vector.shape_cast %82 : vector<1x36x512xbf16> to vector<36x512xbf16>
    %cst_81 = arith.constant dense<0.000000e+00> : vector<8x512xf32>
    %84 = tpu.matmul %4, %83, %cst_81 {dimension_numbers = #tpu.dot_dimension_numbers<[1], [0], [0], [1], [0, 0, 1, 1], [], []>} : vector<8x36xbf16>, vector<36x512xbf16>, vector<8x512xf32> -> vector<8x512xf32>
    %85 = arith.truncf %84 : vector<8x512xf32> to vector<8x512xbf16>
    %c0_82 = arith.constant 0 : index
    %c512 = arith.constant 512 : index
    %86 = vector.load %arg12[%c0_82, %c512] : memref<8x4096xbf16, #tpu.memory_space<vmem>>, vector<8x512xbf16>
    tpu.vector_store %arg12[%c0_82, %c512], %85 {strides = array<i32>} : memref<8x4096xbf16, #tpu.memory_space<vmem>>, vector<8x512xbf16>,
    %c0_83 = arith.constant 0 : index
    %c1280 = arith.constant 1280 : index
    %87 = vector.load %arg10[%c0_83, %c1280] : memref<4x5120xbf16, #tpu.memory_space<vmem>>, vector<4x512xbf16>
    %c0_84 = arith.constant 0 : index
    %c0_85 = arith.constant 0 : index
    %c0_86 = arith.constant 0 : index
    %88 = vector.load %arg11[%c0_84, %c0_85, %c0_86] : memref<2x36x512xbf16, #tpu.memory_space<vmem>>, vector<1x4x512xbf16>
    %89 = vector.shape_cast %88 : vector<1x4x512xbf16> to vector<4x512xbf16>
    %90 = vector.shape_cast %87 : vector<4x512xbf16> to vector<1x4x512xbf16>
    tpu.vector_store %arg11[%c0_84, %c0_85, %c0_86], %90 {strides = array<i32>} : memref<2x36x512xbf16, #tpu.memory_space<vmem>>, vector<1x4x512xbf16>,
    %c0_87 = arith.constant 0 : index
    %c1281 = arith.constant 1281 : index
    %91 = vector.load %arg10[%c0_87, %c1281] : memref<4x5120xbf16, #tpu.memory_space<vmem>>, vector<4x512xbf16>
    %c0_88 = arith.constant 0 : index
    %c4_89 = arith.constant 4 : index
    %c0_90 = arith.constant 0 : index
    %92 = vector.load %arg11[%c0_88, %c4_89, %c0_90] : memref<2x36x512xbf16, #tpu.memory_space<vmem>>, vector<1x4x512xbf16>
    %93 = vector.shape_cast %92 : vector<1x4x512xbf16> to vector<4x512xbf16>
    %94 = vector.shape_cast %91 : vector<4x512xbf16> to vector<1x4x512xbf16>
    tpu.vector_store %arg11[%c0_88, %c4_89, %c0_90], %94 {strides = array<i32>} : memref<2x36x512xbf16, #tpu.memory_space<vmem>>, vector<1x4x512xbf16>,
    %c0_91 = arith.constant 0 : index
    %c1282 = arith.constant 1282 : index
    %95 = vector.load %arg10[%c0_91, %c1282] : memref<4x5120xbf16, #tpu.memory_space<vmem>>, vector<4x512xbf16>
    %c0_92 = arith.constant 0 : index
    %c8_93 = arith.constant 8 : index
    %c0_94 = arith.constant 0 : index
    %96 = vector.load %arg11[%c0_92, %c8_93, %c0_94] : memref<2x36x512xbf16, #tpu.memory_space<vmem>>, vector<1x4x512xbf16>
    %97 = vector.shape_cast %96 : vector<1x4x512xbf16> to vector<4x512xbf16>
    %98 = vector.shape_cast %95 : vector<4x512xbf16> to vector<1x4x512xbf16>
    tpu.vector_store %arg11[%c0_92, %c8_93, %c0_94], %98 {strides = array<i32>} : memref<2x36x512xbf16, #tpu.memory_space<vmem>>, vector<1x4x512xbf16>,
    %c0_95 = arith.constant 0 : index
    %c1296 = arith.constant 1296 : index
    %99 = vector.load %arg10[%c0_95, %c1296] : memref<4x5120xbf16, #tpu.memory_space<vmem>>, vector<4x512xbf16>
    %c0_96 = arith.constant 0 : index
    %c12_97 = arith.constant 12 : index
    %c0_98 = arith.constant 0 : index
    %100 = vector.load %arg11[%c0_96, %c12_97, %c0_98] : memref<2x36x512xbf16, #tpu.memory_space<vmem>>, vector<1x4x512xbf16>
    %101 = vector.shape_cast %100 : vector<1x4x512xbf16> to vector<4x512xbf16>
    %102 = vector.shape_cast %99 : vector<4x512xbf16> to vector<1x4x512xbf16>
    tpu.vector_store %arg11[%c0_96, %c12_97, %c0_98], %102 {strides = array<i32>} : memref<2x36x512xbf16, #tpu.memory_space<vmem>>, vector<1x4x512xbf16>,
    %c0_99 = arith.constant 0 : index
    %c1297 = arith.constant 1297 : index
    %103 = vector.load %arg10[%c0_99, %c1297] : memref<4x5120xbf16, #tpu.memory_space<vmem>>, vector<4x512xbf16>
    %c0_100 = arith.constant 0 : index
    %c16_101 = arith.constant 16 : index
    %c0_102 = arith.constant 0 : index
    %104 = vector.load %arg11[%c0_100, %c16_101, %c0_102] : memref<2x36x512xbf16, #tpu.memory_space<vmem>>, vector<1x4x512xbf16>
    %105 = vector.shape_cast %104 : vector<1x4x512xbf16> to vector<4x512xbf16>
    %106 = vector.shape_cast %103 : vector<4x512xbf16> to vector<1x4x512xbf16>
    tpu.vector_store %arg11[%c0_100, %c16_101, %c0_102], %106 {strides = array<i32>} : memref<2x36x512xbf16, #tpu.memory_space<vmem>>, vector<1x4x512xbf16>,
    %c0_103 = arith.constant 0 : index
    %c1298 = arith.constant 1298 : index
    %107 = vector.load %arg10[%c0_103, %c1298] : memref<4x5120xbf16, #tpu.memory_space<vmem>>, vector<4x512xbf16>
    %c0_104 = arith.constant 0 : index
    %c20_105 = arith.constant 20 : index
    %c0_106 = arith.constant 0 : index
    %108 = vector.load %arg11[%c0_104, %c20_105, %c0_106] : memref<2x36x512xbf16, #tpu.memory_space<vmem>>, vector<1x4x512xbf16>
    %109 = vector.shape_cast %108 : vector<1x4x512xbf16> to vector<4x512xbf16>
    %110 = vector.shape_cast %107 : vector<4x512xbf16> to vector<1x4x512xbf16>
    tpu.vector_store %arg11[%c0_104, %c20_105, %c0_106], %110 {strides = array<i32>} : memref<2x36x512xbf16, #tpu.memory_space<vmem>>, vector<1x4x512xbf16>,
    %c0_107 = arith.constant 0 : index
    %c1312 = arith.constant 1312 : index
    %111 = vector.load %arg10[%c0_107, %c1312] : memref<4x5120xbf16, #tpu.memory_space<vmem>>, vector<4x512xbf16>
    %c0_108 = arith.constant 0 : index
    %c24_109 = arith.constant 24 : index
    %c0_110 = arith.constant 0 : index
    %112 = vector.load %arg11[%c0_108, %c24_109, %c0_110] : memref<2x36x512xbf16, #tpu.memory_space<vmem>>, vector<1x4x512xbf16>
    %113 = vector.shape_cast %112 : vector<1x4x512xbf16> to vector<4x512xbf16>
    %114 = vector.shape_cast %111 : vector<4x512xbf16> to vector<1x4x512xbf16>
    tpu.vector_store %arg11[%c0_108, %c24_109, %c0_110], %114 {strides = array<i32>} : memref<2x36x512xbf16, #tpu.memory_space<vmem>>, vector<1x4x512xbf16>,
    %c0_111 = arith.constant 0 : index
    %c1313 = arith.constant 1313 : index
    %115 = vector.load %arg10[%c0_111, %c1313] : memref<4x5120xbf16, #tpu.memory_space<vmem>>, vector<4x512xbf16>
    %c0_112 = arith.constant 0 : index
    %c28_113 = arith.constant 28 : index
    %c0_114 = arith.constant 0 : index
    %116 = vector.load %arg11[%c0_112, %c28_113, %c0_114] : memref<2x36x512xbf16, #tpu.memory_space<vmem>>, vector<1x4x512xbf16>
    %117 = vector.shape_cast %116 : vector<1x4x512xbf16> to vector<4x512xbf16>
    %118 = vector.shape_cast %115 : vector<4x512xbf16> to vector<1x4x512xbf16>
    tpu.vector_store %arg11[%c0_112, %c28_113, %c0_114], %118 {strides = array<i32>} : memref<2x36x512xbf16, #tpu.memory_space<vmem>>, vector<1x4x512xbf16>,
    %c0_115 = arith.constant 0 : index
    %c1314 = arith.constant 1314 : index
    %119 = vector.load %arg10[%c0_115, %c1314] : memref<4x5120xbf16, #tpu.memory_space<vmem>>, vector<4x512xbf16>
    %c0_116 = arith.constant 0 : index
    %c32_117 = arith.constant 32 : index
    %c0_118 = arith.constant 0 : index
    %120 = vector.load %arg11[%c0_116, %c32_117, %c0_118] : memref<2x36x512xbf16, #tpu.memory_space<vmem>>, vector<1x4x512xbf16>
    %121 = vector.shape_cast %120 : vector<1x4x512xbf16> to vector<4x512xbf16>
    %122 = vector.shape_cast %119 : vector<4x512xbf16> to vector<1x4x512xbf16>
    tpu.vector_store %arg11[%c0_116, %c32_117, %c0_118], %122 {strides = array<i32>} : memref<2x36x512xbf16, #tpu.memory_space<vmem>>, vector<1x4x512xbf16>,
    %c0_119 = arith.constant 0 : index
    %c0_120 = arith.constant 0 : index
    %c0_121 = arith.constant 0 : index
    %123 = vector.load %arg11[%c0_119, %c0_120, %c0_121] : memref<2x36x512xbf16, #tpu.memory_space<vmem>>, vector<1x36x512xbf16>
    %124 = vector.shape_cast %123 : vector<1x36x512xbf16> to vector<36x512xbf16>
    %cst_122 = arith.constant dense<0.000000e+00> : vector<8x512xf32>
    %125 = tpu.matmul %4, %124, %cst_122 {dimension_numbers = #tpu.dot_dimension_numbers<[1], [0], [0], [1], [0, 0, 1, 1], [], []>} : vector<8x36xbf16>, vector<36x512xbf16>, vector<8x512xf32> -> vector<8x512xf32>
    %126 = arith.truncf %125 : vector<8x512xf32> to vector<8x512xbf16>
    %c0_123 = arith.constant 0 : index
    %c1024 = arith.constant 1024 : index
    %127 = vector.load %arg12[%c0_123, %c1024] : memref<8x4096xbf16, #tpu.memory_space<vmem>>, vector<8x512xbf16>
    tpu.vector_store %arg12[%c0_123, %c1024], %126 {strides = array<i32>} : memref<8x4096xbf16, #tpu.memory_space<vmem>>, vector<8x512xbf16>,
    %c0_124 = arith.constant 0 : index
    %c1920 = arith.constant 1920 : index
    %128 = vector.load %arg10[%c0_124, %c1920] : memref<4x5120xbf16, #tpu.memory_space<vmem>>, vector<4x512xbf16>
    %c1_125 = arith.constant 1 : index
    %c0_126 = arith.constant 0 : index
    %c0_127 = arith.constant 0 : index
    %129 = vector.load %arg11[%c1_125, %c0_126, %c0_127] : memref<2x36x512xbf16, #tpu.memory_space<vmem>>, vector<1x4x512xbf16>
    %130 = vector.shape_cast %129 : vector<1x4x512xbf16> to vector<4x512xbf16>
    %131 = vector.shape_cast %128 : vector<4x512xbf16> to vector<1x4x512xbf16>
    tpu.vector_store %arg11[%c1_125, %c0_126, %c0_127], %131 {strides = array<i32>} : memref<2x36x512xbf16, #tpu.memory_space<vmem>>, vector<1x4x512xbf16>,
    %c0_128 = arith.constant 0 : index
    %c1921 = arith.constant 1921 : index
    %132 = vector.load %arg10[%c0_128, %c1921] : memref<4x5120xbf16, #tpu.memory_space<vmem>>, vector<4x512xbf16>
    %c1_129 = arith.constant 1 : index
    %c4_130 = arith.constant 4 : index
    %c0_131 = arith.constant 0 : index
    %133 = vector.load %arg11[%c1_129, %c4_130, %c0_131] : memref<2x36x512xbf16, #tpu.memory_space<vmem>>, vector<1x4x512xbf16>
    %134 = vector.shape_cast %133 : vector<1x4x512xbf16> to vector<4x512xbf16>
    %135 = vector.shape_cast %132 : vector<4x512xbf16> to vector<1x4x512xbf16>
    tpu.vector_store %arg11[%c1_129, %c4_130, %c0_131], %135 {strides = array<i32>} : memref<2x36x512xbf16, #tpu.memory_space<vmem>>, vector<1x4x512xbf16>,
    %c0_132 = arith.constant 0 : index
    %c1922 = arith.constant 1922 : index
    %136 = vector.load %arg10[%c0_132, %c1922] : memref<4x5120xbf16, #tpu.memory_space<vmem>>, vector<4x512xbf16>
    %c1_133 = arith.constant 1 : index
    %c8_134 = arith.constant 8 : index
    %c0_135 = arith.constant 0 : index
    %137 = vector.load %arg11[%c1_133, %c8_134, %c0_135] : memref<2x36x512xbf16, #tpu.memory_space<vmem>>, vector<1x4x512xbf16>
    %138 = vector.shape_cast %137 : vector<1x4x512xbf16> to vector<4x512xbf16>
    %139 = vector.shape_cast %136 : vector<4x512xbf16> to vector<1x4x512xbf16>
    tpu.vector_store %arg11[%c1_133, %c8_134, %c0_135], %139 {strides = array<i32>} : memref<2x36x512xbf16, #tpu.memory_space<vmem>>, vector<1x4x512xbf16>,
    %c0_136 = arith.constant 0 : index
    %c1936 = arith.constant 1936 : index
    %140 = vector.load %arg10[%c0_136, %c1936] : memref<4x5120xbf16, #tpu.memory_space<vmem>>, vector<4x512xbf16>
    %c1_137 = arith.constant 1 : index
    %c12_138 = arith.constant 12 : index
    %c0_139 = arith.constant 0 : index
    %141 = vector.load %arg11[%c1_137, %c12_138, %c0_139] : memref<2x36x512xbf16, #tpu.memory_space<vmem>>, vector<1x4x512xbf16>
    %142 = vector.shape_cast %141 : vector<1x4x512xbf16> to vector<4x512xbf16>
    %143 = vector.shape_cast %140 : vector<4x512xbf16> to vector<1x4x512xbf16>
    tpu.vector_store %arg11[%c1_137, %c12_138, %c0_139], %143 {strides = array<i32>} : memref<2x36x512xbf16, #tpu.memory_space<vmem>>, vector<1x4x512xbf16>,
    %c0_140 = arith.constant 0 : index
    %c1937 = arith.constant 1937 : index
    %144 = vector.load %arg10[%c0_140, %c1937] : memref<4x5120xbf16, #tpu.memory_space<vmem>>, vector<4x512xbf16>
    %c1_141 = arith.constant 1 : index
    %c16_142 = arith.constant 16 : index
    %c0_143 = arith.constant 0 : index
    %145 = vector.load %arg11[%c1_141, %c16_142, %c0_143] : memref<2x36x512xbf16, #tpu.memory_space<vmem>>, vector<1x4x512xbf16>
    %146 = vector.shape_cast %145 : vector<1x4x512xbf16> to vector<4x512xbf16>
    %147 = vector.shape_cast %144 : vector<4x512xbf16> to vector<1x4x512xbf16>
    tpu.vector_store %arg11[%c1_141, %c16_142, %c0_143], %147 {strides = array<i32>} : memref<2x36x512xbf16, #tpu.memory_space<vmem>>, vector<1x4x512xbf16>,
    %c0_144 = arith.constant 0 : index
    %c1938 = arith.constant 1938 : index
    %148 = vector.load %arg10[%c0_144, %c1938] : memref<4x5120xbf16, #tpu.memory_space<vmem>>, vector<4x512xbf16>
    %c1_145 = arith.constant 1 : index
    %c20_146 = arith.constant 20 : index
    %c0_147 = arith.constant 0 : index
    %149 = vector.load %arg11[%c1_145, %c20_146, %c0_147] : memref<2x36x512xbf16, #tpu.memory_space<vmem>>, vector<1x4x512xbf16>
    %150 = vector.shape_cast %149 : vector<1x4x512xbf16> to vector<4x512xbf16>
    %151 = vector.shape_cast %148 : vector<4x512xbf16> to vector<1x4x512xbf16>
    tpu.vector_store %arg11[%c1_145, %c20_146, %c0_147], %151 {strides = array<i32>} : memref<2x36x512xbf16, #tpu.memory_space<vmem>>, vector<1x4x512xbf16>,
    %c0_148 = arith.constant 0 : index
    %c1952 = arith.constant 1952 : index
    %152 = vector.load %arg10[%c0_148, %c1952] : memref<4x5120xbf16, #tpu.memory_space<vmem>>, vector<4x512xbf16>
    %c1_149 = arith.constant 1 : index
    %c24_150 = arith.constant 24 : index
    %c0_151 = arith.constant 0 : index
    %153 = vector.load %arg11[%c1_149, %c24_150, %c0_151] : memref<2x36x512xbf16, #tpu.memory_space<vmem>>, vector<1x4x512xbf16>
    %154 = vector.shape_cast %153 : vector<1x4x512xbf16> to vector<4x512xbf16>
    %155 = vector.shape_cast %152 : vector<4x512xbf16> to vector<1x4x512xbf16>
    tpu.vector_store %arg11[%c1_149, %c24_150, %c0_151], %155 {strides = array<i32>} : memref<2x36x512xbf16, #tpu.memory_space<vmem>>, vector<1x4x512xbf16>,
    %c0_152 = arith.constant 0 : index
    %c1953 = arith.constant 1953 : index
    %156 = vector.load %arg10[%c0_152, %c1953] : memref<4x5120xbf16, #tpu.memory_space<vmem>>, vector<4x512xbf16>
    %c1_153 = arith.constant 1 : index
    %c28_154 = arith.constant 28 : index
    %c0_155 = arith.constant 0 : index
    %157 = vector.load %arg11[%c1_153, %c28_154, %c0_155] : memref<2x36x512xbf16, #tpu.memory_space<vmem>>, vector<1x4x512xbf16>
    %158 = vector.shape_cast %157 : vector<1x4x512xbf16> to vector<4x512xbf16>
    %159 = vector.shape_cast %156 : vector<4x512xbf16> to vector<1x4x512xbf16>
    tpu.vector_store %arg11[%c1_153, %c28_154, %c0_155], %159 {strides = array<i32>} : memref<2x36x512xbf16, #tpu.memory_space<vmem>>, vector<1x4x512xbf16>,
    %c0_156 = arith.constant 0 : index
    %c1954 = arith.constant 1954 : index
    %160 = vector.load %arg10[%c0_156, %c1954] : memref<4x5120xbf16, #tpu.memory_space<vmem>>, vector<4x512xbf16>
    %c1_157 = arith.constant 1 : index
    %c32_158 = arith.constant 32 : index
    %c0_159 = arith.constant 0 : index
    %161 = vector.load %arg11[%c1_157, %c32_158, %c0_159] : memref<2x36x512xbf16, #tpu.memory_space<vmem>>, vector<1x4x512xbf16>
    %162 = vector.shape_cast %161 : vector<1x4x512xbf16> to vector<4x512xbf16>
    %163 = vector.shape_cast %160 : vector<4x512xbf16> to vector<1x4x512xbf16>
    tpu.vector_store %arg11[%c1_157, %c32_158, %c0_159], %163 {strides = array<i32>} : memref<2x36x512xbf16, #tpu.memory_space<vmem>>, vector<1x4x512xbf16>,
    %c1_160 = arith.constant 1 : index
    %c0_161 = arith.constant 0 : index
    %c0_162 = arith.constant 0 : index
    %164 = vector.load %arg11[%c1_160, %c0_161, %c0_162] : memref<2x36x512xbf16, #tpu.memory_space<vmem>>, vector<1x36x512xbf16>
    %165 = vector.shape_cast %164 : vector<1x36x512xbf16> to vector<36x512xbf16>
    %cst_163 = arith.constant dense<0.000000e+00> : vector<8x512xf32>
    %166 = tpu.matmul %4, %165, %cst_163 {dimension_numbers = #tpu.dot_dimension_numbers<[1], [0], [0], [1], [0, 0, 1, 1], [], []>} : vector<8x36xbf16>, vector<36x512xbf16>, vector<8x512xf32> -> vector<8x512xf32>
    %167 = arith.truncf %166 : vector<8x512xf32> to vector<8x512xbf16>
    %c0_164 = arith.constant 0 : index
    %c1536 = arith.constant 1536 : index
    %168 = vector.load %arg12[%c0_164, %c1536] : memref<8x4096xbf16, #tpu.memory_space<vmem>>, vector<8x512xbf16>
    tpu.vector_store %arg12[%c0_164, %c1536], %167 {strides = array<i32>} : memref<8x4096xbf16, #tpu.memory_space<vmem>>, vector<8x512xbf16>,
    %c0_165 = arith.constant 0 : index
    %c2560 = arith.constant 2560 : index
    %169 = vector.load %arg10[%c0_165, %c2560] : memref<4x5120xbf16, #tpu.memory_space<vmem>>, vector<4x512xbf16>
    %c0_166 = arith.constant 0 : index
    %c0_167 = arith.constant 0 : index
    %c0_168 = arith.constant 0 : index
    %170 = vector.load %arg11[%c0_166, %c0_167, %c0_168] : memref<2x36x512xbf16, #tpu.memory_space<vmem>>, vector<1x4x512xbf16>
    %171 = vector.shape_cast %170 : vector<1x4x512xbf16> to vector<4x512xbf16>
    %172 = vector.shape_cast %169 : vector<4x512xbf16> to vector<1x4x512xbf16>
    tpu.vector_store %arg11[%c0_166, %c0_167, %c0_168], %172 {strides = array<i32>} : memref<2x36x512xbf16, #tpu.memory_space<vmem>>, vector<1x4x512xbf16>,
    %c0_169 = arith.constant 0 : index
    %c2561 = arith.constant 2561 : index
    %173 = vector.load %arg10[%c0_169, %c2561] : memref<4x5120xbf16, #tpu.memory_space<vmem>>, vector<4x512xbf16>
    %c0_170 = arith.constant 0 : index
    %c4_171 = arith.constant 4 : index
    %c0_172 = arith.constant 0 : index
    %174 = vector.load %arg11[%c0_170, %c4_171, %c0_172] : memref<2x36x512xbf16, #tpu.memory_space<vmem>>, vector<1x4x512xbf16>
    %175 = vector.shape_cast %174 : vector<1x4x512xbf16> to vector<4x512xbf16>
    %176 = vector.shape_cast %173 : vector<4x512xbf16> to vector<1x4x512xbf16>
    tpu.vector_store %arg11[%c0_170, %c4_171, %c0_172], %176 {strides = array<i32>} : memref<2x36x512xbf16, #tpu.memory_space<vmem>>, vector<1x4x512xbf16>,
    %c0_173 = arith.constant 0 : index
    %c2562 = arith.constant 2562 : index
    %177 = vector.load %arg10[%c0_173, %c2562] : memref<4x5120xbf16, #tpu.memory_space<vmem>>, vector<4x512xbf16>
    %c0_174 = arith.constant 0 : index
    %c8_175 = arith.constant 8 : index
    %c0_176 = arith.constant 0 : index
    %178 = vector.load %arg11[%c0_174, %c8_175, %c0_176] : memref<2x36x512xbf16, #tpu.memory_space<vmem>>, vector<1x4x512xbf16>
    %179 = vector.shape_cast %178 : vector<1x4x512xbf16> to vector<4x512xbf16>
    %180 = vector.shape_cast %177 : vector<4x512xbf16> to vector<1x4x512xbf16>
    tpu.vector_store %arg11[%c0_174, %c8_175, %c0_176], %180 {strides = array<i32>} : memref<2x36x512xbf16, #tpu.memory_space<vmem>>, vector<1x4x512xbf16>,
    %c0_177 = arith.constant 0 : index
    %c2576 = arith.constant 2576 : index
    %181 = vector.load %arg10[%c0_177, %c2576] : memref<4x5120xbf16, #tpu.memory_space<vmem>>, vector<4x512xbf16>
    %c0_178 = arith.constant 0 : index
    %c12_179 = arith.constant 12 : index
    %c0_180 = arith.constant 0 : index
    %182 = vector.load %arg11[%c0_178, %c12_179, %c0_180] : memref<2x36x512xbf16, #tpu.memory_space<vmem>>, vector<1x4x512xbf16>
    %183 = vector.shape_cast %182 : vector<1x4x512xbf16> to vector<4x512xbf16>
    %184 = vector.shape_cast %181 : vector<4x512xbf16> to vector<1x4x512xbf16>
    tpu.vector_store %arg11[%c0_178, %c12_179, %c0_180], %184 {strides = array<i32>} : memref<2x36x512xbf16, #tpu.memory_space<vmem>>, vector<1x4x512xbf16>,
    %c0_181 = arith.constant 0 : index
    %c2577 = arith.constant 2577 : index
    %185 = vector.load %arg10[%c0_181, %c2577] : memref<4x5120xbf16, #tpu.memory_space<vmem>>, vector<4x512xbf16>
    %c0_182 = arith.constant 0 : index
    %c16_183 = arith.constant 16 : index
    %c0_184 = arith.constant 0 : index
    %186 = vector.load %arg11[%c0_182, %c16_183, %c0_184] : memref<2x36x512xbf16, #tpu.memory_space<vmem>>, vector<1x4x512xbf16>
    %187 = vector.shape_cast %186 : vector<1x4x512xbf16> to vector<4x512xbf16>
    %188 = vector.shape_cast %185 : vector<4x512xbf16> to vector<1x4x512xbf16>
    tpu.vector_store %arg11[%c0_182, %c16_183, %c0_184], %188 {strides = array<i32>} : memref<2x36x512xbf16, #tpu.memory_space<vmem>>, vector<1x4x512xbf16>,
    %c0_185 = arith.constant 0 : index
    %c2578 = arith.constant 2578 : index
    %189 = vector.load %arg10[%c0_185, %c2578] : memref<4x5120xbf16, #tpu.memory_space<vmem>>, vector<4x512xbf16>
    %c0_186 = arith.constant 0 : index
    %c20_187 = arith.constant 20 : index
    %c0_188 = arith.constant 0 : index
    %190 = vector.load %arg11[%c0_186, %c20_187, %c0_188] : memref<2x36x512xbf16, #tpu.memory_space<vmem>>, vector<1x4x512xbf16>
    %191 = vector.shape_cast %190 : vector<1x4x512xbf16> to vector<4x512xbf16>
    %192 = vector.shape_cast %189 : vector<4x512xbf16> to vector<1x4x512xbf16>
    tpu.vector_store %arg11[%c0_186, %c20_187, %c0_188], %192 {strides = array<i32>} : memref<2x36x512xbf16, #tpu.memory_space<vmem>>, vector<1x4x512xbf16>,
    %c0_189 = arith.constant 0 : index
    %c2592 = arith.constant 2592 : index
    %193 = vector.load %arg10[%c0_189, %c2592] : memref<4x5120xbf16, #tpu.memory_space<vmem>>, vector<4x512xbf16>
    %c0_190 = arith.constant 0 : index
    %c24_191 = arith.constant 24 : index
    %c0_192 = arith.constant 0 : index
    %194 = vector.load %arg11[%c0_190, %c24_191, %c0_192] : memref<2x36x512xbf16, #tpu.memory_space<vmem>>, vector<1x4x512xbf16>
    %195 = vector.shape_cast %194 : vector<1x4x512xbf16> to vector<4x512xbf16>
    %196 = vector.shape_cast %193 : vector<4x512xbf16> to vector<1x4x512xbf16>
    tpu.vector_store %arg11[%c0_190, %c24_191, %c0_192], %196 {strides = array<i32>} : memref<2x36x512xbf16, #tpu.memory_space<vmem>>, vector<1x4x512xbf16>,
    %c0_193 = arith.constant 0 : index
    %c2593 = arith.constant 2593 : index
    %197 = vector.load %arg10[%c0_193, %c2593] : memref<4x5120xbf16, #tpu.memory_space<vmem>>, vector<4x512xbf16>
    %c0_194 = arith.constant 0 : index
    %c28_195 = arith.constant 28 : index
    %c0_196 = arith.constant 0 : index
    %198 = vector.load %arg11[%c0_194, %c28_195, %c0_196] : memref<2x36x512xbf16, #tpu.memory_space<vmem>>, vector<1x4x512xbf16>
    %199 = vector.shape_cast %198 : vector<1x4x512xbf16> to vector<4x512xbf16>
    %200 = vector.shape_cast %197 : vector<4x512xbf16> to vector<1x4x512xbf16>
    tpu.vector_store %arg11[%c0_194, %c28_195, %c0_196], %200 {strides = array<i32>} : memref<2x36x512xbf16, #tpu.memory_space<vmem>>, vector<1x4x512xbf16>,
    %c0_197 = arith.constant 0 : index
    %c2594 = arith.constant 2594 : index
    %201 = vector.load %arg10[%c0_197, %c2594] : memref<4x5120xbf16, #tpu.memory_space<vmem>>, vector<4x512xbf16>
    %c0_198 = arith.constant 0 : index
    %c32_199 = arith.constant 32 : index
    %c0_200 = arith.constant 0 : index
    %202 = vector.load %arg11[%c0_198, %c32_199, %c0_200] : memref<2x36x512xbf16, #tpu.memory_space<vmem>>, vector<1x4x512xbf16>
    %203 = vector.shape_cast %202 : vector<1x4x512xbf16> to vector<4x512xbf16>
    %204 = vector.shape_cast %201 : vector<4x512xbf16> to vector<1x4x512xbf16>
    tpu.vector_store %arg11[%c0_198, %c32_199, %c0_200], %204 {strides = array<i32>} : memref<2x36x512xbf16, #tpu.memory_space<vmem>>, vector<1x4x512xbf16>,
    %c0_201 = arith.constant 0 : index
    %c0_202 = arith.constant 0 : index
    %c0_203 = arith.constant 0 : index
    %205 = vector.load %arg11[%c0_201, %c0_202, %c0_203] : memref<2x36x512xbf16, #tpu.memory_space<vmem>>, vector<1x36x512xbf16>
    %206 = vector.shape_cast %205 : vector<1x36x512xbf16> to vector<36x512xbf16>
    %cst_204 = arith.constant dense<0.000000e+00> : vector<8x512xf32>
    %207 = tpu.matmul %4, %206, %cst_204 {dimension_numbers = #tpu.dot_dimension_numbers<[1], [0], [0], [1], [0, 0, 1, 1], [], []>} : vector<8x36xbf16>, vector<36x512xbf16>, vector<8x512xf32> -> vector<8x512xf32>
    %208 = arith.truncf %207 : vector<8x512xf32> to vector<8x512xbf16>
    %c0_205 = arith.constant 0 : index
    %c2048 = arith.constant 2048 : index
    %209 = vector.load %arg12[%c0_205, %c2048] : memref<8x4096xbf16, #tpu.memory_space<vmem>>, vector<8x512xbf16>
    tpu.vector_store %arg12[%c0_205, %c2048], %208 {strides = array<i32>} : memref<8x4096xbf16, #tpu.memory_space<vmem>>, vector<8x512xbf16>,
    %c0_206 = arith.constant 0 : index
    %c3200 = arith.constant 3200 : index
    %210 = vector.load %arg10[%c0_206, %c3200] : memref<4x5120xbf16, #tpu.memory_space<vmem>>, vector<4x512xbf16>
    %c1_207 = arith.constant 1 : index
    %c0_208 = arith.constant 0 : index
    %c0_209 = arith.constant 0 : index
    %211 = vector.load %arg11[%c1_207, %c0_208, %c0_209] : memref<2x36x512xbf16, #tpu.memory_space<vmem>>, vector<1x4x512xbf16>
    %212 = vector.shape_cast %211 : vector<1x4x512xbf16> to vector<4x512xbf16>
    %213 = vector.shape_cast %210 : vector<4x512xbf16> to vector<1x4x512xbf16>
    tpu.vector_store %arg11[%c1_207, %c0_208, %c0_209], %213 {strides = array<i32>} : memref<2x36x512xbf16, #tpu.memory_space<vmem>>, vector<1x4x512xbf16>,
    %c0_210 = arith.constant 0 : index
    %c3201 = arith.constant 3201 : index
    %214 = vector.load %arg10[%c0_210, %c3201] : memref<4x5120xbf16, #tpu.memory_space<vmem>>, vector<4x512xbf16>
    %c1_211 = arith.constant 1 : index
    %c4_212 = arith.constant 4 : index
    %c0_213 = arith.constant 0 : index
    %215 = vector.load %arg11[%c1_211, %c4_212, %c0_213] : memref<2x36x512xbf16, #tpu.memory_space<vmem>>, vector<1x4x512xbf16>
    %216 = vector.shape_cast %215 : vector<1x4x512xbf16> to vector<4x512xbf16>
    %217 = vector.shape_cast %214 : vector<4x512xbf16> to vector<1x4x512xbf16>
    tpu.vector_store %arg11[%c1_211, %c4_212, %c0_213], %217 {strides = array<i32>} : memref<2x36x512xbf16, #tpu.memory_space<vmem>>, vector<1x4x512xbf16>,
    %c0_214 = arith.constant 0 : index
    %c3202 = arith.constant 3202 : index
    %218 = vector.load %arg10[%c0_214, %c3202] : memref<4x5120xbf16, #tpu.memory_space<vmem>>, vector<4x512xbf16>
    %c1_215 = arith.constant 1 : index
    %c8_216 = arith.constant 8 : index
    %c0_217 = arith.constant 0 : index
    %219 = vector.load %arg11[%c1_215, %c8_216, %c0_217] : memref<2x36x512xbf16, #tpu.memory_space<vmem>>, vector<1x4x512xbf16>
    %220 = vector.shape_cast %219 : vector<1x4x512xbf16> to vector<4x512xbf16>
    %221 = vector.shape_cast %218 : vector<4x512xbf16> to vector<1x4x512xbf16>
    tpu.vector_store %arg11[%c1_215, %c8_216, %c0_217], %221 {strides = array<i32>} : memref<2x36x512xbf16, #tpu.memory_space<vmem>>, vector<1x4x512xbf16>,
    %c0_218 = arith.constant 0 : index
    %c3216 = arith.constant 3216 : index
    %222 = vector.load %arg10[%c0_218, %c3216] : memref<4x5120xbf16, #tpu.memory_space<vmem>>, vector<4x512xbf16>
    %c1_219 = arith.constant 1 : index
    %c12_220 = arith.constant 12 : index
    %c0_221 = arith.constant 0 : index
    %223 = vector.load %arg11[%c1_219, %c12_220, %c0_221] : memref<2x36x512xbf16, #tpu.memory_space<vmem>>, vector<1x4x512xbf16>
    %224 = vector.shape_cast %223 : vector<1x4x512xbf16> to vector<4x512xbf16>
    %225 = vector.shape_cast %222 : vector<4x512xbf16> to vector<1x4x512xbf16>
    tpu.vector_store %arg11[%c1_219, %c12_220, %c0_221], %225 {strides = array<i32>} : memref<2x36x512xbf16, #tpu.memory_space<vmem>>, vector<1x4x512xbf16>,
    %c0_222 = arith.constant 0 : index
    %c3217 = arith.constant 3217 : index
    %226 = vector.load %arg10[%c0_222, %c3217] : memref<4x5120xbf16, #tpu.memory_space<vmem>>, vector<4x512xbf16>
    %c1_223 = arith.constant 1 : index
    %c16_224 = arith.constant 16 : index
    %c0_225 = arith.constant 0 : index
    %227 = vector.load %arg11[%c1_223, %c16_224, %c0_225] : memref<2x36x512xbf16, #tpu.memory_space<vmem>>, vector<1x4x512xbf16>
    %228 = vector.shape_cast %227 : vector<1x4x512xbf16> to vector<4x512xbf16>
    %229 = vector.shape_cast %226 : vector<4x512xbf16> to vector<1x4x512xbf16>
    tpu.vector_store %arg11[%c1_223, %c16_224, %c0_225], %229 {strides = array<i32>} : memref<2x36x512xbf16, #tpu.memory_space<vmem>>, vector<1x4x512xbf16>,
    %c0_226 = arith.constant 0 : index
    %c3218 = arith.constant 3218 : index
    %230 = vector.load %arg10[%c0_226, %c3218] : memref<4x5120xbf16, #tpu.memory_space<vmem>>, vector<4x512xbf16>
    %c1_227 = arith.constant 1 : index
    %c20_228 = arith.constant 20 : index
    %c0_229 = arith.constant 0 : index
    %231 = vector.load %arg11[%c1_227, %c20_228, %c0_229] : memref<2x36x512xbf16, #tpu.memory_space<vmem>>, vector<1x4x512xbf16>
    %232 = vector.shape_cast %231 : vector<1x4x512xbf16> to vector<4x512xbf16>
    %233 = vector.shape_cast %230 : vector<4x512xbf16> to vector<1x4x512xbf16>
    tpu.vector_store %arg11[%c1_227, %c20_228, %c0_229], %233 {strides = array<i32>} : memref<2x36x512xbf16, #tpu.memory_space<vmem>>, vector<1x4x512xbf16>,
    %c0_230 = arith.constant 0 : index
    %c3232 = arith.constant 3232 : index
    %234 = vector.load %arg10[%c0_230, %c3232] : memref<4x5120xbf16, #tpu.memory_space<vmem>>, vector<4x512xbf16>
    %c1_231 = arith.constant 1 : index
    %c24_232 = arith.constant 24 : index
    %c0_233 = arith.constant 0 : index
    %235 = vector.load %arg11[%c1_231, %c24_232, %c0_233] : memref<2x36x512xbf16, #tpu.memory_space<vmem>>, vector<1x4x512xbf16>
    %236 = vector.shape_cast %235 : vector<1x4x512xbf16> to vector<4x512xbf16>
    %237 = vector.shape_cast %234 : vector<4x512xbf16> to vector<1x4x512xbf16>
    tpu.vector_store %arg11[%c1_231, %c24_232, %c0_233], %237 {strides = array<i32>} : memref<2x36x512xbf16, #tpu.memory_space<vmem>>, vector<1x4x512xbf16>,
    %c0_234 = arith.constant 0 : index
    %c3233 = arith.constant 3233 : index
    %238 = vector.load %arg10[%c0_234, %c3233] : memref<4x5120xbf16, #tpu.memory_space<vmem>>, vector<4x512xbf16>
    %c1_235 = arith.constant 1 : index
    %c28_236 = arith.constant 28 : index
    %c0_237 = arith.constant 0 : index
    %239 = vector.load %arg11[%c1_235, %c28_236, %c0_237] : memref<2x36x512xbf16, #tpu.memory_space<vmem>>, vector<1x4x512xbf16>
    %240 = vector.shape_cast %239 : vector<1x4x512xbf16> to vector<4x512xbf16>
    %241 = vector.shape_cast %238 : vector<4x512xbf16> to vector<1x4x512xbf16>
    tpu.vector_store %arg11[%c1_235, %c28_236, %c0_237], %241 {strides = array<i32>} : memref<2x36x512xbf16, #tpu.memory_space<vmem>>, vector<1x4x512xbf16>,
    %c0_238 = arith.constant 0 : index
    %c3234 = arith.constant 3234 : index
    %242 = vector.load %arg10[%c0_238, %c3234] : memref<4x5120xbf16, #tpu.memory_space<vmem>>, vector<4x512xbf16>
    %c1_239 = arith.constant 1 : index
    %c32_240 = arith.constant 32 : index
    %c0_241 = arith.constant 0 : index
    %243 = vector.load %arg11[%c1_239, %c32_240, %c0_241] : memref<2x36x512xbf16, #tpu.memory_space<vmem>>, vector<1x4x512xbf16>
    %244 = vector.shape_cast %243 : vector<1x4x512xbf16> to vector<4x512xbf16>
    %245 = vector.shape_cast %242 : vector<4x512xbf16> to vector<1x4x512xbf16>
    tpu.vector_store %arg11[%c1_239, %c32_240, %c0_241], %245 {strides = array<i32>} : memref<2x36x512xbf16, #tpu.memory_space<vmem>>, vector<1x4x512xbf16>,
    %c1_242 = arith.constant 1 : index
    %c0_243 = arith.constant 0 : index
    %c0_244 = arith.constant 0 : index
    %246 = vector.load %arg11[%c1_242, %c0_243, %c0_244] : memref<2x36x512xbf16, #tpu.memory_space<vmem>>, vector<1x36x512xbf16>
    %247 = vector.shape_cast %246 : vector<1x36x512xbf16> to vector<36x512xbf16>
    %cst_245 = arith.constant dense<0.000000e+00> : vector<8x512xf32>
    %248 = tpu.matmul %4, %247, %cst_245 {dimension_numbers = #tpu.dot_dimension_numbers<[1], [0], [0], [1], [0, 0, 1, 1], [], []>} : vector<8x36xbf16>, vector<36x512xbf16>, vector<8x512xf32> -> vector<8x512xf32>
    %249 = arith.truncf %248 : vector<8x512xf32> to vector<8x512xbf16>
    %c0_246 = arith.constant 0 : index
    %c2560_247 = arith.constant 2560 : index
    %250 = vector.load %arg12[%c0_246, %c2560_247] : memref<8x4096xbf16, #tpu.memory_space<vmem>>, vector<8x512xbf16>
    tpu.vector_store %arg12[%c0_246, %c2560_247], %249 {strides = array<i32>} : memref<8x4096xbf16, #tpu.memory_space<vmem>>, vector<8x512xbf16>,
    %c0_248 = arith.constant 0 : index
    %c3840 = arith.constant 3840 : index
    %251 = vector.load %arg10[%c0_248, %c3840] : memref<4x5120xbf16, #tpu.memory_space<vmem>>, vector<4x512xbf16>
    %c0_249 = arith.constant 0 : index
    %c0_250 = arith.constant 0 : index
    %c0_251 = arith.constant 0 : index
    %252 = vector.load %arg11[%c0_249, %c0_250, %c0_251] : memref<2x36x512xbf16, #tpu.memory_space<vmem>>, vector<1x4x512xbf16>
    %253 = vector.shape_cast %252 : vector<1x4x512xbf16> to vector<4x512xbf16>
    %254 = vector.shape_cast %251 : vector<4x512xbf16> to vector<1x4x512xbf16>
    tpu.vector_store %arg11[%c0_249, %c0_250, %c0_251], %254 {strides = array<i32>} : memref<2x36x512xbf16, #tpu.memory_space<vmem>>, vector<1x4x512xbf16>,
    %c0_252 = arith.constant 0 : index
    %c3841 = arith.constant 3841 : index
    %255 = vector.load %arg10[%c0_252, %c3841] : memref<4x5120xbf16, #tpu.memory_space<vmem>>, vector<4x512xbf16>
    %c0_253 = arith.constant 0 : index
    %c4_254 = arith.constant 4 : index
    %c0_255 = arith.constant 0 : index
    %256 = vector.load %arg11[%c0_253, %c4_254, %c0_255] : memref<2x36x512xbf16, #tpu.memory_space<vmem>>, vector<1x4x512xbf16>
    %257 = vector.shape_cast %256 : vector<1x4x512xbf16> to vector<4x512xbf16>
    %258 = vector.shape_cast %255 : vector<4x512xbf16> to vector<1x4x512xbf16>
    tpu.vector_store %arg11[%c0_253, %c4_254, %c0_255], %258 {strides = array<i32>} : memref<2x36x512xbf16, #tpu.memory_space<vmem>>, vector<1x4x512xbf16>,
    %c0_256 = arith.constant 0 : index
    %c3842 = arith.constant 3842 : index
    %259 = vector.load %arg10[%c0_256, %c3842] : memref<4x5120xbf16, #tpu.memory_space<vmem>>, vector<4x512xbf16>
    %c0_257 = arith.constant 0 : index
    %c8_258 = arith.constant 8 : index
    %c0_259 = arith.constant 0 : index
    %260 = vector.load %arg11[%c0_257, %c8_258, %c0_259] : memref<2x36x512xbf16, #tpu.memory_space<vmem>>, vector<1x4x512xbf16>
    %261 = vector.shape_cast %260 : vector<1x4x512xbf16> to vector<4x512xbf16>
    %262 = vector.shape_cast %259 : vector<4x512xbf16> to vector<1x4x512xbf16>
    tpu.vector_store %arg11[%c0_257, %c8_258, %c0_259], %262 {strides = array<i32>} : memref<2x36x512xbf16, #tpu.memory_space<vmem>>, vector<1x4x512xbf16>,
    %c0_260 = arith.constant 0 : index
    %c3856 = arith.constant 3856 : index
    %263 = vector.load %arg10[%c0_260, %c3856] : memref<4x5120xbf16, #tpu.memory_space<vmem>>, vector<4x512xbf16>
    %c0_261 = arith.constant 0 : index
    %c12_262 = arith.constant 12 : index
    %c0_263 = arith.constant 0 : index
    %264 = vector.load %arg11[%c0_261, %c12_262, %c0_263] : memref<2x36x512xbf16, #tpu.memory_space<vmem>>, vector<1x4x512xbf16>
    %265 = vector.shape_cast %264 : vector<1x4x512xbf16> to vector<4x512xbf16>
    %266 = vector.shape_cast %263 : vector<4x512xbf16> to vector<1x4x512xbf16>
    tpu.vector_store %arg11[%c0_261, %c12_262, %c0_263], %266 {strides = array<i32>} : memref<2x36x512xbf16, #tpu.memory_space<vmem>>, vector<1x4x512xbf16>,
    %c0_264 = arith.constant 0 : index
    %c3857 = arith.constant 3857 : index
    %267 = vector.load %arg10[%c0_264, %c3857] : memref<4x5120xbf16, #tpu.memory_space<vmem>>, vector<4x512xbf16>
    %c0_265 = arith.constant 0 : index
    %c16_266 = arith.constant 16 : index
    %c0_267 = arith.constant 0 : index
    %268 = vector.load %arg11[%c0_265, %c16_266, %c0_267] : memref<2x36x512xbf16, #tpu.memory_space<vmem>>, vector<1x4x512xbf16>
    %269 = vector.shape_cast %268 : vector<1x4x512xbf16> to vector<4x512xbf16>
    %270 = vector.shape_cast %267 : vector<4x512xbf16> to vector<1x4x512xbf16>
    tpu.vector_store %arg11[%c0_265, %c16_266, %c0_267], %270 {strides = array<i32>} : memref<2x36x512xbf16, #tpu.memory_space<vmem>>, vector<1x4x512xbf16>,
    %c0_268 = arith.constant 0 : index
    %c3858 = arith.constant 3858 : index
    %271 = vector.load %arg10[%c0_268, %c3858] : memref<4x5120xbf16, #tpu.memory_space<vmem>>, vector<4x512xbf16>
    %c0_269 = arith.constant 0 : index
    %c20_270 = arith.constant 20 : index
    %c0_271 = arith.constant 0 : index
    %272 = vector.load %arg11[%c0_269, %c20_270, %c0_271] : memref<2x36x512xbf16, #tpu.memory_space<vmem>>, vector<1x4x512xbf16>
    %273 = vector.shape_cast %272 : vector<1x4x512xbf16> to vector<4x512xbf16>
    %274 = vector.shape_cast %271 : vector<4x512xbf16> to vector<1x4x512xbf16>
    tpu.vector_store %arg11[%c0_269, %c20_270, %c0_271], %274 {strides = array<i32>} : memref<2x36x512xbf16, #tpu.memory_space<vmem>>, vector<1x4x512xbf16>,
    %c0_272 = arith.constant 0 : index
    %c3872 = arith.constant 3872 : index
    %275 = vector.load %arg10[%c0_272, %c3872] : memref<4x5120xbf16, #tpu.memory_space<vmem>>, vector<4x512xbf16>
    %c0_273 = arith.constant 0 : index
    %c24_274 = arith.constant 24 : index
    %c0_275 = arith.constant 0 : index
    %276 = vector.load %arg11[%c0_273, %c24_274, %c0_275] : memref<2x36x512xbf16, #tpu.memory_space<vmem>>, vector<1x4x512xbf16>
    %277 = vector.shape_cast %276 : vector<1x4x512xbf16> to vector<4x512xbf16>
    %278 = vector.shape_cast %275 : vector<4x512xbf16> to vector<1x4x512xbf16>
    tpu.vector_store %arg11[%c0_273, %c24_274, %c0_275], %278 {strides = array<i32>} : memref<2x36x512xbf16, #tpu.memory_space<vmem>>, vector<1x4x512xbf16>,
    %c0_276 = arith.constant 0 : index
    %c3873 = arith.constant 3873 : index
    %279 = vector.load %arg10[%c0_276, %c3873] : memref<4x5120xbf16, #tpu.memory_space<vmem>>, vector<4x512xbf16>
    %c0_277 = arith.constant 0 : index
    %c28_278 = arith.constant 28 : index
    %c0_279 = arith.constant 0 : index
    %280 = vector.load %arg11[%c0_277, %c28_278, %c0_279] : memref<2x36x512xbf16, #tpu.memory_space<vmem>>, vector<1x4x512xbf16>
    %281 = vector.shape_cast %280 : vector<1x4x512xbf16> to vector<4x512xbf16>
    %282 = vector.shape_cast %279 : vector<4x512xbf16> to vector<1x4x512xbf16>
    tpu.vector_store %arg11[%c0_277, %c28_278, %c0_279], %282 {strides = array<i32>} : memref<2x36x512xbf16, #tpu.memory_space<vmem>>, vector<1x4x512xbf16>,
    %c0_280 = arith.constant 0 : index
    %c3874 = arith.constant 3874 : index
    %283 = vector.load %arg10[%c0_280, %c3874] : memref<4x5120xbf16, #tpu.memory_space<vmem>>, vector<4x512xbf16>
    %c0_281 = arith.constant 0 : index
    %c32_282 = arith.constant 32 : index
    %c0_283 = arith.constant 0 : index
    %284 = vector.load %arg11[%c0_281, %c32_282, %c0_283] : memref<2x36x512xbf16, #tpu.memory_space<vmem>>, vector<1x4x512xbf16>
    %285 = vector.shape_cast %284 : vector<1x4x512xbf16> to vector<4x512xbf16>
    %286 = vector.shape_cast %283 : vector<4x512xbf16> to vector<1x4x512xbf16>
    tpu.vector_store %arg11[%c0_281, %c32_282, %c0_283], %286 {strides = array<i32>} : memref<2x36x512xbf16, #tpu.memory_space<vmem>>, vector<1x4x512xbf16>,
    %c0_284 = arith.constant 0 : index
    %c0_285 = arith.constant 0 : index
    %c0_286 = arith.constant 0 : index
    %287 = vector.load %arg11[%c0_284, %c0_285, %c0_286] : memref<2x36x512xbf16, #tpu.memory_space<vmem>>, vector<1x36x512xbf16>
    %288 = vector.shape_cast %287 : vector<1x36x512xbf16> to vector<36x512xbf16>
    %cst_287 = arith.constant dense<0.000000e+00> : vector<8x512xf32>
    %289 = tpu.matmul %4, %288, %cst_287 {dimension_numbers = #tpu.dot_dimension_numbers<[1], [0], [0], [1], [0, 0, 1, 1], [], []>} : vector<8x36xbf16>, vector<36x512xbf16>, vector<8x512xf32> -> vector<8x512xf32>
    %290 = arith.truncf %289 : vector<8x512xf32> to vector<8x512xbf16>
    %c0_288 = arith.constant 0 : index
    %c3072 = arith.constant 3072 : index
    %291 = vector.load %arg12[%c0_288, %c3072] : memref<8x4096xbf16, #tpu.memory_space<vmem>>, vector<8x512xbf16>
    tpu.vector_store %arg12[%c0_288, %c3072], %290 {strides = array<i32>} : memref<8x4096xbf16, #tpu.memory_space<vmem>>, vector<8x512xbf16>,
    %c0_289 = arith.constant 0 : index
    %c4480 = arith.constant 4480 : index
    %292 = vector.load %arg10[%c0_289, %c4480] : memref<4x5120xbf16, #tpu.memory_space<vmem>>, vector<4x512xbf16>
    %c1_290 = arith.constant 1 : index
    %c0_291 = arith.constant 0 : index
    %c0_292 = arith.constant 0 : index
    %293 = vector.load %arg11[%c1_290, %c0_291, %c0_292] : memref<2x36x512xbf16, #tpu.memory_space<vmem>>, vector<1x4x512xbf16>
    %294 = vector.shape_cast %293 : vector<1x4x512xbf16> to vector<4x512xbf16>
    %295 = vector.shape_cast %292 : vector<4x512xbf16> to vector<1x4x512xbf16>
    tpu.vector_store %arg11[%c1_290, %c0_291, %c0_292], %295 {strides = array<i32>} : memref<2x36x512xbf16, #tpu.memory_space<vmem>>, vector<1x4x512xbf16>,
    %c0_293 = arith.constant 0 : index
    %c4481 = arith.constant 4481 : index
    %296 = vector.load %arg10[%c0_293, %c4481] : memref<4x5120xbf16, #tpu.memory_space<vmem>>, vector<4x512xbf16>
    %c1_294 = arith.constant 1 : index
    %c4_295 = arith.constant 4 : index
    %c0_296 = arith.constant 0 : index
    %297 = vector.load %arg11[%c1_294, %c4_295, %c0_296] : memref<2x36x512xbf16, #tpu.memory_space<vmem>>, vector<1x4x512xbf16>
    %298 = vector.shape_cast %297 : vector<1x4x512xbf16> to vector<4x512xbf16>
    %299 = vector.shape_cast %296 : vector<4x512xbf16> to vector<1x4x512xbf16>
    tpu.vector_store %arg11[%c1_294, %c4_295, %c0_296], %299 {strides = array<i32>} : memref<2x36x512xbf16, #tpu.memory_space<vmem>>, vector<1x4x512xbf16>,
    %c0_297 = arith.constant 0 : index
    %c4482 = arith.constant 4482 : index
    %300 = vector.load %arg10[%c0_297, %c4482] : memref<4x5120xbf16, #tpu.memory_space<vmem>>, vector<4x512xbf16>
    %c1_298 = arith.constant 1 : index
    %c8_299 = arith.constant 8 : index
    %c0_300 = arith.constant 0 : index
    %301 = vector.load %arg11[%c1_298, %c8_299, %c0_300] : memref<2x36x512xbf16, #tpu.memory_space<vmem>>, vector<1x4x512xbf16>
    %302 = vector.shape_cast %301 : vector<1x4x512xbf16> to vector<4x512xbf16>
    %303 = vector.shape_cast %300 : vector<4x512xbf16> to vector<1x4x512xbf16>
    tpu.vector_store %arg11[%c1_298, %c8_299, %c0_300], %303 {strides = array<i32>} : memref<2x36x512xbf16, #tpu.memory_space<vmem>>, vector<1x4x512xbf16>,
    %c0_301 = arith.constant 0 : index
    %c4496 = arith.constant 4496 : index
    %304 = vector.load %arg10[%c0_301, %c4496] : memref<4x5120xbf16, #tpu.memory_space<vmem>>, vector<4x512xbf16>
    %c1_302 = arith.constant 1 : index
    %c12_303 = arith.constant 12 : index
    %c0_304 = arith.constant 0 : index
    %305 = vector.load %arg11[%c1_302, %c12_303, %c0_304] : memref<2x36x512xbf16, #tpu.memory_space<vmem>>, vector<1x4x512xbf16>
    %306 = vector.shape_cast %305 : vector<1x4x512xbf16> to vector<4x512xbf16>
    %307 = vector.shape_cast %304 : vector<4x512xbf16> to vector<1x4x512xbf16>
    tpu.vector_store %arg11[%c1_302, %c12_303, %c0_304], %307 {strides = array<i32>} : memref<2x36x512xbf16, #tpu.memory_space<vmem>>, vector<1x4x512xbf16>,
    %c0_305 = arith.constant 0 : index
    %c4497 = arith.constant 4497 : index
    %308 = vector.load %arg10[%c0_305, %c4497] : memref<4x5120xbf16, #tpu.memory_space<vmem>>, vector<4x512xbf16>
    %c1_306 = arith.constant 1 : index
    %c16_307 = arith.constant 16 : index
    %c0_308 = arith.constant 0 : index
    %309 = vector.load %arg11[%c1_306, %c16_307, %c0_308] : memref<2x36x512xbf16, #tpu.memory_space<vmem>>, vector<1x4x512xbf16>
    %310 = vector.shape_cast %309 : vector<1x4x512xbf16> to vector<4x512xbf16>
    %311 = vector.shape_cast %308 : vector<4x512xbf16> to vector<1x4x512xbf16>
    tpu.vector_store %arg11[%c1_306, %c16_307, %c0_308], %311 {strides = array<i32>} : memref<2x36x512xbf16, #tpu.memory_space<vmem>>, vector<1x4x512xbf16>,
    %c0_309 = arith.constant 0 : index
    %c4498 = arith.constant 4498 : index
    %312 = vector.load %arg10[%c0_309, %c4498] : memref<4x5120xbf16, #tpu.memory_space<vmem>>, vector<4x512xbf16>
    %c1_310 = arith.constant 1 : index
    %c20_311 = arith.constant 20 : index
    %c0_312 = arith.constant 0 : index
    %313 = vector.load %arg11[%c1_310, %c20_311, %c0_312] : memref<2x36x512xbf16, #tpu.memory_space<vmem>>, vector<1x4x512xbf16>
    %314 = vector.shape_cast %313 : vector<1x4x512xbf16> to vector<4x512xbf16>
    %315 = vector.shape_cast %312 : vector<4x512xbf16> to vector<1x4x512xbf16>
    tpu.vector_store %arg11[%c1_310, %c20_311, %c0_312], %315 {strides = array<i32>} : memref<2x36x512xbf16, #tpu.memory_space<vmem>>, vector<1x4x512xbf16>,
    %c0_313 = arith.constant 0 : index
    %c4512 = arith.constant 4512 : index
    %316 = vector.load %arg10[%c0_313, %c4512] : memref<4x5120xbf16, #tpu.memory_space<vmem>>, vector<4x512xbf16>
    %c1_314 = arith.constant 1 : index
    %c24_315 = arith.constant 24 : index
    %c0_316 = arith.constant 0 : index
    %317 = vector.load %arg11[%c1_314, %c24_315, %c0_316] : memref<2x36x512xbf16, #tpu.memory_space<vmem>>, vector<1x4x512xbf16>
    %318 = vector.shape_cast %317 : vector<1x4x512xbf16> to vector<4x512xbf16>
    %319 = vector.shape_cast %316 : vector<4x512xbf16> to vector<1x4x512xbf16>
    tpu.vector_store %arg11[%c1_314, %c24_315, %c0_316], %319 {strides = array<i32>} : memref<2x36x512xbf16, #tpu.memory_space<vmem>>, vector<1x4x512xbf16>,
    %c0_317 = arith.constant 0 : index
    %c4513 = arith.constant 4513 : index
    %320 = vector.load %arg10[%c0_317, %c4513] : memref<4x5120xbf16, #tpu.memory_space<vmem>>, vector<4x512xbf16>
    %c1_318 = arith.constant 1 : index
    %c28_319 = arith.constant 28 : index
    %c0_320 = arith.constant 0 : index
    %321 = vector.load %arg11[%c1_318, %c28_319, %c0_320] : memref<2x36x512xbf16, #tpu.memory_space<vmem>>, vector<1x4x512xbf16>
    %322 = vector.shape_cast %321 : vector<1x4x512xbf16> to vector<4x512xbf16>
    %323 = vector.shape_cast %320 : vector<4x512xbf16> to vector<1x4x512xbf16>
    tpu.vector_store %arg11[%c1_318, %c28_319, %c0_320], %323 {strides = array<i32>} : memref<2x36x512xbf16, #tpu.memory_space<vmem>>, vector<1x4x512xbf16>,
    %c0_321 = arith.constant 0 : index
    %c4514 = arith.constant 4514 : index
    %324 = vector.load %arg10[%c0_321, %c4514] : memref<4x5120xbf16, #tpu.memory_space<vmem>>, vector<4x512xbf16>
    %c1_322 = arith.constant 1 : index
    %c32_323 = arith.constant 32 : index
    %c0_324 = arith.constant 0 : index
    %325 = vector.load %arg11[%c1_322, %c32_323, %c0_324] : memref<2x36x512xbf16, #tpu.memory_space<vmem>>, vector<1x4x512xbf16>
    %326 = vector.shape_cast %325 : vector<1x4x512xbf16> to vector<4x512xbf16>
    %327 = vector.shape_cast %324 : vector<4x512xbf16> to vector<1x4x512xbf16>
    tpu.vector_store %arg11[%c1_322, %c32_323, %c0_324], %327 {strides = array<i32>} : memref<2x36x512xbf16, #tpu.memory_space<vmem>>, vector<1x4x512xbf16>,
    %c1_325 = arith.constant 1 : index
    %c0_326 = arith.constant 0 : index
    %c0_327 = arith.constant 0 : index
    %328 = vector.load %arg11[%c1_325, %c0_326, %c0_327] : memref<2x36x512xbf16, #tpu.memory_space<vmem>>, vector<1x36x512xbf16>
    %329 = vector.shape_cast %328 : vector<1x36x512xbf16> to vector<36x512xbf16>
    %cst_328 = arith.constant dense<0.000000e+00> : vector<8x512xf32>
    %330 = tpu.matmul %4, %329, %cst_328 {dimension_numbers = #tpu.dot_dimension_numbers<[1], [0], [0], [1], [0, 0, 1, 1], [], []>} : vector<8x36xbf16>, vector<36x512xbf16>, vector<8x512xf32> -> vector<8x512xf32>
    %331 = arith.truncf %330 : vector<8x512xf32> to vector<8x512xbf16>
    %c0_329 = arith.constant 0 : index
    %c3584 = arith.constant 3584 : index
    %332 = vector.load %arg12[%c0_329, %c3584] : memref<8x4096xbf16, #tpu.memory_space<vmem>>, vector<8x512xbf16>
    tpu.vector_store %arg12[%c0_329, %c3584], %331 {strides = array<i32>} : memref<8x4096xbf16, #tpu.memory_space<vmem>>, vector<8x512xbf16>,
    %c0_330 = arith.constant 0 : index
    %c0_331 = arith.constant 0 : index
    %c0_332 = arith.constant 0 : index
    %333 = vector.load %arg3[%c0_330, %c0_331, %c0_332] : memref<3x8x8xbf16, #tpu.memory_space<vmem>>, vector<1x8x8xbf16>
    %334 = vector.shape_cast %333 : vector<1x8x8xbf16> to vector<8x8xbf16>
    %c0_333 = arith.constant 0 : index
    %c0_334 = arith.constant 0 : index
    %335 = vector.load %arg12[%c0_333, %c0_334] : memref<8x4096xbf16, #tpu.memory_space<vmem>>, vector<8x3072xbf16>
    %cst_335 = arith.constant dense<0.000000e+00> : vector<8x3072xf32>
    %336 = tpu.matmul %334, %335, %cst_335 {dimension_numbers = #tpu.dot_dimension_numbers<[1], [0], [0], [1], [0, 0, 1, 1], [], []>} : vector<8x8xbf16>, vector<8x3072xbf16>, vector<8x3072xf32> -> vector<8x3072xf32>
    %c0_336 = arith.constant 0 : index
    %c0_337 = arith.constant 0 : index
    %337 = vector.load %arg13[%c0_336, %c0_337] : memref<8x3072xf32, #tpu.memory_space<vmem>>, vector<8x3072xf32>
    tpu.vector_store %arg13[%c0_336, %c0_337], %336 {strides = array<i32>} : memref<8x3072xf32, #tpu.memory_space<vmem>>, vector<8x3072xf32>,
    %c0_338 = arith.constant 0 : index
    %c0_339 = arith.constant 0 : index
    %338 = vector.load %arg13[%c0_338, %c0_339] : memref<8x3072xf32, #tpu.memory_space<vmem>>, vector<8x3072xf32>
    %c1_340 = arith.constant 1 : index
    %c0_341 = arith.constant 0 : index
    %c0_342 = arith.constant 0 : index
    %339 = vector.load %arg3[%c1_340, %c0_341, %c0_342] : memref<3x8x8xbf16, #tpu.memory_space<vmem>>, vector<1x8x8xbf16>
    %340 = vector.shape_cast %339 : vector<1x8x8xbf16> to vector<8x8xbf16>
    %c0_343 = arith.constant 0 : index
    %c512_344 = arith.constant 512 : index
    %341 = vector.load %arg12[%c0_343, %c512_344] : memref<8x4096xbf16, #tpu.memory_space<vmem>>, vector<8x3072xbf16>
    %cst_345 = arith.constant dense<0.000000e+00> : vector<8x3072xf32>
    %342 = tpu.matmul %340, %341, %cst_345 {dimension_numbers = #tpu.dot_dimension_numbers<[1], [0], [0], [1], [0, 0, 1, 1], [], []>} : vector<8x8xbf16>, vector<8x3072xbf16>, vector<8x3072xf32> -> vector<8x3072xf32>
    %343 = arith.addf %338, %342 : vector<8x3072xf32>
    %c0_346 = arith.constant 0 : index
    %c0_347 = arith.constant 0 : index
    %344 = vector.load %arg13[%c0_346, %c0_347] : memref<8x3072xf32, #tpu.memory_space<vmem>>, vector<8x3072xf32>
    tpu.vector_store %arg13[%c0_346, %c0_347], %343 {strides = array<i32>} : memref<8x3072xf32, #tpu.memory_space<vmem>>, vector<8x3072xf32>,
    %c0_348 = arith.constant 0 : index
    %c0_349 = arith.constant 0 : index
    %345 = vector.load %arg13[%c0_348, %c0_349] : memref<8x3072xf32, #tpu.memory_space<vmem>>, vector<8x3072xf32>
    %c2_350 = arith.constant 2 : index
    %c0_351 = arith.constant 0 : index
    %c0_352 = arith.constant 0 : index
    %346 = vector.load %arg3[%c2_350, %c0_351, %c0_352] : memref<3x8x8xbf16, #tpu.memory_space<vmem>>, vector<1x8x8xbf16>
    %347 = vector.shape_cast %346 : vector<1x8x8xbf16> to vector<8x8xbf16>
    %c0_353 = arith.constant 0 : index
    %c1024_354 = arith.constant 1024 : index
    %348 = vector.load %arg12[%c0_353, %c1024_354] : memref<8x4096xbf16, #tpu.memory_space<vmem>>, vector<8x3072xbf16>
    %cst_355 = arith.constant dense<0.000000e+00> : vector<8x3072xf32>
    %349 = tpu.matmul %347, %348, %cst_355 {dimension_numbers = #tpu.dot_dimension_numbers<[1], [0], [0], [1], [0, 0, 1, 1], [], []>} : vector<8x8xbf16>, vector<8x3072xbf16>, vector<8x3072xf32> -> vector<8x3072xf32>
    %350 = arith.addf %345, %349 : vector<8x3072xf32>
    %c0_356 = arith.constant 0 : index
    %c0_357 = arith.constant 0 : index
    %351 = vector.load %arg13[%c0_356, %c0_357] : memref<8x3072xf32, #tpu.memory_space<vmem>>, vector<8x3072xf32>
    tpu.vector_store %arg13[%c0_356, %c0_357], %350 {strides = array<i32>} : memref<8x3072xf32, #tpu.memory_space<vmem>>, vector<8x3072xf32>,
    %c0_358 = arith.constant 0 : index
    %c0_359 = arith.constant 0 : index
    %352 = vector.load %arg4[%c0_358, %c0_359] : memref<8x1xf32, #tpu.memory_space<vmem>>, vector<8x1xf32>
    %c0_360 = arith.constant 0 : index
    %c0_361 = arith.constant 0 : index
    %353 = vector.load %arg5[%c0_360, %c0_361] : memref<1x512xf32, #tpu.memory_space<vmem>>, vector<1x512xf32>
    %cst_362 = arith.constant 0.000000e+00 : f32
    %354 = vector.broadcast %cst_362 : f32 to vector<1x512xf32>
    %355 = arith.cmpf ogt, %353, %354 : vector<1x512xf32>
    %cst_363 = arith.constant 0.000000e+00 : f32
    %356 = vector.broadcast %cst_363 : f32 to vector<8x1xf32>
    %cst_364 = arith.constant 0.000000e+00 : f32
    %357 = vector.broadcast %cst_364 : f32 to vector<8x1xf32>
    %c0_365 = arith.constant 0 : index
    %c0_366 = arith.constant 0 : index
    %358 = vector.load %arg13[%c0_365, %c0_366] : memref<8x3072xf32, #tpu.memory_space<vmem>>, vector<8x512xf32>
    %359 = vector.broadcast %352 : vector<8x1xf32> to vector<8x512xf32>
    %360 = arith.addf %358, %359 : vector<8x512xf32>
    %361 = arith.truncf %360 : vector<8x512xf32> to vector<8x512xbf16>
    %c0_367 = arith.constant 0 : index
    %c0_368 = arith.constant 0 : index
    %c0_369 = arith.constant 0 : index
    %362 = vector.load %arg8[%c0_367, %c0_368, %c0_369] : memref<1x8x3072xbf16, #tpu.memory_space<vmem>>, vector<1x8x512xbf16>
    %363 = vector.shape_cast %362 : vector<1x8x512xbf16> to vector<8x512xbf16>
    %364 = vector.shape_cast %361 : vector<8x512xbf16> to vector<1x8x512xbf16>
    tpu.vector_store %arg8[%c0_367, %c0_368, %c0_369], %364 {strides = array<i32>} : memref<1x8x3072xbf16, #tpu.memory_space<vmem>>, vector<1x8x512xbf16>,
    %cst_370 = arith.constant 0.000000e+00 : f32
    %365 = vector.shape_cast %355 : vector<1x512xi1> to vector<1x512xi1>
    %366 = vector.broadcast %365 : vector<1x512xi1> to vector<8x512xi1>
    %367 = vector.broadcast %cst_370 : f32 to vector<8x512xf32>
    %368 = arith.select %366, %360, %367 : vector<8x512xi1>, vector<8x512xf32>
    %cst_371 = arith.constant dense<0.000000e+00> : vector<8xf32>
    %369 = vector.multi_reduction <add>, %368, %cst_371 [1] : vector<8x512xf32> to vector<8xf32>
    %370 = vector.shape_cast %369 : vector<8xf32> to vector<8x1xf32>
    %371 = arith.addf %356, %370 : vector<8x1xf32>
    %372 = arith.mulf %368, %368 : vector<8x512xf32>
    %cst_372 = arith.constant dense<0.000000e+00> : vector<8xf32>
    %373 = vector.multi_reduction <add>, %372, %cst_372 [1] : vector<8x512xf32> to vector<8xf32>
    %374 = vector.shape_cast %373 : vector<8xf32> to vector<8x1xf32>
    %375 = arith.addf %357, %374 : vector<8x1xf32>
    %c0_373 = arith.constant 0 : index
    %c512_374 = arith.constant 512 : index
    %376 = vector.load %arg13[%c0_373, %c512_374] : memref<8x3072xf32, #tpu.memory_space<vmem>>, vector<8x512xf32>
    %377 = vector.broadcast %352 : vector<8x1xf32> to vector<8x512xf32>
    %378 = arith.addf %376, %377 : vector<8x512xf32>
    %379 = arith.truncf %378 : vector<8x512xf32> to vector<8x512xbf16>
    %c0_375 = arith.constant 0 : index
    %c0_376 = arith.constant 0 : index
    %c512_377 = arith.constant 512 : index
    %380 = vector.load %arg8[%c0_375, %c0_376, %c512_377] : memref<1x8x3072xbf16, #tpu.memory_space<vmem>>, vector<1x8x512xbf16>
    %381 = vector.shape_cast %380 : vector<1x8x512xbf16> to vector<8x512xbf16>
    %382 = vector.shape_cast %379 : vector<8x512xbf16> to vector<1x8x512xbf16>
    tpu.vector_store %arg8[%c0_375, %c0_376, %c512_377], %382 {strides = array<i32>} : memref<1x8x3072xbf16, #tpu.memory_space<vmem>>, vector<1x8x512xbf16>,
    %cst_378 = arith.constant 0.000000e+00 : f32
    %383 = vector.shape_cast %355 : vector<1x512xi1> to vector<1x512xi1>
    %384 = vector.broadcast %383 : vector<1x512xi1> to vector<8x512xi1>
    %385 = vector.broadcast %cst_378 : f32 to vector<8x512xf32>
    %386 = arith.select %384, %378, %385 : vector<8x512xi1>, vector<8x512xf32>
    %cst_379 = arith.constant dense<0.000000e+00> : vector<8xf32>
    %387 = vector.multi_reduction <add>, %386, %cst_379 [1] : vector<8x512xf32> to vector<8xf32>
    %388 = vector.shape_cast %387 : vector<8xf32> to vector<8x1xf32>
    %389 = arith.addf %371, %388 : vector<8x1xf32>
    %390 = arith.mulf %386, %386 : vector<8x512xf32>
    %cst_380 = arith.constant dense<0.000000e+00> : vector<8xf32>
    %391 = vector.multi_reduction <add>, %390, %cst_380 [1] : vector<8x512xf32> to vector<8xf32>
    %392 = vector.shape_cast %391 : vector<8xf32> to vector<8x1xf32>
    %393 = arith.addf %375, %392 : vector<8x1xf32>
    %c0_381 = arith.constant 0 : index
    %c1024_382 = arith.constant 1024 : index
    %394 = vector.load %arg13[%c0_381, %c1024_382] : memref<8x3072xf32, #tpu.memory_space<vmem>>, vector<8x512xf32>
    %395 = vector.broadcast %352 : vector<8x1xf32> to vector<8x512xf32>
    %396 = arith.addf %394, %395 : vector<8x512xf32>
    %397 = arith.truncf %396 : vector<8x512xf32> to vector<8x512xbf16>
    %c0_383 = arith.constant 0 : index
    %c0_384 = arith.constant 0 : index
    %c1024_385 = arith.constant 1024 : index
    %398 = vector.load %arg8[%c0_383, %c0_384, %c1024_385] : memref<1x8x3072xbf16, #tpu.memory_space<vmem>>, vector<1x8x512xbf16>
    %399 = vector.shape_cast %398 : vector<1x8x512xbf16> to vector<8x512xbf16>
    %400 = vector.shape_cast %397 : vector<8x512xbf16> to vector<1x8x512xbf16>
    tpu.vector_store %arg8[%c0_383, %c0_384, %c1024_385], %400 {strides = array<i32>} : memref<1x8x3072xbf16, #tpu.memory_space<vmem>>, vector<1x8x512xbf16>,
    %cst_386 = arith.constant 0.000000e+00 : f32
    %401 = vector.shape_cast %355 : vector<1x512xi1> to vector<1x512xi1>
    %402 = vector.broadcast %401 : vector<1x512xi1> to vector<8x512xi1>
    %403 = vector.broadcast %cst_386 : f32 to vector<8x512xf32>
    %404 = arith.select %402, %396, %403 : vector<8x512xi1>, vector<8x512xf32>
    %cst_387 = arith.constant dense<0.000000e+00> : vector<8xf32>
    %405 = vector.multi_reduction <add>, %404, %cst_387 [1] : vector<8x512xf32> to vector<8xf32>
    %406 = vector.shape_cast %405 : vector<8xf32> to vector<8x1xf32>
    %407 = arith.addf %389, %406 : vector<8x1xf32>
    %408 = arith.mulf %404, %404 : vector<8x512xf32>
    %cst_388 = arith.constant dense<0.000000e+00> : vector<8xf32>
    %409 = vector.multi_reduction <add>, %408, %cst_388 [1] : vector<8x512xf32> to vector<8xf32>
    %410 = vector.shape_cast %409 : vector<8xf32> to vector<8x1xf32>
    %411 = arith.addf %393, %410 : vector<8x1xf32>
    %c0_389 = arith.constant 0 : index
    %c1536_390 = arith.constant 1536 : index
    %412 = vector.load %arg13[%c0_389, %c1536_390] : memref<8x3072xf32, #tpu.memory_space<vmem>>, vector<8x512xf32>
    %413 = vector.broadcast %352 : vector<8x1xf32> to vector<8x512xf32>
    %414 = arith.addf %412, %413 : vector<8x512xf32>
    %415 = arith.truncf %414 : vector<8x512xf32> to vector<8x512xbf16>
    %c0_391 = arith.constant 0 : index
    %c0_392 = arith.constant 0 : index
    %c1536_393 = arith.constant 1536 : index
    %416 = vector.load %arg8[%c0_391, %c0_392, %c1536_393] : memref<1x8x3072xbf16, #tpu.memory_space<vmem>>, vector<1x8x512xbf16>
    %417 = vector.shape_cast %416 : vector<1x8x512xbf16> to vector<8x512xbf16>
    %418 = vector.shape_cast %415 : vector<8x512xbf16> to vector<1x8x512xbf16>
    tpu.vector_store %arg8[%c0_391, %c0_392, %c1536_393], %418 {strides = array<i32>} : memref<1x8x3072xbf16, #tpu.memory_space<vmem>>, vector<1x8x512xbf16>,
    %cst_394 = arith.constant 0.000000e+00 : f32
    %419 = vector.shape_cast %355 : vector<1x512xi1> to vector<1x512xi1>
    %420 = vector.broadcast %419 : vector<1x512xi1> to vector<8x512xi1>
    %421 = vector.broadcast %cst_394 : f32 to vector<8x512xf32>
    %422 = arith.select %420, %414, %421 : vector<8x512xi1>, vector<8x512xf32>
    %cst_395 = arith.constant dense<0.000000e+00> : vector<8xf32>
    %423 = vector.multi_reduction <add>, %422, %cst_395 [1] : vector<8x512xf32> to vector<8xf32>
    %424 = vector.shape_cast %423 : vector<8xf32> to vector<8x1xf32>
    %425 = arith.addf %407, %424 : vector<8x1xf32>
    %426 = arith.mulf %422, %422 : vector<8x512xf32>
    %cst_396 = arith.constant dense<0.000000e+00> : vector<8xf32>
    %427 = vector.multi_reduction <add>, %426, %cst_396 [1] : vector<8x512xf32> to vector<8xf32>
    %428 = vector.shape_cast %427 : vector<8xf32> to vector<8x1xf32>
    %429 = arith.addf %411, %428 : vector<8x1xf32>
    %c0_397 = arith.constant 0 : index
    %c2048_398 = arith.constant 2048 : index
    %430 = vector.load %arg13[%c0_397, %c2048_398] : memref<8x3072xf32, #tpu.memory_space<vmem>>, vector<8x512xf32>
    %431 = vector.broadcast %352 : vector<8x1xf32> to vector<8x512xf32>
    %432 = arith.addf %430, %431 : vector<8x512xf32>
    %433 = arith.truncf %432 : vector<8x512xf32> to vector<8x512xbf16>
    %c0_399 = arith.constant 0 : index
    %c0_400 = arith.constant 0 : index
    %c2048_401 = arith.constant 2048 : index
    %434 = vector.load %arg8[%c0_399, %c0_400, %c2048_401] : memref<1x8x3072xbf16, #tpu.memory_space<vmem>>, vector<1x8x512xbf16>
    %435 = vector.shape_cast %434 : vector<1x8x512xbf16> to vector<8x512xbf16>
    %436 = vector.shape_cast %433 : vector<8x512xbf16> to vector<1x8x512xbf16>
    tpu.vector_store %arg8[%c0_399, %c0_400, %c2048_401], %436 {strides = array<i32>} : memref<1x8x3072xbf16, #tpu.memory_space<vmem>>, vector<1x8x512xbf16>,
    %cst_402 = arith.constant 0.000000e+00 : f32
    %437 = vector.shape_cast %355 : vector<1x512xi1> to vector<1x512xi1>
    %438 = vector.broadcast %437 : vector<1x512xi1> to vector<8x512xi1>
    %439 = vector.broadcast %cst_402 : f32 to vector<8x512xf32>
    %440 = arith.select %438, %432, %439 : vector<8x512xi1>, vector<8x512xf32>
    %cst_403 = arith.constant dense<0.000000e+00> : vector<8xf32>
    %441 = vector.multi_reduction <add>, %440, %cst_403 [1] : vector<8x512xf32> to vector<8xf32>
    %442 = vector.shape_cast %441 : vector<8xf32> to vector<8x1xf32>
    %443 = arith.addf %425, %442 : vector<8x1xf32>
    %444 = arith.mulf %440, %440 : vector<8x512xf32>
    %cst_404 = arith.constant dense<0.000000e+00> : vector<8xf32>
    %445 = vector.multi_reduction <add>, %444, %cst_404 [1] : vector<8x512xf32> to vector<8xf32>
    %446 = vector.shape_cast %445 : vector<8xf32> to vector<8x1xf32>
    %447 = arith.addf %429, %446 : vector<8x1xf32>
    %c0_405 = arith.constant 0 : index
    %c2560_406 = arith.constant 2560 : index
    %448 = vector.load %arg13[%c0_405, %c2560_406] : memref<8x3072xf32, #tpu.memory_space<vmem>>, vector<8x512xf32>
    %449 = vector.broadcast %352 : vector<8x1xf32> to vector<8x512xf32>
    %450 = arith.addf %448, %449 : vector<8x512xf32>
    %451 = arith.truncf %450 : vector<8x512xf32> to vector<8x512xbf16>
    %c0_407 = arith.constant 0 : index
    %c0_408 = arith.constant 0 : index
    %c2560_409 = arith.constant 2560 : index
    %452 = vector.load %arg8[%c0_407, %c0_408, %c2560_409] : memref<1x8x3072xbf16, #tpu.memory_space<vmem>>, vector<1x8x512xbf16>
    %453 = vector.shape_cast %452 : vector<1x8x512xbf16> to vector<8x512xbf16>
    %454 = vector.shape_cast %451 : vector<8x512xbf16> to vector<1x8x512xbf16>
    tpu.vector_store %arg8[%c0_407, %c0_408, %c2560_409], %454 {strides = array<i32>} : memref<1x8x3072xbf16, #tpu.memory_space<vmem>>, vector<1x8x512xbf16>,
    %cst_410 = arith.constant 0.000000e+00 : f32
    %455 = vector.shape_cast %355 : vector<1x512xi1> to vector<1x512xi1>
    %456 = vector.broadcast %455 : vector<1x512xi1> to vector<8x512xi1>
    %457 = vector.broadcast %cst_410 : f32 to vector<8x512xf32>
    %458 = arith.select %456, %450, %457 : vector<8x512xi1>, vector<8x512xf32>
    %cst_411 = arith.constant dense<0.000000e+00> : vector<8xf32>
    %459 = vector.multi_reduction <add>, %458, %cst_411 [1] : vector<8x512xf32> to vector<8xf32>
    %460 = vector.shape_cast %459 : vector<8xf32> to vector<8x1xf32>
    %461 = arith.addf %443, %460 : vector<8x1xf32>
    %462 = arith.mulf %458, %458 : vector<8x512xf32>
    %cst_412 = arith.constant dense<0.000000e+00> : vector<8xf32>
    %463 = vector.multi_reduction <add>, %462, %cst_412 [1] : vector<8x512xf32> to vector<8xf32>
    %464 = vector.shape_cast %463 : vector<8xf32> to vector<8x1xf32>
    %465 = arith.addf %447, %464 : vector<8x1xf32>
    %466 = tpu.concatenate %461, %465 in 1 : vector<8x1xf32>, vector<8x1xf32> -> vector<8x2xf32>
    %c0_413 = arith.constant 0 : index
    %c0_414 = arith.constant 0 : index
    %c0_415 = arith.constant 0 : index
    %467 = vector.load %arg9[%c0_413, %c0_414, %c0_415] : memref<1x8x2xf32, #tpu.memory_space<vmem>>, vector<1x8x2xf32>
    %468 = vector.shape_cast %467 : vector<1x8x2xf32> to vector<8x2xf32>
    %469 = vector.shape_cast %466 : vector<8x2xf32> to vector<1x8x2xf32>
    tpu.vector_store %arg9[%c0_413, %c0_414, %c0_415], %469 {strides = array<i32>} : memref<1x8x2xf32, #tpu.memory_space<vmem>>, vector<1x8x2xf32>,
    return
  }
  func.func @transform_0(%arg0: i32) -> (i32, i32, i32) {
    %c0_i32 = arith.constant 0 : i32
    %c0_i32_0 = arith.constant 0 : i32
    %c0_i32_1 = arith.constant 0 : i32
    return %arg0, %c0_i32, %c0_i32_0 : i32, i32, i32
  }
  func.func @transform_1(%arg0: i32) -> (i32, i32) {
    %c0_i32 = arith.constant 0 : i32
    %c0_i32_0 = arith.constant 0 : i32
    %c0_i32_1 = arith.constant 0 : i32
    return %c0_i32, %c0_i32_0 : i32, i32
  }
  func.func @transform_2(%arg0: i32) -> (i32, i32, i32) {
    %c0_i32 = arith.constant 0 : i32
    %c0_i32_0 = arith.constant 0 : i32
    %c0_i32_1 = arith.constant 0 : i32
    %c0_i32_2 = arith.constant 0 : i32
    return %c0_i32, %c0_i32_0, %c0_i32_1 : i32, i32, i32
  }
  func.func @transform_3(%arg0: i32) -> (i32, i32) {
    %c0_i32 = arith.constant 0 : i32
    %c0_i32_0 = arith.constant 0 : i32
    %c0_i32_1 = arith.constant 0 : i32
    return %c0_i32, %c0_i32_0 : i32, i32
  }
  func.func @transform_4(%arg0: i32) -> (i32, i32) {
    %c0_i32 = arith.constant 0 : i32
    %c0_i32_0 = arith.constant 0 : i32
    %c0_i32_1 = arith.constant 0 : i32
    return %c0_i32, %c0_i32_0 : i32, i32
  }
  func.func @transform_5(%arg0: i32) -> (i32, i32) {
    %c0_i32 = arith.constant 0 : i32
    %c0_i32_0 = arith.constant 0 : i32
    %c0_i32_1 = arith.constant 0 : i32
    return %c0_i32, %c0_i32_0 : i32, i32
  }
  func.func @transform_6(%arg0: i32) -> (i32, i32) {
    %c0_i32 = arith.constant 0 : i32
    %c0_i32_0 = arith.constant 0 : i32
    %c0_i32_1 = arith.constant 0 : i32
    return %c0_i32, %c0_i32_0 : i32, i32
  }
  func.func @transform_7(%arg0: i32) -> (i32, i32, i32) {
    %c0_i32 = arith.constant 0 : i32
    %c0_i32_0 = arith.constant 0 : i32
    %c0_i32_1 = arith.constant 0 : i32
    return %arg0, %c0_i32, %c0_i32_0 : i32, i32, i32
  }
  func.func @transform_8(%arg0: i32) -> (i32, i32, i32) {
    %c0_i32 = arith.constant 0 : i32
    %c0_i32_0 = arith.constant 0 : i32
    %c0_i32_1 = arith.constant 0 : i32
    return %arg0, %c0_i32, %c0_i32_0 : i32, i32, i32
  }
}

</mosaic_0001>

<bundles_post_ra>
// kernel: tpu_custom_call.1
= control target key start
LH: loop header
LB: loop body
LE: loop exit
PB: predicated region body
PF: predicated region fallthrough
CT: control target
= control target key end

     0   :  { %s10619_s0 = inlined_call_operand.hbm [shape: f32[2,4,5120], index: 0, kind: input, shape index: {}]   ;;  %s10620_s1 = inlined_call_operand.hbm [shape: bf16[8,36], index: 1, kind: input, shape index: {}]   ;;  %s10621_s2 = inlined_call_operand.hbm [shape: bf16[3,8,8], index: 2, kind: input, shape index: {}]   ;;  %s10622_s3 = inlined_call_operand.hbm [shape: f32[8,1], index: 3, kind: input, shape index: {}]   ;;  %s10623_s4 = inlined_call_operand.hbm [shape: f32[1,512], index: 4, kind: input, shape index: {}]   ;;  %s10624_s5 = inlined_call_operand.hbm [shape: f32[4,1], index: 5, kind: input, shape index: {}]   ;;  %s10625_s6 = inlined_call_operand.hbm [shape: f32[4,1], index: 6, kind: input, shape index: {}]   ;;  %s10626_s7 = inlined_call_operand.hbm [shape: bf16[2,8,3072], index: 7, kind: output, shape index: {0}]   ;;  %s10627_s8 = inlined_call_operand.hbm [shape: f32[2,8,2], index: 8, kind: output, shape index: {1}]  }
   0x1   :  { %10631 = sst [smem:[#allocation27_spill]] %s10620_s1 }
   0x2   :  { %10632 = sst [smem:[#allocation28_spill]] %s10621_s2 }
   0x3   :  { %14 = vsyncpa [#allocation7], 0 }
   0x4   :  { %16 = vsyncpa [#allocation7 + $0x1], 0 }
   0x5   :  { %17 = vsyncpa [#allocation10], 0 }
   0x6   :  { %18 = vsyncpa [#allocation13], 0 }
   0x7   :  { %19 = vsyncpa [#allocation16], 0 }
   0x8   :  { %20 = vsyncpa [#allocation8], 0 }
   0x9   :  { %22 = vsyncpa [#allocation8 + $0x1], 0 }
   0xa   :  { %23 = vsyncpa [#allocation20], 0 }
   0xb   :  { %25 = vsyncpa [#allocation20 + $0x1], 0  ;;  %s8845_s27 = smov 0   ;;  %s8847_s28 = smov 0  }
   0xc   :  { %s8849_s29 = smov 0   ;;  %s8851_s30 = smov 0  }
   0xd LB: > { %s8779_s9 = smov [#allocation9]   ;;  %s8866_s11 = sadd.s32 4294967295, %s8777_s30   ;;  %s8777_s30 = sphi %s8851_s30, %s10656_s30   ;;  %s8773_s29 = sphi %s8849_s29, %s10655_s29   ;;  %s8769_s28 = sphi %s8847_s28, %s10654_s28   ;;  %s8765_s27 = sphi %s8845_s27, %s10653_s27  }
   0xe   : > { %s253_s10 = sshll.u32 %s8779_s9, 4  ;;  %p7699_p0 = scmp.ge.s32.totalorder %s8777_s30, 1  ;;  %s8871_s10 = int_to_ptr.vmem [resolvable:$true] %s253_s10 }
   0xf   : > { %p10628_p1 = scmp.eq.s32.totalorder %s8866_s11, 0  ;;  %p240_p2 = scmp.lt.s32.totalorder %s8777_s30, 3 }
  0x10   : > { %s8780_s13 = smov [#allocation12]   ;;  %s8781_s15 = smov [#allocation15]  }
  0x11   : > { %p8873_p3 = pnand %p7699_p0, %p240_p2  ;;  %s277_s14 = sshll.u32 %s8780_s13, 4  ;;  %s8880_s14 = int_to_ptr.vmem [resolvable:$true] %s277_s14 }
  0x12   : > { %s299_s16 = sshll.u32 %s8781_s15, 4  ;;  %s8782_s18 = smov [#allocation11]   ;;  %s8888_s16 = int_to_ptr.vmem [resolvable:$true] %s299_s16 }
  0x13   : > { %s10633_s12 = scalar_select %p8873_p3, 1, 0 }
  0x14   : > { %p8184_p5 = pneg %p8873_p3  ;;  %s8890_s19 = sshll.u32 %s8782_s18, 4  ;;  %s264_s19 = int_to_ptr.vmem [resolvable:$true] %s8890_s19 }
  0x15   : > { %s10635_s1 = sld [smem:[#allocation27_spill]] }
  0x16   : > { %p8884_p6 = pnand %p8184_p5, %p10628_p1 }
  0x18   : > { %p8900_p8 = pneg %p8884_p6 }
  0x1b   : > { %s8469_s22 = scalar_lea.hbm %s10635_s1, 64 }
  0x1c   : > { %p8470_p7 = scmp.ne.s32.totalorder %s10635_s1, %s8469_s22  ;;  %p8476_p11 = scmp.lt.u32.totalorder %s8469_s22, %s10635_s1 }
  0x1e   : > { %p8472_p9 = pnand %p8900_p8, %p8470_p7 }
  0x20   : > { %p8473_p10 = pneg %p8472_p9 }
  0x22   : > { %p8478_p12 = pnand %p8476_p11, %p8473_p10 }
  0x24   : > { %8481 = shalt.err (!%p8478_p12)
}
  0x25   : > { %s8482_s13 = scalar_lea.vmem %s8871_s10, 64  ;;  %p8490_p5 = scmp.lt.s32.totalorder %s8871_s10, %s8871_s10 }
  0x26   : > { %p8483_p13 = scmp.ne.s32.totalorder %s8871_s10, %s8482_s13  ;;  %p8491_p4 = scmp.lt.s32.totalorder %s8482_s13, %s8482_s13 }
  0x28   : > { %p8485_p0 = pnand %p8483_p13, %p8900_p8  ;;  %p8492_p7 = por %p8491_p4, %p8490_p5 }
  0x2a   : > { %p8486_p2 = pneg %p8485_p0 }
  0x2c   : > { %p8493_p9 = pnand %p8492_p7, %p8486_p2 }
  0x2e   : > { %8496 = shalt.err (!%p8493_p9)
}
  0x2f   : > { %8187 = dma.hbm_to_vmem [thread:$0]  (!%p8884_p6), %s10635_s1, 64, %s8871_s10, [#allocation10]  }
  0x30   : > { %s8497_s22 = scalar_lea.hbm %s10622_s3, 128 }
  0x31   : > { %p8498_p10 = scmp.ne.s32.totalorder %s10622_s3, %s8497_s22  ;;  %p8504_p12 = scmp.lt.u32.totalorder %s8497_s22, %s10622_s3 }
  0x33   : > { %p8500_p4 = pnand %p8498_p10, %p8900_p8 }
  0x35   : > { %p8501_p11 = pneg %p8500_p4 }
  0x37   : > { %p8506_p13 = pnand %p8504_p12, %p8501_p11 }
  0x39   : > { %8509 = shalt.err (!%p8506_p13)
}
  0x3a   : > { %s8510_s10 = scalar_lea.vmem %s8880_s14, 128  ;;  %p8518_p7 = scmp.lt.s32.totalorder %s8880_s14, %s8880_s14 }
  0x3b   : > { %p8511_p0 = scmp.ne.s32.totalorder %s8880_s14, %s8510_s10  ;;  %p8519_p9 = scmp.lt.s32.totalorder %s8510_s10, %s8510_s10 }
  0x3d   : > { %p8513_p2 = pnand %p8511_p0, %p8900_p8  ;;  %p8520_p10 = por %p8519_p9, %p8518_p7 }
  0x3f   : > { %p8514_p5 = pneg %p8513_p2 }
  0x41   : > { %p8521_p4 = pnand %p8520_p10, %p8514_p5 }
  0x43   : > { %8524 = shalt.err (!%p8521_p4)
}
  0x44   : > { %8193 = dma.hbm_to_vmem [thread:$0]  (!%p8884_p6), %s10622_s3, 128, %s8880_s14, [#allocation13]  }
  0x45   : > { %s8525_s21 = scalar_lea.hbm %s10624_s5, 64 }
  0x46   : > { %p8526_p11 = scmp.ne.s32.totalorder %s10624_s5, %s8525_s21  ;;  %p8532_p0 = scmp.lt.u32.totalorder %s8525_s21, %s10624_s5 }
  0x48   : > { %p8528_p12 = pnand %p8526_p11, %p8900_p8 }
  0x4a   : > { %p8529_p13 = pneg %p8528_p12 }
  0x4c   : > { %p8534_p2 = pnand %p8532_p0, %p8529_p13 }
  0x4e   : > { %8537 = shalt.err (!%p8534_p2)
}
  0x4f   : > { %s8538_s14 = scalar_lea.vmem %s8888_s16, 64  ;;  %p8546_p10 = scmp.lt.s32.totalorder %s8888_s16, %s8888_s16 }
  0x50   : > { %p8539_p5 = scmp.ne.s32.totalorder %s8888_s16, %s8538_s14  ;;  %p8547_p4 = scmp.lt.s32.totalorder %s8538_s14, %s8538_s14 }
  0x52   : > { %p8541_p7 = pnand %p8539_p5, %p8900_p8  ;;  %p8548_p11 = por %p8547_p4, %p8546_p10 }
  0x54   : > { %p8542_p9 = pneg %p8541_p7 }
  0x56   : > { %p8549_p12 = pnand %p8548_p11, %p8542_p9 }
  0x58   : > { %8552 = shalt.err (!%p8549_p12)
}
  0x59   : > { %8199 = dma.hbm_to_vmem [thread:$0]  (!%p8884_p6), %s10624_s5, 64, %s8888_s16, [#allocation16]  }
  0x5a   : > { %s10637_s2 = sld [smem:[#allocation28_spill]] }
  0x60   : > { %s8553_s18 = scalar_lea.hbm %s10637_s2, 192 }
  0x61   : > { %p8554_p13 = scmp.ne.s32.totalorder %s10637_s2, %s8553_s18  ;;  %p8560_p5 = scmp.lt.u32.totalorder %s8553_s18, %s10637_s2 }
  0x63   : > { %p8556_p0 = pnand %p8554_p13, %p8900_p8 }
  0x65   : > { %p8557_p2 = pneg %p8556_p0 }
  0x67   : > { %p8562_p7 = pnand %p8560_p5, %p8557_p2 }
  0x69   : > { %8565 = shalt.err (!%p8562_p7)
}
  0x6a   : > { %s8566_s24 = scalar_lea.vmem %s264_s19, 192  ;;  %p8574_p11 = scmp.lt.s32.totalorder %s264_s19, %s264_s19 }
  0x6b   : > { %p8567_p9 = scmp.ne.s32.totalorder %s264_s19, %s8566_s24  ;;  %p8575_p12 = scmp.lt.s32.totalorder %s8566_s24, %s8566_s24 }
  0x6d   : > { %p8569_p10 = pnand %p8567_p9, %p8900_p8  ;;  %p8576_p1 = por %p8575_p12, %p8574_p11 }
  0x6f   : > { %p8570_p4 = pneg %p8569_p10 }
  0x71   : > { %p8577_p3 = pnand %p8576_p1, %p8570_p4 }
  0x73   : > { %8580 = shalt.err (!%p8577_p3)
}
  0x74   : > { %s8783_s16 = smov 64   ;;  %s8784_s26 = smov 4  }
  0x75   : > { %8190 = dma.hbm_to_vmem [thread:$0]  (!%p8884_p6), %s10637_s2, 192, %s264_s19, [#allocation10], %s8783_s16, %s8783_s16, %s8784_s26  }
  0x76   : > { %s8785_s10 = smov [#allocation14]   ;;  %s8786_s15 = smov [#allocation17]  }
  0x77   : > { %s288_s13 = sshll.u32 %s8785_s10, 4  ;;  %s310_s18 = sshll.u32 %s8786_s15, 4  ;;  %s289_s13 = int_to_ptr.vmem [resolvable:$true] %s288_s13  ;;  %s8986_s18 = int_to_ptr.vmem [resolvable:$true] %s310_s18 }
  0x78   : > { %s8581_s22 = scalar_lea.hbm %s10623_s4, 64 }
  0x79   : > { %p8582_p1 = scmp.ne.s32.totalorder %s10623_s4, %s8581_s22  ;;  %p8588_p0 = scmp.lt.u32.totalorder %s8581_s22, %s10623_s4 }
  0x7b   : > { %p8584_p3 = pnand %p8582_p1, %p8900_p8 }
  0x7d   : > { %p8585_p13 = pneg %p8584_p3 }
  0x7f   : > { %p8590_p2 = pnand %p8588_p0, %p8585_p13 }
  0x81   : > { %8593 = shalt.err (!%p8590_p2)
}
  0x82   : > { %s8594_s16 = scalar_lea.vmem %s289_s13, 64  ;;  %p8602_p10 = scmp.lt.s32.totalorder %s289_s13, %s289_s13 }
  0x83   : > { %p8595_p5 = scmp.ne.s32.totalorder %s289_s13, %s8594_s16  ;;  %p8603_p4 = scmp.lt.s32.totalorder %s8594_s16, %s8594_s16 }
  0x85   : > { %p8597_p7 = pnand %p8595_p5, %p8900_p8  ;;  %p8604_p11 = por %p8603_p4, %p8602_p10 }
  0x87   : > { %p8598_p9 = pneg %p8597_p7 }
  0x89   : > { %p8605_p12 = pnand %p8604_p11, %p8598_p9 }
  0x8b   : > { %8608 = shalt.err (!%p8605_p12)
}
  0x8c   : > { %8196 = dma.hbm_to_vmem [thread:$0]  (!%p8884_p6), %s10623_s4, 64, %s289_s13, [#allocation13]  }
  0x8d   : > { %s8609_s20 = scalar_lea.hbm %s10625_s6, 64 }
  0x8e   : > { %p8610_p1 = scmp.ne.s32.totalorder %s10625_s6, %s8609_s20  ;;  %p8616_p0 = scmp.lt.u32.totalorder %s8609_s20, %s10625_s6 }
  0x90   : > { %p8612_p3 = pnand %p8610_p1, %p8900_p8 }
  0x92   : > { %p8613_p13 = pneg %p8612_p3 }
  0x94   : > { %p8618_p2 = pnand %p8616_p0, %p8613_p13 }
  0x96   : > { %8621 = shalt.err (!%p8618_p2)
}
  0x97   : > { %s8622_s13 = scalar_lea.vmem %s8986_s18, 64  ;;  %p8630_p10 = scmp.lt.s32.totalorder %s8986_s18, %s8986_s18 }
  0x98   : > { %p8623_p5 = scmp.ne.s32.totalorder %s8986_s18, %s8622_s13  ;;  %p8631_p4 = scmp.lt.s32.totalorder %s8622_s13, %s8622_s13 }
  0x9a   : > { %p8625_p7 = pnand %p8623_p5, %p8900_p8  ;;  %p8632_p11 = por %p8631_p4, %p8630_p10 }
  0x9c   : > { %p8626_p9 = pneg %p8625_p7 }
  0x9e   : > { %p8633_p12 = pnand %p8632_p11, %p8626_p9 }
  0xa0   : > { %8636 = shalt.err (!%p8633_p12)
}
  0xa1   : > { %8202 = dma.hbm_to_vmem [thread:$0]  (!%p8884_p6), %s10625_s6, 64, %s8986_s18, [#allocation16]  }
  0xa2   : > { %s7698_s17 = sadd.s32 4294967294, %s8777_s30   ;;  %s9031_s25 = sadd.s32 1, %s8777_s30  }
  0xa3   : > { %s35_s16 = ssub.s32 %s8777_s30, %s9031_s25  ;;  %s38_s26 = sadd.s32 1, %s8773_s29 }
  0xa4   : > { %p36_p8 = scmp.eq.s32.totalorder %s35_s16, 0  ;;  %p45_p1 = scmp.ne.s32.totalorder %s8773_s29, %s8769_s28 }
  0xa5   : > { %p46_p3 = scmp.eq.s32.totalorder %s8777_s30, 0  ;;  %p51_p13 = scmp.ne.s32.totalorder %s8769_s28, %s8765_s27 }
  0xa6   : > { %s9042_s9 = scalar_select %p36_p8, %s8773_s29, %s38_s26  }
  0xa7   : > { %p47_p0 = por %p46_p3, %p45_p1  ;;  %p10638_p2 = scmp.eq.s32.totalorder %s8866_s11, 0 }
  0xa8   : > { %p201_p6 = scmp.eq.s32.totalorder %s8866_s11, 1  ;;  %p207_p7 = scmp.eq.s32.totalorder %s7698_s17, 1 }
  0xa9   : > { %p9046_p5 = por %p10638_p2, %p51_p13  ;;  %p8220_p9 = scmp.lt.s32.totalorder %s8777_s30, 2 }
  0xaa   : > { %s321_s18 = sand.u32 1, %s8773_s29   ;;  %p9053_p10 = por %p201_p6, %p45_p1 }
  0xab   : > { %p9057_p4 = por %p207_p7, %p51_p13  ;;  %s8149_s21 = smul.u32 160, %s321_s18 }
  0xac   : > { %s10640_s15 = scalar_select %p9053_p10, 1, 0 }
  0xad   : > { %s10641_s20 = scalar_select %p9057_p4, 1, 0 }
  0xae   : > { %s8150_s22 = smul.u32 2560, %s8777_s30  ;;  %p9062_p11 = pnand %p8220_p9, %p47_p0 }
  0xaf   : > { %s325_s19 = scalar_lea.vmem [#allocation6], %s8149_s21  ;;  %s322_s16 = scalar_lea.sflag [#allocation7], %s321_s18 }
  0xb0   : > { %s9069_s14 = scalar_lea.hbm %s10619_s0, %s8150_s22  ;;  %s333_s17 = sshll.u32 %s325_s19, 4  ;;  %s9071_s17 = int_to_ptr.vmem [resolvable:$true] %s333_s17 }
  0xb1   : > { %s8637_s26 = scalar_lea.hbm %s9069_s14, 2560  ;;  %p8639_p8 = pneg %p9062_p11 }
  0xb2   : > { %p8638_p12 = scmp.ne.s32.totalorder %s9069_s14, %s8637_s26  ;;  %s8642_s13 = scalar_lea.hbm %s10619_s0, 5120 }
  0xb3   : > { %p8643_p13 = scmp.lt.u32.totalorder %s9069_s14, %s10619_s0  ;;  %p8644_p0 = scmp.lt.u32.totalorder %s8642_s13, %s8637_s26 }
  0xb4   : > { %p8640_p1 = pnand %p8639_p8, %p8638_p12  ;;  %p8646_p6 = scmp.lt.u32.totalorder %s8637_s26, %s9069_s14 }
  0xb5   : > { %p8645_p2 = por %p8644_p0, %p8643_p13 }
  0xb6   : > { %p8641_p3 = pneg %p8640_p1 }
  0xb7   : > { %p8647_p7 = por %p8646_p6, %p8645_p2 }
  0xb9   : > { %p8648_p9 = pnand %p8647_p7, %p8641_p3 }
  0xbb   : > { %8651 = shalt.err (!%p8648_p9)
}
  0xbc   : > { %s8652_s18 = scalar_lea.vmem %s9071_s17, 2560  ;;  %s8787_s21 = smov [#allocation6]  }
  0xbd   : > { %p8653_p12 = scmp.ne.s32.totalorder %s9071_s17, %s8652_s18  ;;  %s8657_s19 = sshll.u32 %s8787_s21, 4  ;;  %s8658_s19 = int_to_ptr.vmem [resolvable:$false] %s8657_s19 }
  0xbe   : > { %s8659_s1 = scalar_lea.vmem %s8658_s19, 5120  ;;  %p8660_p10 = scmp.lt.s32.totalorder %s9071_s17, %s8658_s19 }
  0xbf   : > { %p8655_p1 = pnand %p8653_p12, %p8639_p8  ;;  %p8661_p13 = scmp.lt.s32.totalorder %s8659_s1, %s8652_s18 }
  0xc1   : > { %p8656_p4 = pneg %p8655_p1  ;;  %p8662_p0 = por %p8661_p13, %p8660_p10 }
  0xc3   : > { %p8663_p2 = pnand %p8662_p0, %p8656_p4 }
  0xc5   : > { %8666 = shalt.err (!%p8663_p2)
}
  0xc6   : > { %8206 = dma.hbm_to_vmem [thread:$0]  (!%p9062_p11), %s9069_s14, 2560, %s9071_s17, %s322_s16  }
  0xc7   : > { %p10643_p3 = scmp.ne.s32.totalorder %s10633_s12, 0 }
  0xc8   : > { %s9101_s2 = sand.u32 (!%p10643_p3), 1, %s8769_s28  }
  0xc9   : > { %342 = sbr.rel (%p10643_p3) target bundleno = 1352 (0x548), region = 48  ;;  %s345_s24 = scalar_lea.sflag (!%p10643_p3), [#allocation7], %s9101_s2 }
  0xca   : > { %s8151_s26 = smul.u32 (!%p10643_p3), 160, %s9101_s2 }
  0xcc   : > { %s9105_s22 = scalar_lea.vmem (!%p10643_p3), [#allocation6], %s8151_s26 }
  0xd0   : > { %8740 = dma.done.wait (%p9046_p5), %s345_s24, 2560  }
  0xd1   : > { %8742 = vsyncadd (%p9046_p5), %s345_s24, 4294964736  ;;  %p10644_p10 = scmp.eq.s32.totalorder %s8866_s11, 0 }
  0xd3   : > { %8744 = dma.done.wait (%p10644_p10), [#allocation10], 256   ;;  %p10645_p4 = pmov %p10644_p10 }
  0xd5   : > { %8746 = vsyncadd (%p10645_p4), [#allocation10], 4294967040  ;;  %p10646_p11 = pmov %p10645_p4 }
  0xd6   : > { %p10647_p8 = pmov %p10645_p4 }
  0xd7   : > { %8748 = dma.done.wait (%p10646_p11), [#allocation13], 192  }
  0xd8   : > { %8750 = vsyncadd (%p10647_p8), [#allocation13], 4294967104  ;;  %p10648_p6 = pmov %p10645_p4 }
  0xd9   : > { %p10649_p7 = pmov %p10645_p4 }
  0xda   : > { %8752 = dma.done.wait (%p10648_p6), [#allocation16], 128  }
  0xdb   : > { %8754 = vsyncadd (%p10649_p7), [#allocation16], 4294967168  ;;  %v576_v0 = vlaneseq  ;;  %v8788_v1 = vmov 1983009808   ;;  %v413_v5 = vld [vmem:[%s9105_s22 + $0x10] sm:$0xff]  ;;  %v414_v6 = vld [vmem:[%s9105_s22 + $0x18] sm:$0xff] }
  0xdc   : > { %v574_v2 = vunpack.c.l.s4 %v8788_v1  ;;  %v411_v7 = vld [vmem:[%s9105_s22] sm:$0xff]  ;;  %v453_v8 = vcombine.high %v413_v5, %v413_v5  ;;  %v454_v9 = vcombine.high %v414_v6, %v414_v6  ;;  %v412_v11 = vld [vmem:[%s9105_s22 + $0x8] sm:$0xff]  ;;  %v417_v18 = vld [vmem:[%s9105_s22 + $0x30] sm:$0xff]  ;;  %s8789_s12 = smov 127   ;;  %s8790_s10 = smov 110   ;;  %vm819_vm0 = vcmask 1043456  }
  0xdd   : > { %v9123_v4 = vshrl.u32 %v576_v0, 7  ;;  %v451_v12 = vcombine.high %v411_v7, %v411_v7  ;;  %v415_v13 = vld [vmem:[%s9105_s22 + $0x20] sm:$0xff]  ;;  %v416_v14 = vld [vmem:[%s9105_s22 + $0x28] sm:$0xff]  ;;  %v452_v15 = vcombine.high %v412_v11, %v412_v11  ;;  %v418_v19 = vld [vmem:[%s9105_s22 + $0x38] sm:$0xff]  ;;  %v457_v23 = vcombine.high %v417_v18, %v417_v18  ;;  %s8791_s23 = smov 126   ;;  %s8792_s14 = smov 112  }
  0xde   : > { %v575_v3 = vunpack.c.0.s8 %v574_v2  ;;  %v455_v16 = vcombine.high %v415_v13, %v415_v13  ;;  %v456_v17 = vcombine.high %v416_v14, %v416_v14  ;;  %v7718_v20 = vpack.c.bf16 %v453_v8, %v413_v5  ;;  %v419_v38 = vld [vmem:[%s9105_s22 + $0x40] sm:$0xff]  ;;  %v420_v39 = vld [vmem:[%s9105_s22 + $0x48] sm:$0xff]  ;;  %s8793_s17 = smov 111   ;;  %s8794_s16 = smov 96   ;;  %v422_v8 = vld [vmem:[%s9105_s22 + $0x58] sm:$0xff] }
  0xdf   : > { %v7719_v21 = vpack.c.bf16 %v454_v9, %v414_v6  ;;  %v7716_v22 = vpack.c.bf16 %v451_v12, %v411_v7  ;;  %v7717_v24 = vpack.c.bf16 %v452_v15, %v412_v11  ;;  %v458_v27 = vcombine.high %v418_v19, %v418_v19  ;;  %s8795_s13 = smov 95   ;;  %s8796_s18 = smov 94   ;;  %v421_v7 = vld [vmem:[%s9105_s22 + $0x50] sm:$0xff] }
  0xe0   : > { %v9129_v10 = vsub.s32 %v575_v3, %v9123_v4  ;;  %v7720_v25 = vpack.c.bf16 %v455_v16, %v415_v13  ;;  %v7721_v26 = vpack.c.bf16 %v456_v17, %v416_v14  ;;  %v7722_v31 = vpack.c.bf16 %v457_v23, %v417_v18  ;;  %s8152_s21 = smul.u32 96, %s9101_s2  ;;  %p10650_p9 = scmp.ne.s32.totalorder %s10640_s15, 0 }
  0xe1   : > { %v7723_v35 = vpack.c.bf16 %v458_v27, %v418_v19  ;;  %v459_v43 = vcombine.high %v419_v38, %v419_v38  ;;  %v460_v44 = vcombine.high %v420_v39, %v420_v39  ;;  %v461_v11 = vcombine.high %v421_v7, %v421_v7  ;;  %s8153_s1 = smul.u32 1536, %s8866_s11 }
  0xe2   : > { %v596_v28 = vrot.slane %v7718_v20, %v9129_v10  ;;  %v603_v29 = vrot.slane %v7719_v21, %v9129_v10  ;;  %v579_v30 = vrot.slane %v7716_v22, %v9129_v10  ;;  %v586_v32 = vrot.slane %v7717_v24, %v9129_v10  ;;  %v423_v20 = vld [vmem:[%s9105_s22 + $0x60] sm:$0xff]  ;;  %v424_v21 = vld [vmem:[%s9105_s22 + $0x68] sm:$0xff]  ;;  %s10447_s19 = scalar_lea.vmem [#allocation18], %s8152_s21 }
  0xe3   : > { %v613_v33 = vrot.slane %v7720_v25, %v9129_v10  ;;  %v620_v34 = vrot.slane %v7721_v26, %v9129_v10  ;;  %v630_v37 = vrot.slane %v7722_v31, %v9129_v10  ;;  %v637_v42 = vrot.slane %v7723_v35, %v9129_v10  ;;  %s7526_s26 = sshll.u32 %s10447_s19, 4  ;;  %s7527_s26 = int_to_ptr.vmem [resolvable:$true] %s7526_s26 }
  0xe4   : > { %v604_v36 = vcombine.low %v596_v28, %v603_v29  ;;  %v587_v40 = vcombine.low %v579_v30, %v586_v32  ;;  %v8465_v46 = vcombine.low %v586_v32, %v586_v32  ;;  %v7724_v48 = vpack.c.bf16 %v459_v43, %v419_v38 }
  0xe5   : > { %v621_v41 = vcombine.low %v613_v33, %v620_v34  ;;  %v638_v47 = vcombine.low %v630_v37, %v637_v42  ;;  %v7725_v49 = vpack.c.bf16 %v460_v44, %v420_v39  ;;  %v8466_v50 = vcombine.low %v579_v30, %v579_v30  ;;  %v425_v39 = vld [vmem:[%s9105_s22 + $0x70] sm:$0xff] }
  0xe6   : > { %752 = vst [vmem:[#allocation2 + $0x8] sm:$0xff] %v604_v36  ;;  %v801_v45 = vrot.slane %v587_v40, %v9129_v10  ;;  %7736 = vst.sshfl [vmem:[#allocation3] sm:$0xf pattern:$0x76325410] %v587_v40  ;;  %v647_v51 = vrot.slane %v7724_v48, %v9129_v10  ;;  %v847_v62 = vrot.slane %v8465_v46, %v9129_v10  ;;  %v8797_v31 = vmov 0  }
  0xe7   : > { %753 = vst [vmem:[#allocation2 + $0x10] sm:$0xff] %v621_v41  ;;  %754 = vst [vmem:[#allocation2 + $0x18] sm:$0xff] %v638_v47  ;;  %v654_v52 = vrot.slane %v7725_v49, %v9129_v10  ;;  %v794_v55 = vrot.slane %v8466_v50, %v9129_v10  ;;  %v462_v12 = vcombine.high %v422_v8, %v422_v8  ;;  %1249 = vmatprep.mubr.bf16.mxu0 %v8797_v31  ;;  %v426_v40 = vld [vmem:[%s9105_s22 + $0x78] sm:$0xff]  ;;  %vm821_vm1 = vcmask 1039360  }
  0xe8   : > { %812 = vrot.lane.b32.xlu0 %v801_v45, %s8789_s12  ;;  %7737 = vst.sshfl [vmem:[#allocation3 + $0x8] sm:$0xf pattern:$0x76325410] %v8465_v46  ;;  %v7726_v14 = vpack.c.bf16 %v461_v11, %v421_v7  ;;  %v463_v22 = vcombine.high %v423_v20, %v423_v20  ;;  %v464_v23 = vcombine.high %v424_v21, %v424_v21  ;;  %vm910_vm2 = vcmask 916480  }
  0xe9   : > { %v655_v53 = vcombine.low %v647_v51, %v654_v52  ;;  %v7727_v15 = vpack.c.bf16 %v462_v12, %v422_v8  ;;  %1290 = vmatprep.mubr.bf16.mxu1 %v8797_v31  ;;  %8278 = vset.pattern.permute.xlu0 %v8797_v31  ;;  %v465_v42 = vcombine.high %v425_v39, %v425_v39  ;;  %vm865_vm3 = vcmask 1031168  }
  0xea   : > { %v9194_v18 = vrot.slane %v7726_v14, %v9129_v10  ;;  %v7728_v25 = vpack.c.bf16 %v463_v22, %v423_v20  ;;  %v7729_v26 = vpack.c.bf16 %v464_v23, %v424_v21  ;;  %v466_v43 = vcombine.high %v426_v40, %v426_v40 }
  0xeb   : > { %755 = vst [vmem:[#allocation2 + $0x20] sm:$0xff] %v655_v53  ;;  %v9197_v19 = vrot.slane %v7727_v15, %v9129_v10  ;;  %v7730_v44 = vpack.c.bf16 %v465_v42, %v425_v39  ;;  %vm954_vm4 = vcmask 908288   ;;  %vm999_vm5 = vcmask 900096  }
  0xec   : > { %991 = vrot.lane.b32.xlu0 %v801_v45, %s8790_s10  ;;  %v681_v28 = vrot.slane %v7728_v25, %v9129_v10  ;;  %v688_v29 = vrot.slane %v7729_v26, %v9129_v10  ;;  %vm1043_vm6 = vcmask 785408   ;;  %vm1088_vm7 = vcmask 777216  }
  0xed   : > { %v7738_v54 = vld.sshfl [vmem:[#allocation2 + $0x8] sm:$0x3 pattern:$0x76325410]  ;;  %v9204_v24 = vcombine.low %v9194_v18, %v9197_v19  ;;  %v698_v47 = vrot.slane %v7730_v44, %v9129_v10  ;;  %vm1132_vm8 = vcmask 769024   ;;  %vm1204_vm9 = vcmask 1041408  }
  0xee   : > { %859 = vrot.lane.b32.xlu1 %v7738_v54, %s8791_s23  ;;  %v1339_v56 = vld [vmem:[#allocation2 + $0xa] sm:$0xff]  ;;  %v8283_v58 = vld [vmem:[#allocation2 + $0x8] ss:$0 sps:$4 sm:$0x33]   ;;  %v689_v32 = vcombine.low %v681_v28, %v688_v29  ;;  %v1880_v37 = vld [vmem:[#allocation2 + $0x14] sm:$0xff]  ;;  %vm1200_vm10 = vcmask 293888  }
  0xef   : > { %v1387_v57 = vcombine.high %v1339_v56, %v1339_v56  ;;  %7760 = vst.sshfl [vmem:[#allocation3 + $0x50] sm:$0xf pattern:$0x76325410] %v1339_v56  ;;  %v809_v59 = vrot.slane %v8283_v58, %v9129_v10  ;;  %v1343_v3 = vcombine.low %v1339_v56, %v1339_v56  ;;  %v9180_v6 = vrot.slane %v1339_v56, %v9129_v10 }
  0xf0   : > { %810 = vrot.lane.b32.xlu0 %v794_v55, %s8789_s12  ;;  %v8284_v60 = vld [vmem:[#allocation2 + $0x8] ss:$0 sps:$4 sm:$0x33]   ;;  %v8291_v9 = vld [vmem:[#allocation2 + $0x12] ss:$0 sps:$4 sm:$0x33]   ;;  %v1884_v38 = vcombine.low %v1880_v37, %v1880_v37  ;;  %v9243_v46 = vrot.slane %v1880_v37, %v9129_v10  ;;  %v1928_v49 = vcombine.high %v1880_v37, %v1880_v37 }
  0xf1   : > { %7761 = vst.sshfl [vmem:[#allocation3 + $0x58] sm:$0xf pattern:$0x76325410] %v1387_v57  ;;  %v899_v61 = vrot.slane %v8284_v60, %v9129_v10  ;;  %v1350_v5 = vrot.slane %v1343_v3, %v9129_v10  ;;  %v1401_v13 = vrot.slane %v1387_v57, %v9129_v10  ;;  %v1365_v16 = vrot.slane %v8291_v9, %v9129_v10  ;;  %v428_v37 = vld [vmem:[%s9105_s22 + $0x88] sm:$0xff] }
  0xf2   : > { %855 = vrot.lane.b32.xlu1 %v801_v45, %s8791_s23  ;;  %v8285_v63 = vld [vmem:[#allocation2 + $0x8] ss:$0 sps:$4 sm:$0x33]   ;;  %v8292_v17 = vld [vmem:[#allocation2 + $0x12] ss:$0 sps:$4 sm:$0x33]   ;;  %v1891_v41 = vrot.slane %v1884_v38, %v9129_v10  ;;  %v9254_v52 = vrot.slane %v1928_v49, %v9129_v10 }
  0xf3   : > { %v988_v0 = vrot.slane %v8285_v63, %v9129_v10  ;;  %v8286_v1 = vld [vmem:[#allocation2 + $0x8] ss:$0 sps:$4 sm:$0x33]   ;;  %v1452_v27 = vrot.slane %v8292_v17, %v9129_v10  ;;  %756 = vst [vmem:[#allocation2 + $0x28] sm:$0xff] %v9204_v24  ;;  %757 = vst [vmem:[#allocation2 + $0x30] sm:$0xff] %v689_v32  ;;  %v9296_v17 = vld [vmem:[#allocation2 + $0x1e] sm:$0xff] }
  0xf4   : > { %900 = vrot.lane.b32.xlu0 %v794_v55, %s8792_s14  ;;  %v1077_v2 = vrot.slane %v8286_v1, %v9129_v10  ;;  %v7762_v30 = vld.sshfl [vmem:[#allocation2 + $0x12] sm:$0x3 pattern:$0x76325410]  ;;  %v2425_v26 = vcombine.low %v9296_v17, %v9296_v17  ;;  %vm5178_vm11 = vcmask 64512  }
  0xf5   : > { %v8293_v33 = vld [vmem:[#allocation2 + $0x12] ss:$0 sps:$4 sm:$0x33]   ;;  %v8299_v51 = vld [vmem:[#allocation2 + $0x1c] ss:$0 sps:$4 sm:$0x33]  }
  0xf6   : > { %902 = vrot.lane.b32.xlu1 %v801_v45, %s8792_s14  ;;  %v1539_v34 = vrot.slane %v8293_v33, %v9129_v10  ;;  %v8294_v35 = vld [vmem:[#allocation2 + $0x12] ss:$0 sps:$4 sm:$0x33]   ;;  %v1906_v53 = vrot.slane %v8299_v51, %v9129_v10  ;;  %v8302_v9 = vld [vmem:[#allocation2 + $0x1c] ss:$0 sps:$4 sm:$0x33]  }
  0xf7   : > { %v1626_v36 = vrot.slane %v8294_v35, %v9129_v10  ;;  %v9264_v56 = vld.sshfl [vmem:[#allocation2 + $0x1c] sm:$0x3 pattern:$0x76325410]  ;;  %v9314_v35 = vrot.slane %v2425_v26, %v9129_v10 }
  0xf8   : > { %814 = vrot.lane.b32.xlu0 %v809_v59, %s8789_s12 }
  0xfa   : > { %944 = vrot.lane.b32.xlu1 %v801_v45, %s8793_s17 }
  0xfc   : > { %904 = vrot.lane.b32.xlu0 %v899_v61, %s8792_s14 }
  0xfe   : > { %1033 = vrot.lane.b32.xlu1 %v801_v45, %s8794_s16 }
 0x100   : > { %946 = vrot.lane.b32.xlu0 %v847_v62, %s8793_s17 }
 0x102   : > { %857 = vrot.lane.b32.xlu1 %v847_v62, %s8791_s23 }
 0x104   : > { %1035 = vrot.lane.b32.xlu0 %v847_v62, %s8794_s16 }
 0x106   : > { %989 = vrot.lane.b32.xlu1 %v794_v55, %s8790_s10 }
 0x108   : > { %1080 = vrot.lane.b32.xlu0 %v801_v45, %s8795_s13 }
 0x10a   : > { %1078 = vrot.lane.b32.xlu1 %v794_v55, %s8795_s13 }
 0x10c   : > { %993 = vrot.lane.b32.xlu0 %v988_v0, %s8790_s10  ;;  %v8301_v0 = vld [vmem:[#allocation2 + $0x1c] ss:$0 sps:$4 sm:$0x33]  }
 0x10d   : > { %v2080_v8 = vrot.slane %v8301_v0, %v9129_v10 }
 0x10e   : > { %948 = vrot.lane.b32.xlu1 %v7738_v54, %s8793_s17 }
 0x110   : > { %1082 = vrot.lane.b32.xlu0 %v1077_v2, %s8795_s13 }
 0x112   : > { %1037 = vrot.lane.b32.xlu1 %v7738_v54, %s8794_s16 }
 0x114   : > { %1124 = vrot.lane.b32.xlu0 %v847_v62, %s8796_s18 }
 0x116   : > { %1122 = vrot.lane.b32.xlu1 %v801_v45, %s8796_s18  ;;  %v7731_v45 = vpack.c.bf16 %v466_v43, %v426_v40 }
 0x118   : > { %1366 = vrot.lane.b32.xlu0 %v1350_v5, %s8789_s12  ;;  %v705_v48 = vrot.slane %v7731_v45, %v9129_v10 }
 0x11a   : > { %1126 = vrot.lane.b32.xlu1 %v7738_v54, %s8796_s18  ;;  %v706_v50 = vcombine.low %v698_v47, %v705_v48  ;;  %v8300_v54 = vld [vmem:[#allocation2 + $0x1c] ss:$0 sps:$4 sm:$0x33]  }
 0x11b   : > { %v1993_v55 = vrot.slane %v8300_v54, %v9129_v10 }
 0x11c   : > { %1409 = vrot.lane.b32.xlu0 %v9180_v6, %s8791_s23  ;;  %758 = vst [vmem:[#allocation2 + $0x38] sm:$0xff] %v706_v50 }
 0x11e   : > { %1368 = vrot.lane.b32.xlu1 %v9180_v6, %s8789_s12 }
 0x120   : > { %1453 = vrot.lane.b32.xlu0 %v1350_v5, %s8792_s14 }
 0x122   : > { %1411 = vrot.lane.b32.xlu1 %v1401_v13, %s8791_s23 }
 0x124   : > { %1370 = vrot.lane.b32.xlu0 %v1365_v16, %s8789_s12  ;;  %v2167_v16 = vrot.slane %v8302_v9, %v9129_v10 }
 0x126   : > { %1455 = vrot.lane.b32.xlu1 %v9180_v6, %s8792_s14 }
 0x128   : > { %1457 = vrot.lane.b32.xlu0 %v1452_v27, %s8792_s14 }
 0x12a   : > { %1413 = vrot.lane.b32.xlu1 %v7762_v30, %s8791_s23 }
 0x12c   : > { %1498 = vrot.lane.b32.xlu0 %v1401_v13, %s8793_s17 }
 0x12e   : > { %1496 = vrot.lane.b32.xlu1 %v9180_v6, %s8793_s17 }
 0x130   : > { %1542 = vrot.lane.b32.xlu0 %v9180_v6, %s8790_s10 }
 0x132   : > { %1540 = vrot.lane.b32.xlu1 %v1350_v5, %s8790_s10 }
 0x134   : > { %1585 = vrot.lane.b32.xlu0 %v1401_v13, %s8794_s16 }
 0x136   : > { %1583 = vrot.lane.b32.xlu1 %v9180_v6, %s8794_s16 }
 0x138   : > { %1629 = vrot.lane.b32.xlu0 %v9180_v6, %s8795_s13 }
 0x13a   : > { %1627 = vrot.lane.b32.xlu1 %v1350_v5, %s8795_s13 }
 0x13c   : > { %1544 = vrot.lane.b32.xlu0 %v1539_v34, %s8790_s10 }
 0x13e   : > { %1500 = vrot.lane.b32.xlu1 %v7762_v30, %s8793_s17 }
 0x140   : > { %1631 = vrot.lane.b32.xlu0 %v1626_v36, %s8795_s13  ;;  %v427_v36 = vld [vmem:[%s9105_s22 + $0x80] sm:$0xff] }
 0x141   : > { %v467_v40 = vcombine.high %v427_v36, %v427_v36 }
 0x142   : > { %1587 = vrot.lane.b32.xlu1 %v7762_v30, %s8794_s16 }
 0x143   : > { %v7732_v49 = vpack.c.bf16 %v467_v40, %v427_v36 }
 0x144   : > { %1672 = vrot.lane.b32.xlu0 %v1401_v13, %s8796_s18 }
 0x146   : > { %1670 = vrot.lane.b32.xlu1 %v9180_v6, %s8796_s18 }
 0x148   : > { %1907 = vrot.lane.b32.xlu0 %v1891_v41, %s8789_s12 }
 0x14a   : > { %1674 = vrot.lane.b32.xlu1 %v7762_v30, %s8796_s18 }
 0x14c   : > { %1950 = vrot.lane.b32.xlu0 %v9243_v46, %s8791_s23 }
 0x14e   : > { %1909 = vrot.lane.b32.xlu1 %v9243_v46, %s8789_s12 }
 0x150   : > { %1994 = vrot.lane.b32.xlu0 %v1891_v41, %s8792_s14 }
 0x152   : > { %1952 = vrot.lane.b32.xlu1 %v9254_v52, %s8791_s23 }
 0x154   : > { %1911 = vrot.lane.b32.xlu0 %v1906_v53, %s8789_s12 }
 0x156   : > { %1996 = vrot.lane.b32.xlu1 %v9243_v46, %s8792_s14 }
 0x158   : > { %1998 = vrot.lane.b32.xlu0 %v1993_v55, %s8792_s14 }
 0x15a   : > { %1954 = vrot.lane.b32.xlu1 %v9264_v56, %s8791_s23  ;;  %v813_v57 = vpop.permute.xlu0 %812 }
 0x15b   : > { %v817_v61 = vrot.slane %v813_v57, 4 }
 0x15c   : > { %2039 = vrot.lane.b32.xlu0 %v9254_v52, %s8793_s17 }
 0x15e   : > { %2037 = vrot.lane.b32.xlu1 %v9243_v46, %s8793_s17  ;;  %v9273_v58 = vpop.permute.xlu0 %991 }
 0x15f   : > { %v996_v54 = vrot.slane %v9273_v58, 4 }
 0x160   : > { %v9275_v59 = vpop.permute.xlu1 %859  ;;  %2083 = vrot.lane.b32.xlu0 %v9243_v46, %s8790_s10 }
 0x161   : > { %v863_v30 = vrot.slane %v9275_v59, 4  ;;  %v715_v59 = vrot.slane %v7732_v49, %v9129_v10 }
 0x162   : > { %2081 = vrot.lane.b32.xlu1 %v1891_v41, %s8790_s10  ;;  %v811_v60 = vpop.permute.xlu0 %810 }
 0x163   : > { %v816_v63 = vrot.slane %v811_v60, 4 }
 0x164   : > { %v9280_v62 = vpop.permute.xlu1 %855  ;;  %2126 = vrot.lane.b32.xlu0 %v9254_v52, %s8794_s16 }
 0x165   : > { %v820_v1 = vsel %vm819_vm0, %v816_v63, %v817_v61  ;;  %v861_v38 = vrot.slane %v9280_v62, 4 }
 0x166   : > { %2124 = vrot.lane.b32.xlu1 %v9243_v46, %s8794_s16  ;;  %v822_v2 = vsel %vm821_vm1, %v811_v60, %v820_v1  ;;  %v901_v3 = vpop.permute.xlu0 %900 }
 0x167   : > { %827 = vst [vmem:[#allocation3] sm:$0xcc] %v822_v2  ;;  %v906_v6 = vrot.slane %v901_v3, 4 }
 0x168   : > { %v903_v5 = vpop.permute.xlu1 %902  ;;  %2170 = vrot.lane.b32.xlu0 %v9243_v46, %s8795_s13 }
 0x169   : > { %v907_v7 = vrot.slane %v903_v5, 4 }
 0x16a   : > { %2168 = vrot.lane.b32.xlu1 %v1891_v41, %s8795_s13  ;;  %v815_v12 = vpop.permute.xlu0 %814  ;;  %v468_v41 = vcombine.high %v428_v37, %v428_v37 }
 0x16b   : > { %v909_v11 = vsel %vm819_vm0, %v906_v6, %v907_v7  ;;  %v818_v15 = vrot.slane %v815_v12, 4 }
 0x16c   : > { %v945_v13 = vpop.permute.xlu1 %944  ;;  %v911_v14 = vsel %vm910_vm2, %v901_v3, %v909_v11  ;;  %2085 = vrot.lane.b32.xlu0 %v2080_v8, %s8790_s10  ;;  %v7733_v53 = vpack.c.bf16 %v468_v41, %v428_v37  ;;  %v1859_v8 = vld [vmem:[#allocation2 + $0x14] sm:$0xff] }
 0x16d   : > { %916 = vst [vmem:[#allocation3 + $0x10] sm:$0xcc] %v911_v14  ;;  %v823_v20 = vsel %vm819_vm0, %v817_v61, %v818_v15  ;;  %v950_v32 = vrot.slane %v945_v13, 4  ;;  %v2469_v61 = vcombine.high %v9296_v17, %v9296_v17  ;;  %v1861_v11 = vcombine.high %v1859_v8, %v1859_v8  ;;  %v8314_v14 = vld [vmem:[#allocation2 + $0x26] ss:$0 sps:$4 sm:$0x33]  }
 0x16e   : > { %2041 = vrot.lane.b32.xlu1 %v9264_v56, %s8793_s17  ;;  %v824_v21 = vsel %vm821_vm1, %v813_v57, %v823_v20  ;;  %v905_v22 = vpop.permute.xlu0 %904  ;;  %v9338_v57 = vrot.slane %v9296_v17, %v9129_v10 }
 0x16f   : > { %828 = vst [vmem:[#allocation3 + $0x8] sm:$0xcc] %v824_v21  ;;  %v908_v25 = vrot.slane %v905_v22, 4  ;;  %v9359_v9 = vrot.slane %v2469_v61, %v9129_v10 }
 0x170   : > { %v1034_v23 = vpop.permute.xlu1 %1033  ;;  %2172 = vrot.lane.b32.xlu0 %v2167_v16, %s8795_s13 }
 0x171   : > { %v912_v27 = vsel %vm819_vm0, %v907_v7, %v908_v25  ;;  %v1039_v42 = vrot.slane %v1034_v23, 4  ;;  %v8313_v7 = vld [vmem:[#allocation2 + $0x26] ss:$0 sps:$4 sm:$0x33]  }
 0x172   : > { %2128 = vrot.lane.b32.xlu1 %v9264_v56, %s8794_s16  ;;  %v913_v28 = vsel %vm910_vm2, %v903_v5, %v912_v27  ;;  %v9309_v29 = vpop.permute.xlu0 %946  ;;  %v2447_v26 = vrot.slane %v8313_v7, %v9129_v10 }
 0x173   : > { %917 = vst [vmem:[#allocation3 + $0x18] sm:$0xcc] %v913_v28  ;;  %v951_v34 = vrot.slane %v9309_v29, 4 }
 0x174   : > { %v858_v33 = vpop.permute.xlu1 %857  ;;  %2213 = vrot.lane.b32.xlu0 %v9254_v52, %s8796_s18 }
 0x175   : > { %v862_v39 = vrot.slane %v858_v33, 4  ;;  %v953_v43 = vsel %vm819_vm0, %v950_v32, %v951_v34 }
 0x176   : > { %2211 = vrot.lane.b32.xlu1 %v9243_v46, %s8796_s18  ;;  %v955_v47 = vsel %vm954_vm4, %v945_v13, %v953_v43  ;;  %v9329_v48 = vpop.permute.xlu0 %1035 }
 0x177   : > { %v864_v44 = vsel %vm819_vm0, %v861_v38, %v862_v39  ;;  %v867_v45 = vsel %vm819_vm0, %v862_v39, %v863_v30  ;;  %960 = vst [vmem:[#allocation3 + $0x20] sm:$0x33] %v955_v47  ;;  %v1040_v52 = vrot.slane %v9329_v48, 4  ;;  %v2534_v39 = vrot.slane %v8314_v14, %v9129_v10 }
 0x178   : > { %v866_v50 = vsel %vm865_vm3, %v9280_v62, %v864_v44  ;;  %v868_v46 = vsel %vm865_vm3, %v858_v33, %v867_v45  ;;  %v990_v51 = vpop.permute.xlu1 %989  ;;  %2448 = vrot.lane.b32.xlu0 %v9314_v35, %s8789_s12  ;;  %v722_v62 = vrot.slane %v7733_v53, %v9129_v10 }
 0x179   : > { %871 = vst [vmem:[#allocation3 + $0x10] sm:$0x33] %v866_v50  ;;  %872 = vst [vmem:[#allocation3 + $0x18] sm:$0x33] %v868_v46  ;;  %v995_v55 = vrot.slane %v990_v51, 4  ;;  %v1042_v60 = vsel %vm819_vm0, %v1039_v42, %v1040_v52 }
 0x17a   : > { %2215 = vrot.lane.b32.xlu1 %v9264_v56, %s8796_s18  ;;  %v1044_v0 = vsel %vm1043_vm6, %v1034_v23, %v1042_v60  ;;  %v1081_v1 = vpop.permute.xlu0 %1080  ;;  %v723_v56 = vcombine.low %v715_v59, %v722_v62 }
 0x17b   : > { %v998_v63 = vsel %vm819_vm0, %v995_v55, %v996_v54  ;;  %1049 = vst [vmem:[#allocation3 + $0x30] sm:$0x33] %v1044_v0  ;;  %v1085_v5 = vrot.slane %v1081_v1, 4 }
 0x17c   : > { %v1000_v2 = vsel %vm999_vm5, %v990_v51, %v998_v63  ;;  %v1079_v3 = vpop.permute.xlu1 %1078  ;;  %2491 = vrot.lane.b32.xlu0 %v9338_v57, %s8791_s23  ;;  %759 = vst [vmem:[#allocation2 + $0x40] sm:$0xff] %v723_v56  ;;  %v8325_v56 = vld [vmem:[#allocation2 + $0x26] ss:$0 sps:$4 sm:$0x33]  }
 0x17d   : > { %1005 = vst [vmem:[#allocation3 + $0x20] sm:$0xcc] %v1000_v2  ;;  %v1084_v6 = vrot.slane %v1079_v3, 4 }
 0x17e   : > { %2450 = vrot.lane.b32.xlu1 %v9338_v57, %s8789_s12  ;;  %v994_v13 = vpop.permute.xlu0 %993 }
 0x17f   : > { %v1087_v12 = vsel %vm819_vm0, %v1084_v6, %v1085_v5  ;;  %v997_v21 = vrot.slane %v994_v13, 4 }
 0x180   : > { %v949_v15 = vpop.permute.xlu1 %948  ;;  %v1089_v16 = vsel %vm1088_vm7, %v1079_v3, %v1087_v12  ;;  %v8307_v17 = vld [vmem:[#allocation3 + $0x4] ss:$16 sps:$4 sm:$0xff]   ;;  %v8309_v20 = vld [vmem:[#allocation3] ss:$16 sps:$4 sm:$0xff]   ;;  %v8310_v23 = vld [vmem:[#allocation3 + $0xc] ss:$16 sps:$4 sm:$0xff]   ;;  %2535 = vrot.lane.b32.xlu0 %v9314_v35, %s8792_s14 }
 0x181   : > { %v952_v22 = vrot.slane %v949_v15, 4  ;;  %1094 = vst [vmem:[#allocation3 + $0x30] sm:$0xcc] %v1089_v16  ;;  %v8312_v25 = vld [vmem:[#allocation3 + $0x8] ss:$16 sps:$4 sm:$0xff]   ;;  %1217 = vmatprep.subr.bf16.mxu0 %v8307_v17  ;;  %v1001_v27 = vsel %vm819_vm0, %v996_v54, %v997_v21  ;;  %1258 = vmatprep.subr.bf16.mxu1 %v8310_v23  ;;  %v2621_v21 = vrot.slane %v8325_v56, %v9129_v10 }
 0x182   : > { %7784 = vst.sshfl [vmem:[#allocation3] sm:$0xf pattern:$0x76325410] %v1859_v8  ;;  %2493 = vrot.lane.b32.xlu1 %v9359_v9, %s8791_s23  ;;  %1218 = vmatpush1.bf16.msra.mxu0 %v8309_v20  ;;  %v1002_v30 = vsel %vm999_vm5, %v9273_v58, %v1001_v27  ;;  %v1083_v32 = vpop.permute.xlu0 %1082 }
 0x183   : > { %7785 = vst.sshfl [vmem:[#allocation3 + $0x8] sm:$0xf pattern:$0x76325410] %v1861_v11  ;;  %v956_v28 = vsel %vm819_vm0, %v951_v34, %v952_v22  ;;  %1006 = vst [vmem:[#allocation3 + $0x28] sm:$0xcc] %v1002_v30  ;;  %1259 = vmatpush1.bf16.msra.mxu1 %v8312_v25 }
 0x184   : > { %v957_v33 = vsel %vm954_vm4, %v9309_v29, %v956_v28  ;;  %v1038_v36 = vpop.permute.xlu1 %1037  ;;  %v1086_v37 = vrot.slane %v1083_v32, 4  ;;  %2452 = vrot.lane.b32.xlu0 %v2447_v26, %s8789_s12  ;;  %v9384_v29 = vld.sshfl [vmem:[#allocation2 + $0x26] sm:$0x3 pattern:$0x76325410] }
 0x185   : > { %961 = vst [vmem:[#allocation3 + $0x28] sm:$0x33] %v957_v33  ;;  %v1041_v38 = vrot.slane %v1038_v36, 4  ;;  %v9415_v22 = vld [vmem:[#allocation9] sm:$0xf] }
 0x186   : > { %2537 = vrot.lane.b32.xlu1 %v9338_v57, %s8792_s14  ;;  %v1090_v34 = vsel %vm819_vm0, %v1085_v5, %v1086_v37  ;;  %v1125_v41 = vpop.permute.xlu0 %1124  ;;  %v8326_v28 = vld [vmem:[#allocation2 + $0x26] ss:$0 sps:$4 sm:$0x33]  }
 0x187   : > { %v1045_v58 = vsel %vm819_vm0, %v1040_v52, %v1041_v38  ;;  %v1091_v40 = vsel %vm1088_vm7, %v1081_v1, %v1090_v34  ;;  %v1129_v44 = vrot.slane %v1125_v41, 4 }
 0x188   : > { %v1046_v42 = vsel %vm1043_vm6, %v9329_v48, %v1045_v58  ;;  %v1123_v43 = vpop.permute.xlu1 %1122  ;;  %1095 = vst [vmem:[#allocation3 + $0x38] sm:$0xcc] %v1091_v40  ;;  %v8315_v45 = vld [vmem:[#allocation3 + $0x24] ss:$16 sps:$4 sm:$0xff]   ;;  %v8317_v47 = vld [vmem:[#allocation3 + $0x20] ss:$16 sps:$4 sm:$0xff]   ;;  %2539 = vrot.lane.b32.xlu0 %v2534_v39, %s8792_s14  ;;  %v2708_v58 = vrot.slane %v8326_v28, %v9129_v10 }
 0x189   : > { %1050 = vst [vmem:[#allocation3 + $0x38] sm:$0x33] %v1046_v42  ;;  %v1128_v49 = vrot.slane %v1123_v43, 4  ;;  %1219 = vmatprep.subr.bf16.mxu0 %v8315_v45 }
 0x18a   : > { %2495 = vrot.lane.b32.xlu1 %v9384_v29, %s8791_s23  ;;  %v1367_v46 = vpop.permute.xlu0 %1366  ;;  %1220 = vmatpush1.bf16.msra.mxu0 %v8317_v47 }
 0x18b   : > { %v1131_v50 = vsel %vm819_vm0, %v1128_v49, %v1129_v44  ;;  %v1372_v63 = vrot.slane %v1367_v46, 4 }
 0x18c   : > { %v1127_v51 = vpop.permute.xlu1 %1126  ;;  %v1133_v48 = vsel %vm1132_vm8, %v1123_v43, %v1131_v50  ;;  %2580 = vrot.lane.b32.xlu0 %v9359_v9, %s8793_s17  ;;  %v8467_v50 = vcombine.low %v9194_v18, %v9194_v18 }
 0x18d   : > { %v1130_v52 = vrot.slane %v1127_v51, 4  ;;  %1138 = vst [vmem:[#allocation3 + $0x40] sm:$0x33] %v1133_v48 }
 0x18e   : > { %2578 = vrot.lane.b32.xlu1 %v9338_v57, %s8793_s17  ;;  %v1410_v54 = vpop.permute.xlu0 %1409 }
 0x18f   : > { %v1134_v53 = vsel %vm819_vm0, %v1129_v44, %v1130_v52  ;;  %v1415_v7 = vrot.slane %v1410_v54, 4 }
 0x190   : > { %v1135_v55 = vsel %vm1132_vm8, %v1125_v41, %v1134_v53  ;;  %v1369_v59 = vpop.permute.xlu1 %1368  ;;  %v8318_v60 = vld [vmem:[#allocation3 + $0x2c] ss:$16 sps:$4 sm:$0xff]   ;;  %v8320_v61 = vld [vmem:[#allocation3 + $0x28] ss:$16 sps:$4 sm:$0xff]   ;;  %2624 = vrot.lane.b32.xlu0 %v9338_v57, %s8790_s10 }
 0x191   : > { %1139 = vst [vmem:[#allocation3 + $0x48] sm:$0x33] %v1135_v55  ;;  %v1373_v62 = vrot.slane %v1369_v59, 4  ;;  %1260 = vmatprep.subr.bf16.mxu1 %v8318_v60  ;;  %v9459_v60 = vrot.slane %v8467_v50, %v9129_v10 }
 0x192   : > { %2622 = vrot.lane.b32.xlu1 %v9314_v35, %s8790_s10  ;;  %v1454_v1 = vpop.permute.xlu0 %1453  ;;  %1261 = vmatpush1.bf16.msra.mxu1 %v8320_v61 }
 0x193   : > { %v1375_v0 = vsel %vm819_vm0, %v1372_v63, %v1373_v62  ;;  %v1459_v25 = vrot.slane %v1454_v1, 4  ;;  %v430_v63 = vld [vmem:[%s9105_s22 + $0x98] sm:$0xff] }
 0x194   : > { %v1376_v2 = vsel %vm821_vm1, %v1367_v46, %v1375_v0  ;;  %v1412_v3 = vpop.permute.xlu1 %1411  ;;  %v1148_v5 = vld [vmem:[#allocation3 + $0x40] sm:$0x33]  ;;  %2667 = vrot.lane.b32.xlu0 %v9359_v9, %s8794_s16  ;;  %v2400_v46 = vld [vmem:[#allocation2 + $0x1e] sm:$0xff] }
 0x195   : > { %1381 = vst [vmem:[#allocation3 + $0x50] sm:$0xcc] %v1376_v2  ;;  %v1416_v6 = vrot.slane %v1412_v3, 4  ;;  %v7751_v8 = vcombine.high %v1148_v5, %v1148_v5  ;;  %v7750_v11 = vcombine.low %v1148_v5, %v1148_v5  ;;  %v2402_v61 = vcombine.high %v2400_v46, %v2400_v46 }
 0x196   : > { %2665 = vrot.lane.b32.xlu1 %v9338_v57, %s8794_s16  ;;  %v1371_v13 = vpop.permute.xlu0 %1370 }
 0x197   : > { %v1418_v12 = vsel %vm819_vm0, %v1415_v7, %v1416_v6  ;;  %7754 = vmatprep.subr.msk.bf16.mxu0 %vm1204_vm9, %v7751_v8  ;;  %v1206_v14 = vsel %vm1204_vm9, %v7750_v11, 0  ;;  %v1374_v20 = vrot.slane %v1371_v13, 4  ;;  %v9477_v13 = vcombine.low %v9197_v19, %v9197_v19  ;;  %v8337_v19 = vld [vmem:[#allocation2 + $0x30] ss:$0 sps:$4 sm:$0x33]  }
 0x198   : > { %v1419_v15 = vsel %vm865_vm3, %v1410_v54, %v1418_v12  ;;  %v1456_v16 = vpop.permute.xlu1 %1455  ;;  %v1149_v17 = vld [vmem:[#allocation3 + $0x48] sm:$0x33]  ;;  %1222 = vmatpush1.bf16.msra.mxu0 %v1206_v14  ;;  %2711 = vrot.lane.b32.xlu0 %v9338_v57, %s8795_s13 }
 0x199   : > { %1424 = vst [vmem:[#allocation3 + $0x60] sm:$0x33] %v1419_v15  ;;  %v1460_v23 = vrot.slane %v1456_v16, 4  ;;  %v7753_v26 = vcombine.high %v1149_v17, %v1149_v17  ;;  %v7752_v27 = vcombine.low %v1149_v17, %v1149_v17  ;;  %v1377_v30 = vsel %vm819_vm0, %v1373_v62, %v1374_v20  ;;  %v429_v62 = vld [vmem:[%s9105_s22 + $0x90] sm:$0xff] }
 0x19a   : > { %2709 = vrot.lane.b32.xlu1 %v9314_v35, %s8795_s13  ;;  %v1378_v33 = vsel %vm821_vm1, %v1369_v59, %v1377_v30  ;;  %v1458_v37 = vpop.permute.xlu0 %1457  ;;  %v469_v0 = vcombine.high %v429_v62, %v429_v62 }
 0x19b   : > { %v1462_v32 = vsel %vm819_vm0, %v1459_v25, %v1460_v23  ;;  %7756 = vmatprep.subr.msk.bf16.mxu1 %vm1204_vm9, %v7753_v26  ;;  %v1212_v36 = vsel %vm1204_vm9, %v7752_v27, 0  ;;  %7755 = vmatmul.mubr.msk.bf16.vlgmr.msra.gmra.mrb[0].mxu0 %vm1200_vm10, %v9415_v22  ;;  %1382 = vst [vmem:[#allocation3 + $0x58] sm:$0xcc] %v1378_v33  ;;  %v1461_v35 = vrot.slane %v1458_v37, 4 }
 0x19c   : > { %v1463_v38 = vsel %vm910_vm2, %v1454_v1, %v1462_v32  ;;  %v1414_v39 = vpop.permute.xlu1 %1413  ;;  %1263 = vmatpush1.bf16.msra.mxu1 %v1212_v36  ;;  %1791 = vmatprep.mubr.bf16.mxu0 %v8797_v31  ;;  %v470_v1 = vcombine.high %v430_v63, %v430_v63  ;;  %v7734_v8 = vpack.c.bf16 %v469_v0, %v429_v62  ;;  %v8338_v37 = vld [vmem:[#allocation2 + $0x30] ss:$0 sps:$4 sm:$0x33]  }
 0x19d   : > { %1468 = vst [vmem:[#allocation3 + $0x60] sm:$0xcc] %v1463_v38  ;;  %v1417_v34 = vrot.slane %v1414_v39, 4  ;;  %2626 = vrot.lane.b32.xlu0 %v2621_v21, %s8790_s10  ;;  %v1464_v40 = vsel %vm819_vm0, %v1460_v23, %v1461_v35  ;;  %v2988_v36 = vrot.slane %v8337_v19, %v9129_v10 }
 0x19e   : > { %2582 = vrot.lane.b32.xlu1 %v9384_v29, %s8793_s17  ;;  %v1465_v42 = vsel %vm910_vm2, %v1456_v16, %v1464_v40  ;;  %v9437_v43 = vpop.permute.xlu0 %1498  ;;  %v7735_v11 = vpack.c.bf16 %v470_v1, %v430_v63  ;;  %v732_v14 = vrot.slane %v7734_v8, %v9129_v10 }
 0x19f   : > { %v1420_v41 = vsel %vm819_vm0, %v1416_v6, %v1417_v34  ;;  %7757 = vmatmul.mubr.msk.bf16.vlgmr.msra.gmra.mrb[0].mxu1 %vm1200_vm10, %v9415_v22  ;;  %1469 = vst [vmem:[#allocation3 + $0x68] sm:$0xcc] %v1465_v42  ;;  %v1503_v47 = vrot.slane %v9437_v43, 4 }
 0x1a0   : > { %v1421_v44 = vsel %vm865_vm3, %v1412_v3, %v1420_v41  ;;  %v1497_v45 = vpop.permute.xlu1 %1496  ;;  %1832 = vmatprep.mubr.bf16.mxu1 %v8797_v31  ;;  %v739_v15 = vrot.slane %v7735_v11, %v9129_v10 }
 0x1a1   : > { %1425 = vst [vmem:[#allocation3 + $0x68] sm:$0x33] %v1421_v44  ;;  %v1502_v49 = vrot.slane %v1497_v45, 4  ;;  %2713 = vrot.lane.b32.xlu0 %v2708_v58, %s8795_s13  ;;  %v3075_v44 = vrot.slane %v8338_v37, %v9129_v10  ;;  %v8350_v37 = vld [vmem:[#allocation2 + $0x30] ss:$0 sps:$4 sm:$0x33]  }
 0x1a2   : > { %2669 = vrot.lane.b32.xlu1 %v9384_v29, %s8794_s16  ;;  %v9452_v48 = vpop.permute.xlu0 %1542  ;;  %v740_v23 = vcombine.low %v732_v14, %v739_v15  ;;  %v8349_v14 = vld [vmem:[#allocation2 + $0x30] ss:$0 sps:$4 sm:$0x33]  }
 0x1a3   : > { %v1505_v51 = vsel %vm819_vm0, %v1502_v49, %v1503_v47  ;;  %v1547_v55 = vrot.slane %v9452_v48, 4  ;;  %v9512_v49 = vld.sshfl [vmem:[#allocation2 + $0x30] sm:$0x3 pattern:$0x76325410] }
 0x1a4   : > { %v1541_v52 = vpop.permute.xlu1 %1540  ;;  %v1506_v53 = vsel %vm954_vm4, %v1497_v45, %v1505_v51  ;;  %v8327_v54 = vld [vmem:[#allocation3 + $0x54] ss:$16 sps:$4 sm:$0xff]   ;;  %v8329_v59 = vld [vmem:[#allocation3 + $0x50] ss:$16 sps:$4 sm:$0xff]   ;;  %760 = vst [vmem:[#allocation2 + $0x48] sm:$0xff] %v740_v23 }
 0x1a5   : > { %v1546_v18 = vrot.slane %v1541_v52, 4  ;;  %1511 = vst [vmem:[#allocation3 + $0x70] sm:$0x33] %v1506_v53  ;;  %2754 = vrot.lane.b32.xlu0 %v9359_v9, %s8796_s18  ;;  %1759 = vmatprep.subr.bf16.mxu0 %v8327_v54 }
 0x1a6   : > { %7808 = vst.sshfl [vmem:[#allocation3 + $0x50] sm:$0xf pattern:$0x76325410] %v2400_v46  ;;  %2752 = vrot.lane.b32.xlu1 %v9338_v57, %s8796_s18  ;;  %1760 = vmatpush1.bf16.msra.mxu0 %v8329_v59  ;;  %v1586_v3 = vpop.permute.xlu0 %1585  ;;  %v9469_v57 = vrot.slane %v9204_v24, %v9129_v10 }
 0x1a7   : > { %v1549_v2 = vsel %vm819_vm0, %v1546_v18, %v1547_v55  ;;  %v1590_v56 = vrot.slane %v1586_v3, 4 }
 0x1a8   : > { %v1584_v5 = vpop.permute.xlu1 %1583  ;;  %v1550_v9 = vsel %vm999_vm5, %v1541_v52, %v1549_v2  ;;  %v8332_v6 = vld [vmem:[#allocation3 + $0x5c] ss:$16 sps:$4 sm:$0xff]   ;;  %v8334_v7 = vld [vmem:[#allocation3 + $0x58] ss:$16 sps:$4 sm:$0xff]  }
 0x1a9   : > { %v1589_v12 = vrot.slane %v1584_v5, 4  ;;  %1555 = vst [vmem:[#allocation3 + $0x70] sm:$0xcc] %v1550_v9  ;;  %2989 = vrot.lane.b32.xlu0 %v9459_v60, %s8789_s12  ;;  %1800 = vmatprep.subr.bf16.mxu1 %v8332_v6 }
 0x1aa   : > { %7809 = vst.sshfl [vmem:[#allocation3 + $0x58] sm:$0xf pattern:$0x76325410] %v2402_v61  ;;  %2756 = vrot.lane.b32.xlu1 %v9384_v29, %s8796_s18  ;;  %v1630_v24 = vpop.permute.xlu0 %1629  ;;  %1801 = vmatpush1.bf16.msra.mxu1 %v8334_v7  ;;  %v9489_v29 = vrot.slane %v9477_v13, %v9129_v10 }
 0x1ab   : > { %v1592_v16 = vsel %vm819_vm0, %v1589_v12, %v1590_v56  ;;  %v1634_v21 = vrot.slane %v1630_v24, 4 }
 0x1ac   : > { %v1628_v17 = vpop.permute.xlu1 %1627  ;;  %v1593_v20 = vsel %vm1043_vm6, %v1584_v5, %v1592_v16 }
 0x1ad   : > { %v1633_v25 = vrot.slane %v1628_v17, 4  ;;  %1598 = vst [vmem:[#allocation3 + $0x80] sm:$0x33] %v1593_v20  ;;  %3032 = vrot.lane.b32.xlu0 %v9469_v57, %s8791_s23 }
 0x1ae   : > { %2991 = vrot.lane.b32.xlu1 %v9469_v57, %s8789_s12  ;;  %v1545_v27 = vpop.permute.xlu0 %1544 }
 0x1af   : > { %v1636_v26 = vsel %vm819_vm0, %v1633_v25, %v1634_v21  ;;  %v1548_v32 = vrot.slane %v1545_v27, 4 }
 0x1b0   : > { %v1501_v28 = vpop.permute.xlu1 %1500  ;;  %v1637_v30 = vsel %vm1088_vm7, %v1628_v17, %v1636_v26 }
 0x1b1   : > { %v1504_v33 = vrot.slane %v1501_v28, 4  ;;  %1642 = vst [vmem:[#allocation3 + $0x80] sm:$0xcc] %v1637_v30  ;;  %3076 = vrot.lane.b32.xlu0 %v9459_v60, %s8792_s14  ;;  %v1551_v38 = vsel %vm819_vm0, %v1547_v55, %v1548_v32  ;;  %v3162_v28 = vrot.slane %v8349_v14, %v9129_v10 }
 0x1b2   : > { %3034 = vrot.lane.b32.xlu1 %v9489_v29, %s8791_s23  ;;  %v1552_v35 = vsel %vm999_vm5, %v9452_v48, %v1551_v38  ;;  %v1632_v34 = vpop.permute.xlu0 %1631 }
 0x1b3   : > { %v1507_v39 = vsel %vm819_vm0, %v1503_v47, %v1504_v33  ;;  %1556 = vst [vmem:[#allocation3 + $0x78] sm:$0xcc] %v1552_v35  ;;  %v1635_v41 = vrot.slane %v1632_v34, 4 }
 0x1b4   : > { %v1508_v58 = vsel %vm954_vm4, %v9437_v43, %v1507_v39  ;;  %v1588_v40 = vpop.permute.xlu1 %1587 }
 0x1b5   : > { %1512 = vst [vmem:[#allocation3 + $0x78] sm:$0x33] %v1508_v58  ;;  %v1591_v42 = vrot.slane %v1588_v40, 4  ;;  %2993 = vrot.lane.b32.xlu0 %v2988_v36, %s8789_s12  ;;  %v1638_v45 = vsel %vm819_vm0, %v1634_v21, %v1635_v41 }
 0x1b6   : > { %3078 = vrot.lane.b32.xlu1 %v9469_v57, %s8792_s14  ;;  %v1639_v43 = vsel %vm1088_vm7, %v1630_v24, %v1638_v45  ;;  %v1673_v50 = vpop.permute.xlu0 %1672 }
 0x1b7   : > { %v1594_v47 = vsel %vm819_vm0, %v1590_v56, %v1591_v42  ;;  %1643 = vst [vmem:[#allocation3 + $0x88] sm:$0xcc] %v1639_v43  ;;  %v1677_v48 = vrot.slane %v1673_v50, 4 }
 0x1b8   : > { %v1595_v46 = vsel %vm1043_vm6, %v1586_v3, %v1594_v47  ;;  %v1671_v51 = vpop.permute.xlu1 %1670  ;;  %v8339_v52 = vld [vmem:[#allocation3 + $0x74] ss:$16 sps:$4 sm:$0xff]   ;;  %v8341_v53 = vld [vmem:[#allocation3 + $0x70] ss:$16 sps:$4 sm:$0xff]  }
 0x1b9   : > { %1599 = vst [vmem:[#allocation3 + $0x88] sm:$0x33] %v1595_v46  ;;  %v1676_v54 = vrot.slane %v1671_v51, 4  ;;  %3080 = vrot.lane.b32.xlu0 %v3075_v44, %s8792_s14  ;;  %1761 = vmatprep.subr.bf16.mxu0 %v8339_v52  ;;  %v3249_v44 = vrot.slane %v8350_v37, %v9129_v10  ;;  %v9560_v47 = vld [vmem:[#allocation2 + $0x32] sm:$0xff] }
 0x1ba   : > { %3036 = vrot.lane.b32.xlu1 %v9512_v49, %s8791_s23  ;;  %v1908_v59 = vpop.permute.xlu0 %1907  ;;  %1762 = vmatpush1.bf16.msra.mxu0 %v8341_v53  ;;  %v8360_v37 = vld [vmem:[#allocation2 + $0x3a] ss:$0 sps:$4 sm:$0x33]  }
 0x1bb   : > { %v1679_v55 = vsel %vm819_vm0, %v1676_v54, %v1677_v48  ;;  %v1913_v56 = vrot.slane %v1908_v59, 4  ;;  %v3507_v54 = vcombine.low %v9560_v47, %v9560_v47 }
 0x1bc   : > { %v1675_v18 = vpop.permute.xlu1 %1674  ;;  %v1680_v61 = vsel %vm1132_vm8, %v1671_v51, %v1679_v55 }
 0x1bd   : > { %v1678_v62 = vrot.slane %v1675_v18, 4  ;;  %1685 = vst [vmem:[#allocation3 + $0x90] sm:$0x33] %v1680_v61  ;;  %3121 = vrot.lane.b32.xlu0 %v9489_v29, %s8793_s17 }
 0x1be   : > { %3119 = vrot.lane.b32.xlu1 %v9469_v57, %s8793_s17  ;;  %v1951_v0 = vpop.permute.xlu0 %1950 }
 0x1bf   : > { %v1681_v63 = vsel %vm819_vm0, %v1677_v48, %v1678_v62  ;;  %v1956_v16 = vrot.slane %v1951_v0, 4 }
 0x1c0   : > { %v1682_v1 = vsel %vm1132_vm8, %v1673_v50, %v1681_v63  ;;  %v1910_v2 = vpop.permute.xlu1 %1909  ;;  %v8342_v3 = vld [vmem:[#allocation3 + $0x7c] ss:$16 sps:$4 sm:$0xff]   ;;  %v8344_v5 = vld [vmem:[#allocation3 + $0x78] ss:$16 sps:$4 sm:$0xff]  }
 0x1c1   : > { %1686 = vst [vmem:[#allocation3 + $0x98] sm:$0x33] %v1682_v1  ;;  %v1914_v9 = vrot.slane %v1910_v2, 4  ;;  %3165 = vrot.lane.b32.xlu0 %v9469_v57, %s8790_s10  ;;  %1802 = vmatprep.subr.bf16.mxu1 %v8342_v3  ;;  %v8462_v3 = vld [vmem:[#allocation2 + $0x28] sm:$0xff] }
 0x1c2   : > { %3163 = vrot.lane.b32.xlu1 %v9459_v60, %s8790_s10  ;;  %v1995_v7 = vpop.permute.xlu0 %1994  ;;  %1803 = vmatpush1.bf16.msra.mxu1 %v8344_v5 }
 0x1c3   : > { %v1916_v6 = vsel %vm819_vm0, %v1913_v56, %v1914_v9  ;;  %v2000_v32 = vrot.slane %v1995_v7, 4 }
 0x1c4   : > { %v1917_v8 = vsel %vm821_vm1, %v1908_v59, %v1916_v6  ;;  %v1953_v11 = vpop.permute.xlu1 %1952  ;;  %v1695_v12 = vld [vmem:[#allocation3 + $0x90] sm:$0x33] }
 0x1c5   : > { %1922 = vst [vmem:[#allocation3] sm:$0xcc] %v1917_v8  ;;  %v1957_v15 = vrot.slane %v1953_v11, 4  ;;  %3208 = vrot.lane.b32.xlu0 %v9489_v29, %s8794_s16  ;;  %v7775_v24 = vcombine.high %v1695_v12, %v1695_v12  ;;  %v7774_v17 = vcombine.low %v1695_v12, %v1695_v12 }
 0x1c6   : > { %3206 = vrot.lane.b32.xlu1 %v9469_v57, %s8794_s16  ;;  %v1912_v21 = vpop.permute.xlu0 %1911 }
 0x1c7   : > { %v1959_v20 = vsel %vm819_vm0, %v1956_v16, %v1957_v15  ;;  %7778 = vmatprep.subr.msk.bf16.mxu0 %vm1204_vm9, %v7775_v24  ;;  %v1748_v23 = vsel %vm1204_vm9, %v7774_v17, 0  ;;  %v1915_v27 = vrot.slane %v1912_v21, 4  ;;  %v9600_v24 = vcombine.high %v9560_v47, %v9560_v47 }
 0x1c8   : > { %v1960_v25 = vsel %vm865_vm3, %v1951_v0, %v1959_v20  ;;  %v1997_v19 = vpop.permute.xlu1 %1996  ;;  %v1696_v26 = vld [vmem:[#allocation3 + $0x98] sm:$0x33]  ;;  %1764 = vmatpush1.bf16.msra.mxu0 %v1748_v23 }
 0x1c9   : > { %1965 = vst [vmem:[#allocation3 + $0x10] sm:$0x33] %v1960_v25  ;;  %v2001_v30 = vrot.slane %v1997_v19, 4  ;;  %v7777_v33 = vcombine.high %v1696_v26, %v1696_v26  ;;  %v7776_v36 = vcombine.low %v1696_v26, %v1696_v26  ;;  %3252 = vrot.lane.b32.xlu0 %v9469_v57, %s8795_s13  ;;  %v1918_v38 = vsel %vm819_vm0, %v1914_v9, %v1915_v27 }
 0x1ca   : > { %3250 = vrot.lane.b32.xlu1 %v9459_v60, %s8795_s13  ;;  %v1919_v35 = vsel %vm821_vm1, %v1910_v2, %v1918_v38  ;;  %v1999_v58 = vpop.permute.xlu0 %1998  ;;  %v9583_v9 = vrot.slane %v3507_v54, %v9129_v10 }
 0x1cb   : > { %v2003_v39 = vsel %vm819_vm0, %v2000_v32, %v2001_v30  ;;  %7780 = vmatprep.subr.msk.bf16.mxu1 %vm1204_vm9, %v7777_v33  ;;  %v1754_v34 = vsel %vm1204_vm9, %v7776_v36, 0  ;;  %7779 = vmatmul.mubr.msk.bf16.vlgmr.msra.gmra.mrb[4].mxu0 %vm1200_vm10, %v9415_v22  ;;  %1923 = vst [vmem:[#allocation3 + $0x8] sm:$0xcc] %v1919_v35  ;;  %v2002_v60 = vrot.slane %v1999_v58, 4 }
 0x1cc   : > { %v2004_v40 = vsel %vm910_vm2, %v1995_v7, %v2003_v39  ;;  %v1955_v41 = vpop.permute.xlu1 %1954  ;;  %1805 = vmatpush1.bf16.msra.mxu1 %v1754_v34  ;;  %2332 = vmatprep.mubr.bf16.mxu0 %v8797_v31  ;;  %v2228_v62 = vld [vmem:[#allocation3] sm:$0xff] }
 0x1cd   : > { %2009 = vst [vmem:[#allocation3 + $0x10] sm:$0xcc] %v2004_v40  ;;  %v1958_v42 = vrot.slane %v1955_v41, 4  ;;  %3167 = vrot.lane.b32.xlu0 %v3162_v28, %s8790_s10  ;;  %v2005_v45 = vsel %vm819_vm0, %v2001_v30, %v2002_v60 }
 0x1ce   : > { %3123 = vrot.lane.b32.xlu1 %v9512_v49, %s8793_s17  ;;  %v2006_v50 = vsel %vm910_vm2, %v1997_v19, %v2005_v45  ;;  %v9564_v46 = vpop.permute.xlu0 %2039 }
 0x1cf   : > { %v1961_v43 = vsel %vm819_vm0, %v1957_v15, %v1958_v42  ;;  %7781 = vmatmul.mubr.msk.bf16.vlgmr.msra.gmra.mrb[4].mxu1 %vm1200_vm10, %v9415_v22  ;;  %2010 = vst [vmem:[#allocation3 + $0x18] sm:$0xcc] %v2006_v50  ;;  %v2044_v52 = vrot.slane %v9564_v46, 4  ;;  %v3616_v42 = vrot.slane %v8360_v37, %v9129_v10 }
 0x1d0   : > { %v1962_v51 = vsel %vm865_vm3, %v1953_v11, %v1961_v43  ;;  %v2038_v48 = vpop.permute.xlu1 %2037  ;;  %2373 = vmatprep.mubr.bf16.mxu1 %v8797_v31  ;;  %v9632_v43 = vld.sshfl [vmem:[#allocation2 + $0x3a] sm:$0x3 pattern:$0x76325410] }
 0x1d1   : > { %1966 = vst [vmem:[#allocation3 + $0x18] sm:$0x33] %v1962_v51  ;;  %v2043_v53 = vrot.slane %v2038_v48, 4  ;;  %3254 = vrot.lane.b32.xlu0 %v3249_v44, %s8795_s13 }
 0x1d2   : > { %3210 = vrot.lane.b32.xlu1 %v9512_v49, %s8794_s16  ;;  %v2084_v59 = vpop.permute.xlu0 %2083  ;;  %v2229_v12 = vld [vmem:[#allocation3 + $0x8] sm:$0xff] }
 0x1d3   : > { %v2046_v55 = vsel %vm819_vm0, %v2043_v53, %v2044_v52  ;;  %v2088_v1 = vrot.slane %v2084_v59, 4 }
 0x1d4   : > { %v2082_v18 = vpop.permute.xlu1 %2081  ;;  %v2047_v61 = vsel %vm954_vm4, %v2038_v48, %v2046_v55  ;;  %v2230_v63 = vld [vmem:[#allocation3 + $0x10] sm:$0xff] }
 0x1d5   : > { %v8352_v0 = vld [vmem:[#allocation3 + $0x4] ss:$16 sps:$4 sm:$0xff]   ;;  %v2087_v2 = vrot.slane %v2082_v18, 4  ;;  %2052 = vst [vmem:[#allocation3 + $0x20] sm:$0x33] %v2047_v61  ;;  %v7790_v5 = vcombine.low %v2228_v62, %v2230_v63  ;;  %3295 = vrot.lane.b32.xlu0 %v9489_v29, %s8796_s18  ;;  %v9591_v29 = vrot.slane %v9560_v47, %v9129_v10 }
 0x1d6   : > { %7832 = vst.sshfl [vmem:[#allocation3] sm:$0xf pattern:$0x76325410] %v8462_v3  ;;  %3293 = vrot.lane.b32.xlu1 %v9469_v57, %s8796_s18  ;;  %2300 = vmatprep.subr.bf16.mxu0 %v8352_v0  ;;  %v2127_v6 = vpop.permute.xlu0 %2126 }
 0x1d7   : > { %v2090_v56 = vsel %vm819_vm0, %v2087_v2, %v2088_v1  ;;  %2301 = vmatpush1.bf16.msra.mxu0 %v7790_v5  ;;  %v2131_v11 = vrot.slane %v2127_v6, 4 }
 0x1d8   : > { %v2125_v7 = vpop.permute.xlu1 %2124  ;;  %v2091_v8 = vsel %vm999_vm5, %v2082_v18, %v2090_v56  ;;  %v2231_v14 = vld [vmem:[#allocation3 + $0x18] sm:$0xff] }
 0x1d9   : > { %v8357_v15 = vld [vmem:[#allocation3 + $0xc] ss:$16 sps:$4 sm:$0xff]   ;;  %v2130_v16 = vrot.slane %v2125_v7, 4  ;;  %2096 = vst [vmem:[#allocation3 + $0x20] sm:$0xcc] %v2091_v8  ;;  %3530 = vrot.lane.b32.xlu0 %v9583_v9, %s8789_s12  ;;  %v7792_v57 = vcombine.low %v2229_v12, %v2231_v14 }
 0x1da   : > { %7833 = vst.sshfl [vmem:[#allocation3 + $0x8] sm:$0xf pattern:$0x76325410] %v9477_v13  ;;  %3297 = vrot.lane.b32.xlu1 %v9512_v49, %s8796_s18  ;;  %2341 = vmatprep.subr.bf16.mxu1 %v8357_v15  ;;  %v2171_v20 = vpop.permute.xlu0 %2170  ;;  %v9610_v49 = vrot.slane %v9600_v24, %v9129_v10 }
 0x1db   : > { %v2133_v17 = vsel %vm819_vm0, %v2130_v16, %v2131_v11  ;;  %2342 = vmatpush1.bf16.msra.mxu1 %v7792_v57  ;;  %v2175_v25 = vrot.slane %v2171_v20, 4  ;;  %v8359_v13 = vld [vmem:[#allocation2 + $0x3a] ss:$0 sps:$4 sm:$0x33]  }
 0x1dc   : > { %v2169_v21 = vpop.permute.xlu1 %2168  ;;  %v2134_v23 = vsel %vm1043_vm6, %v2125_v7, %v2133_v17  ;;  %v3529_v36 = vrot.slane %v8359_v13, %v9129_v10  ;;  %v8371_v16 = vld [vmem:[#allocation2 + $0x3a] ss:$0 sps:$4 sm:$0x33]  }
 0x1dd   : > { %v2174_v19 = vrot.slane %v2169_v21, 4  ;;  %2139 = vst [vmem:[#allocation3 + $0x30] sm:$0x33] %v2134_v23  ;;  %3573 = vrot.lane.b32.xlu0 %v9591_v29, %s8791_s23 }
 0x1de   : > { %3532 = vrot.lane.b32.xlu1 %v9591_v29, %s8789_s12  ;;  %v2086_v27 = vpop.permute.xlu0 %2085 }
 0x1df   : > { %v2177_v26 = vsel %vm819_vm0, %v2174_v19, %v2175_v25  ;;  %v2089_v32 = vrot.slane %v2086_v27, 4 }
 0x1e0   : > { %v2042_v28 = vpop.permute.xlu1 %2041  ;;  %v2178_v30 = vsel %vm1088_vm7, %v2169_v21, %v2177_v26 }
 0x1e1   : > { %v2045_v33 = vrot.slane %v2042_v28, 4  ;;  %2183 = vst [vmem:[#allocation3 + $0x30] sm:$0xcc] %v2178_v30  ;;  %3617 = vrot.lane.b32.xlu0 %v9583_v9, %s8792_s14  ;;  %v2092_v38 = vsel %vm819_vm0, %v2088_v1, %v2089_v32  ;;  %v3703_v30 = vrot.slane %v8371_v16, %v9129_v10 }
 0x1e2   : > { %3575 = vrot.lane.b32.xlu1 %v9610_v49, %s8791_s23  ;;  %v2093_v35 = vsel %vm999_vm5, %v2084_v59, %v2092_v38  ;;  %v2173_v34 = vpop.permute.xlu0 %2172  ;;  %v8372_v38 = vld [vmem:[#allocation2 + $0x3a] ss:$0 sps:$4 sm:$0x33]  }
 0x1e3   : > { %v2048_v39 = vsel %vm819_vm0, %v2044_v52, %v2045_v33  ;;  %2097 = vst [vmem:[#allocation3 + $0x28] sm:$0xcc] %v2093_v35  ;;  %v2176_v41 = vrot.slane %v2173_v34, 4 }
 0x1e4   : > { %v2049_v58 = vsel %vm954_vm4, %v9564_v46, %v2048_v39  ;;  %v2129_v40 = vpop.permute.xlu1 %2128 }
 0x1e5   : > { %2053 = vst [vmem:[#allocation3 + $0x28] sm:$0x33] %v2049_v58  ;;  %v2132_v60 = vrot.slane %v2129_v40, 4  ;;  %3534 = vrot.lane.b32.xlu0 %v3529_v36, %s8789_s12  ;;  %v2179_v44 = vsel %vm819_vm0, %v2175_v25, %v2176_v41 }
 0x1e6   : > { %3619 = vrot.lane.b32.xlu1 %v9591_v29, %s8792_s14  ;;  %v2180_v50 = vsel %vm1088_vm7, %v2171_v20, %v2179_v44  ;;  %v2214_v46 = vpop.permute.xlu0 %2213  ;;  %v3790_v44 = vrot.slane %v8372_v38, %v9129_v10 }
 0x1e7   : > { %v2135_v45 = vsel %vm819_vm0, %v2131_v11, %v2132_v60  ;;  %2184 = vst [vmem:[#allocation3 + $0x38] sm:$0xcc] %v2180_v50  ;;  %v2218_v52 = vrot.slane %v2214_v46, 4  ;;  %v9680_v50 = vld [vmem:[#allocation2 + $0x3c] sm:$0xff] }
 0x1e8   : > { %v2136_v51 = vsel %vm1043_vm6, %v2127_v6, %v2135_v45  ;;  %v2212_v48 = vpop.permute.xlu1 %2211  ;;  %v8361_v53 = vld [vmem:[#allocation3 + $0x24] ss:$16 sps:$4 sm:$0xff]   ;;  %v8363_v54 = vld [vmem:[#allocation3 + $0x20] ss:$16 sps:$4 sm:$0xff]  }
 0x1e9   : > { %2140 = vst [vmem:[#allocation3 + $0x38] sm:$0x33] %v2136_v51  ;;  %v2217_v55 = vrot.slane %v2212_v48, 4  ;;  %3621 = vrot.lane.b32.xlu0 %v3616_v42, %s8792_s14  ;;  %2302 = vmatprep.subr.bf16.mxu0 %v8361_v53 }
 0x1ea   : > { %3577 = vrot.lane.b32.xlu1 %v9632_v43, %s8791_s23  ;;  %v2449_v18 = vpop.permute.xlu0 %2448  ;;  %2303 = vmatpush1.bf16.msra.mxu0 %v8363_v54 }
 0x1eb   : > { %v2220_v59 = vsel %vm819_vm0, %v2217_v55, %v2218_v52  ;;  %v2454_v7 = vrot.slane %v2449_v18, 4 }
 0x1ec   : > { %v2216_v61 = vpop.permute.xlu1 %2215  ;;  %v2221_v62 = vsel %vm1132_vm8, %v2212_v48, %v2220_v59  ;;  %v4048_v59 = vcombine.low %v9680_v50, %v9680_v50 }
 0x1ed   : > { %v2219_v63 = vrot.slane %v2216_v61, 4  ;;  %2226 = vst [vmem:[#allocation3 + $0x40] sm:$0x33] %v2221_v62  ;;  %3662 = vrot.lane.b32.xlu0 %v9610_v49, %s8793_s17 }
 0x1ee   : > { %3660 = vrot.lane.b32.xlu1 %v9591_v29, %s8793_s17  ;;  %v2492_v1 = vpop.permute.xlu0 %2491 }
 0x1ef   : > { %v2222_v0 = vsel %vm819_vm0, %v2218_v52, %v2219_v63  ;;  %v2497_v17 = vrot.slane %v2492_v1, 4 }
 0x1f0   : > { %v2223_v2 = vsel %vm1132_vm8, %v2214_v46, %v2222_v0  ;;  %v2451_v3 = vpop.permute.xlu1 %2450  ;;  %v8364_v5 = vld [vmem:[#allocation3 + $0x2c] ss:$16 sps:$4 sm:$0xff]   ;;  %v8366_v56 = vld [vmem:[#allocation3 + $0x28] ss:$16 sps:$4 sm:$0xff]  }
 0x1f1   : > { %2227 = vst [vmem:[#allocation3 + $0x48] sm:$0x33] %v2223_v2  ;;  %v2455_v6 = vrot.slane %v2451_v3, 4  ;;  %3706 = vrot.lane.b32.xlu0 %v9591_v29, %s8790_s10  ;;  %2343 = vmatprep.subr.bf16.mxu1 %v8364_v5 }
 0x1f2   : > { %3704 = vrot.lane.b32.xlu1 %v9583_v9, %s8790_s10  ;;  %v2536_v11 = vpop.permute.xlu0 %2535  ;;  %2344 = vmatpush1.bf16.msra.mxu1 %v8366_v56  ;;  %v9704_v56 = vrot.slane %v4048_v59, %v9129_v10 }
 0x1f3   : > { %v2457_v8 = vsel %vm819_vm0, %v2454_v7, %v2455_v6  ;;  %v2541_v33 = vrot.slane %v2536_v11, 4 }
 0x1f4   : > { %v2458_v12 = vsel %vm821_vm1, %v2449_v18, %v2457_v8  ;;  %v2494_v14 = vpop.permute.xlu1 %2493  ;;  %v2236_v15 = vld [vmem:[#allocation3 + $0x40] sm:$0x33] }
 0x1f5   : > { %2463 = vst [vmem:[#allocation3 + $0x50] sm:$0xcc] %v2458_v12  ;;  %v2498_v57 = vrot.slane %v2494_v14, 4  ;;  %3749 = vrot.lane.b32.xlu0 %v9610_v49, %s8794_s16  ;;  %v7799_v20 = vcombine.high %v2236_v15, %v2236_v15  ;;  %v7798_v21 = vcombine.low %v2236_v15, %v2236_v15 }
 0x1f6   : > { %3747 = vrot.lane.b32.xlu1 %v9591_v29, %s8794_s16  ;;  %v2453_v25 = vpop.permute.xlu0 %2452 }
 0x1f7   : > { %v2500_v23 = vsel %vm819_vm0, %v2497_v17, %v2498_v57  ;;  %7802 = vmatprep.subr.msk.bf16.mxu0 %vm1204_vm9, %v7799_v20  ;;  %v2289_v19 = vsel %vm1204_vm9, %v7798_v21, 0  ;;  %v2456_v28 = vrot.slane %v2453_v25, 4 }
 0x1f8   : > { %v2501_v13 = vsel %vm865_vm3, %v2492_v1, %v2500_v23  ;;  %v2538_v26 = vpop.permute.xlu1 %2537  ;;  %v2237_v27 = vld [vmem:[#allocation3 + $0x48] sm:$0x33]  ;;  %2305 = vmatpush1.bf16.msra.mxu0 %v2289_v19 }
 0x1f9   : > { %2506 = vst [vmem:[#allocation3 + $0x60] sm:$0x33] %v2501_v13  ;;  %v2542_v32 = vrot.slane %v2538_v26, 4  ;;  %v7801_v36 = vcombine.high %v2237_v27, %v2237_v27  ;;  %v7800_v37 = vcombine.low %v2237_v27, %v2237_v27  ;;  %3793 = vrot.lane.b32.xlu0 %v9591_v29, %s8795_s13  ;;  %v2459_v39 = vsel %vm819_vm0, %v2455_v6, %v2456_v28 }
 0x1fa   : > { %3791 = vrot.lane.b32.xlu1 %v9583_v9, %s8795_s13  ;;  %v2460_v34 = vsel %vm821_vm1, %v2451_v3, %v2459_v39  ;;  %v2540_v40 = vpop.permute.xlu0 %2539 }
 0x1fb   : > { %v2544_v35 = vsel %vm819_vm0, %v2541_v33, %v2542_v32  ;;  %7804 = vmatprep.subr.msk.bf16.mxu1 %vm1204_vm9, %v7801_v36  ;;  %v2295_v58 = vsel %vm1204_vm9, %v7800_v37, 0  ;;  %7803 = vmatmul.mubr.msk.bf16.vlgmr.msra.gmra.mrb[8].mxu0 %vm1200_vm10, %v9415_v22  ;;  %2464 = vst [vmem:[#allocation3 + $0x58] sm:$0xcc] %v2460_v34  ;;  %v2543_v9 = vrot.slane %v2540_v40, 4 }
 0x1fc   : > { %v2545_v41 = vsel %vm910_vm2, %v2536_v11, %v2544_v35  ;;  %v2496_v60 = vpop.permute.xlu1 %2495  ;;  %2346 = vmatpush1.bf16.msra.mxu1 %v2295_v58  ;;  %2873 = vmatprep.mubr.bf16.mxu0 %v8797_v31  ;;  %v2769_v63 = vld [vmem:[#allocation3 + $0x50] sm:$0xff] }
 0x1fd   : > { %2550 = vst [vmem:[#allocation3 + $0x60] sm:$0xcc] %v2545_v41  ;;  %v2499_v42 = vrot.slane %v2496_v60, 4  ;;  %3708 = vrot.lane.b32.xlu0 %v3703_v30, %s8790_s10  ;;  %v2546_v45 = vsel %vm819_vm0, %v2542_v32, %v2543_v9  ;;  %v8382_v36 = vld [vmem:[#allocation2 + $0x44] ss:$0 sps:$4 sm:$0x33]  }
 0x1fe   : > { %3664 = vrot.lane.b32.xlu1 %v9632_v43, %s8793_s17  ;;  %v2547_v51 = vsel %vm910_vm2, %v2538_v26, %v2546_v45  ;;  %v9684_v48 = vpop.permute.xlu0 %2580  ;;  %v4157_v60 = vrot.slane %v8382_v36, %v9129_v10  ;;  %v8394_v36 = vld [vmem:[#allocation2 + $0x44] ss:$0 sps:$4 sm:$0x33]  }
 0x1ff   : > { %v2502_v46 = vsel %vm819_vm0, %v2498_v57, %v2499_v42  ;;  %7805 = vmatmul.mubr.msk.bf16.vlgmr.msra.gmra.mrb[8].mxu1 %vm1200_vm10, %v9415_v22  ;;  %2551 = vst [vmem:[#allocation3 + $0x68] sm:$0xcc] %v2547_v51  ;;  %v2585_v54 = vrot.slane %v9684_v48, 4  ;;  %v9721_v57 = vcombine.high %v9680_v50, %v9680_v50 }
 0x200   : > { %v2503_v52 = vsel %vm865_vm3, %v2494_v14, %v2502_v46  ;;  %v2579_v53 = vpop.permute.xlu1 %2578  ;;  %2914 = vmatprep.mubr.bf16.mxu1 %v8797_v31 }
 0x201   : > { %2507 = vst [vmem:[#allocation3 + $0x68] sm:$0x33] %v2503_v52  ;;  %v2584_v55 = vrot.slane %v2579_v53, 4  ;;  %3795 = vrot.lane.b32.xlu0 %v3790_v44, %s8795_s13 }
 0x202   : > { %3751 = vrot.lane.b32.xlu1 %v9632_v43, %s8794_s16  ;;  %v2625_v18 = vpop.permute.xlu0 %2624  ;;  %v9753_v44 = vld.sshfl [vmem:[#allocation2 + $0x44] sm:$0x3 pattern:$0x76325410] }
 0x203   : > { %v2587_v22 = vsel %vm819_vm0, %v2584_v55, %v2585_v54  ;;  %v2629_v2 = vrot.slane %v2625_v18, 4 }
 0x204   : > { %v2623_v61 = vpop.permute.xlu1 %2622  ;;  %v2588_v62 = vsel %vm954_vm4, %v2579_v53, %v2587_v22  ;;  %v2771_v0 = vld [vmem:[#allocation3 + $0x60] sm:$0xff] }
 0x205   : > { %v8374_v1 = vld [vmem:[#allocation3 + $0x54] ss:$16 sps:$4 sm:$0xff]   ;;  %v2628_v3 = vrot.slane %v2623_v61, 4  ;;  %2593 = vst [vmem:[#allocation3 + $0x70] sm:$0x33] %v2588_v62  ;;  %v7814_v5 = vcombine.low %v2769_v63, %v2771_v0  ;;  %3836 = vrot.lane.b32.xlu0 %v9610_v49, %s8796_s18  ;;  %v9712_v49 = vrot.slane %v9680_v50, %v9129_v10 }
 0x206   : > { %7856 = vst.sshfl [vmem:[#allocation3 + $0x50] sm:$0xf pattern:$0x76325410] %v9560_v47  ;;  %3834 = vrot.lane.b32.xlu1 %v9591_v29, %s8796_s18  ;;  %2841 = vmatprep.subr.bf16.mxu0 %v8374_v1  ;;  %v2668_v7 = vpop.permute.xlu0 %2667  ;;  %v2770_v47 = vld [vmem:[#allocation3 + $0x58] sm:$0xff] }
 0x207   : > { %v2631_v6 = vsel %vm819_vm0, %v2628_v3, %v2629_v2  ;;  %2842 = vmatpush1.bf16.msra.mxu0 %v7814_v5  ;;  %v2672_v12 = vrot.slane %v2668_v7, 4 }
 0x208   : > { %v2666_v8 = vpop.permute.xlu1 %2665  ;;  %v2632_v11 = vsel %vm999_vm5, %v2623_v61, %v2631_v6  ;;  %v2772_v14 = vld [vmem:[#allocation3 + $0x68] sm:$0xff] }
 0x209   : > { %v8379_v15 = vld [vmem:[#allocation3 + $0x5c] ss:$16 sps:$4 sm:$0xff]   ;;  %v2671_v16 = vrot.slane %v2666_v8, 4  ;;  %2637 = vst [vmem:[#allocation3 + $0x70] sm:$0xcc] %v2632_v11  ;;  %4071 = vrot.lane.b32.xlu0 %v9704_v56, %s8789_s12  ;;  %v7816_v29 = vcombine.low %v2770_v47, %v2772_v14 }
 0x20a   : > { %7857 = vst.sshfl [vmem:[#allocation3 + $0x58] sm:$0xf pattern:$0x76325410] %v9600_v24  ;;  %3838 = vrot.lane.b32.xlu1 %v9632_v43, %s8796_s18  ;;  %2882 = vmatprep.subr.bf16.mxu1 %v8379_v15  ;;  %v2712_v20 = vpop.permute.xlu0 %2711  ;;  %v9731_v43 = vrot.slane %v9721_v57, %v9129_v10 }
 0x20b   : > { %v2674_v17 = vsel %vm819_vm0, %v2671_v16, %v2672_v12  ;;  %2883 = vmatpush1.bf16.msra.mxu1 %v7816_v29  ;;  %v2716_v25 = vrot.slane %v2712_v20, 4  ;;  %v8381_v24 = vld [vmem:[#allocation2 + $0x44] ss:$0 sps:$4 sm:$0x33]  }
 0x20c   : > { %v2710_v21 = vpop.permute.xlu1 %2709  ;;  %v2675_v23 = vsel %vm1043_vm6, %v2666_v8, %v2674_v17  ;;  %v4070_v33 = vrot.slane %v8381_v24, %v9129_v10  ;;  %v8393_v15 = vld [vmem:[#allocation2 + $0x44] ss:$0 sps:$4 sm:$0x33]  }
 0x20d   : > { %v2715_v19 = vrot.slane %v2710_v21, 4  ;;  %2680 = vst [vmem:[#allocation3 + $0x80] sm:$0x33] %v2675_v23  ;;  %4114 = vrot.lane.b32.xlu0 %v9712_v49, %s8791_s23 }
 0x20e   : > { %4073 = vrot.lane.b32.xlu1 %v9712_v49, %s8789_s12 }
 0x20f   : > { %v2718_v13 = vsel %vm819_vm0, %v2715_v19, %v2716_v25  ;;  %v2627_v26 = vpop.permute.xlu0 %2626 }
 0x210   : > { %v2583_v27 = vpop.permute.xlu1 %2582  ;;  %v2719_v28 = vsel %vm1088_vm7, %v2710_v21, %v2718_v13  ;;  %v2630_v30 = vrot.slane %v2627_v26, 4 }
 0x211   : > { %v2586_v32 = vrot.slane %v2583_v27, 4  ;;  %2724 = vst [vmem:[#allocation3 + $0x80] sm:$0xcc] %v2719_v28  ;;  %4158 = vrot.lane.b32.xlu0 %v9704_v56, %s8792_s14  ;;  %v4244_v27 = vrot.slane %v8393_v15, %v9129_v10 }
 0x212   : > { %4116 = vrot.lane.b32.xlu1 %v9731_v43, %s8791_s23  ;;  %v2633_v37 = vsel %vm819_vm0, %v2629_v2, %v2630_v30 }
 0x213   : > { %v2589_v38 = vsel %vm819_vm0, %v2585_v54, %v2586_v32  ;;  %v2634_v39 = vsel %vm999_vm5, %v2625_v18, %v2633_v37  ;;  %v2714_v35 = vpop.permute.xlu0 %2713 }
 0x214   : > { %v2590_v34 = vsel %vm954_vm4, %v9684_v48, %v2589_v38  ;;  %v2670_v58 = vpop.permute.xlu1 %2669  ;;  %2638 = vst [vmem:[#allocation3 + $0x78] sm:$0xcc] %v2634_v39  ;;  %v2717_v40 = vrot.slane %v2714_v35, 4 }
 0x215   : > { %2594 = vst [vmem:[#allocation3 + $0x78] sm:$0x33] %v2590_v34  ;;  %v2673_v41 = vrot.slane %v2670_v58, 4  ;;  %4075 = vrot.lane.b32.xlu0 %v4070_v33, %s8789_s12  ;;  %v9792_v58 = vld [vmem:[#allocation9] sm:$0xf] }
 0x216   : > { %4160 = vrot.lane.b32.xlu1 %v9712_v49, %s8792_s14  ;;  %v2720_v9 = vsel %vm819_vm0, %v2716_v25, %v2717_v40 }
 0x217   : > { %v2676_v42 = vsel %vm819_vm0, %v2672_v12, %v2673_v41  ;;  %v2721_v45 = vsel %vm1088_vm7, %v2712_v20, %v2720_v9  ;;  %v2755_v46 = vpop.permute.xlu0 %2754  ;;  %v4331_v9 = vrot.slane %v8394_v36, %v9129_v10 }
 0x218   : > { %v2677_v51 = vsel %vm1043_vm6, %v2668_v7, %v2676_v42  ;;  %v2753_v48 = vpop.permute.xlu1 %2752  ;;  %2725 = vst [vmem:[#allocation3 + $0x88] sm:$0xcc] %v2721_v45  ;;  %v2759_v52 = vrot.slane %v2755_v46, 4  ;;  %v8383_v53 = vld [vmem:[#allocation3 + $0x74] ss:$16 sps:$4 sm:$0xff]  }
 0x219   : > { %v8385_v54 = vld [vmem:[#allocation3 + $0x70] ss:$16 sps:$4 sm:$0xff]   ;;  %2681 = vst [vmem:[#allocation3 + $0x88] sm:$0x33] %v2677_v51  ;;  %v2758_v55 = vrot.slane %v2753_v48, 4  ;;  %4162 = vrot.lane.b32.xlu0 %v4157_v60, %s8792_s14  ;;  %2843 = vmatprep.subr.bf16.mxu0 %v8383_v53  ;;  %v9803_v45 = vld [vmem:[#allocation2 + $0x46] sm:$0xff] }
 0x21a   : > { %4118 = vrot.lane.b32.xlu1 %v9753_v44, %s8791_s23  ;;  %2844 = vmatpush1.bf16.msra.mxu0 %v8385_v54 }
 0x21b   : > { %v2761_v59 = vsel %vm819_vm0, %v2758_v55, %v2759_v52  ;;  %v2990_v22 = vpop.permute.xlu0 %2989 }
 0x21c   : > { %v2757_v18 = vpop.permute.xlu1 %2756  ;;  %v2762_v61 = vsel %vm1132_vm8, %v2753_v48, %v2761_v59  ;;  %v2995_v7 = vrot.slane %v2990_v22, 4  ;;  %v4589_v59 = vcombine.low %v9803_v45, %v9803_v45 }
 0x21d   : > { %v2760_v62 = vrot.slane %v2757_v18, 4  ;;  %2767 = vst [vmem:[#allocation3 + $0x90] sm:$0x33] %v2762_v61  ;;  %4203 = vrot.lane.b32.xlu0 %v9731_v43, %s8793_s17 }
 0x21e   : > { %4201 = vrot.lane.b32.xlu1 %v9712_v49, %s8793_s17 }
 0x21f   : > { %v2763_v63 = vsel %vm819_vm0, %v2759_v52, %v2760_v62  ;;  %v3033_v0 = vpop.permute.xlu0 %3032 }
 0x220   : > { %v2764_v1 = vsel %vm1132_vm8, %v2755_v46, %v2763_v63  ;;  %v2992_v2 = vpop.permute.xlu1 %2991  ;;  %v8386_v3 = vld [vmem:[#allocation3 + $0x7c] ss:$16 sps:$4 sm:$0xff]   ;;  %v8388_v5 = vld [vmem:[#allocation3 + $0x78] ss:$16 sps:$4 sm:$0xff]   ;;  %v3038_v29 = vrot.slane %v3033_v0, 4 }
 0x221   : > { %2768 = vst [vmem:[#allocation3 + $0x98] sm:$0x33] %v2764_v1  ;;  %v2996_v6 = vrot.slane %v2992_v2, 4  ;;  %4247 = vrot.lane.b32.xlu0 %v9712_v49, %s8790_s10  ;;  %2884 = vmatprep.subr.bf16.mxu1 %v8386_v3 }
 0x222   : > { %4245 = vrot.lane.b32.xlu1 %v9704_v56, %s8790_s10  ;;  %2885 = vmatpush1.bf16.msra.mxu1 %v8388_v5 }
 0x223   : > { %v2998_v8 = vsel %vm819_vm0, %v2995_v7, %v2996_v6  ;;  %v3077_v11 = vpop.permute.xlu0 %3076 }
 0x224   : > { %v2999_v12 = vsel %vm821_vm1, %v2990_v22, %v2998_v8  ;;  %v3035_v47 = vpop.permute.xlu1 %3034  ;;  %v2777_v14 = vld [vmem:[#allocation3 + $0x90] sm:$0x33]  ;;  %v3082_v30 = vrot.slane %v3077_v11, 4 }
 0x225   : > { %3004 = vst [vmem:[#allocation3] sm:$0xcc] %v2999_v12  ;;  %v3039_v16 = vrot.slane %v3035_v47, 4  ;;  %4290 = vrot.lane.b32.xlu0 %v9731_v43, %s8794_s16  ;;  %v7823_v17 = vcombine.high %v2777_v14, %v2777_v14  ;;  %v7822_v20 = vcombine.low %v2777_v14, %v2777_v14 }
 0x226   : > { %4288 = vrot.lane.b32.xlu1 %v9712_v49, %s8794_s16 }
 0x227   : > { %v3041_v21 = vsel %vm819_vm0, %v3038_v29, %v3039_v16  ;;  %7826 = vmatprep.subr.msk.bf16.mxu0 %vm1204_vm9, %v7823_v17  ;;  %v2994_v23 = vpop.permute.xlu0 %2993  ;;  %v2830_v25 = vsel %vm1204_vm9, %v7822_v20, 0  ;;  %v9844_v29 = vcombine.high %v9803_v45, %v9803_v45 }
 0x228   : > { %v3042_v19 = vsel %vm865_vm3, %v3033_v0, %v3041_v21  ;;  %v3079_v24 = vpop.permute.xlu1 %3078  ;;  %v2778_v13 = vld [vmem:[#allocation3 + $0x98] sm:$0x33]  ;;  %v2997_v26 = vrot.slane %v2994_v23, 4  ;;  %2846 = vmatpush1.bf16.msra.mxu0 %v2830_v25 }
 0x229   : > { %3047 = vst [vmem:[#allocation3 + $0x10] sm:$0x33] %v3042_v19  ;;  %v3083_v28 = vrot.slane %v3079_v24, 4  ;;  %v7825_v32 = vcombine.high %v2778_v13, %v2778_v13  ;;  %v7824_v33 = vcombine.low %v2778_v13, %v2778_v13  ;;  %4334 = vrot.lane.b32.xlu0 %v9712_v49, %s8795_s13 }
 0x22a   : > { %4332 = vrot.lane.b32.xlu1 %v9704_v56, %s8795_s13  ;;  %v3000_v37 = vsel %vm819_vm0, %v2996_v6, %v2997_v26  ;;  %v9827_v6 = vrot.slane %v4589_v59, %v9129_v10 }
 0x22b   : > { %v3085_v38 = vsel %vm819_vm0, %v3082_v30, %v3083_v28  ;;  %7828 = vmatprep.subr.msk.bf16.mxu1 %vm1204_vm9, %v7825_v32  ;;  %v3001_v39 = vsel %vm821_vm1, %v2992_v2, %v3000_v37  ;;  %v2836_v35 = vsel %vm1204_vm9, %v7824_v33, 0  ;;  %v3081_v34 = vpop.permute.xlu0 %3080  ;;  %7827 = vmatmul.mubr.msk.bf16.vlgmr.msra.gmra.mrb[12].mxu0 %vm1200_vm10, %v9792_v58  ;;  %v8403_v33 = vld [vmem:[#allocation2 + $0x4e] ss:$0 sps:$4 sm:$0x33]  }
 0x22c   : > { %v3086_v40 = vsel %vm910_vm2, %v3077_v11, %v3085_v38  ;;  %v3037_v41 = vpop.permute.xlu1 %3036  ;;  %3005 = vst [vmem:[#allocation3 + $0x8] sm:$0xcc] %v3001_v39  ;;  %2887 = vmatpush1.bf16.msra.mxu1 %v2836_v35  ;;  %v3084_v56 = vrot.slane %v3081_v34, 4  ;;  %3414 = vmatprep.mubr.bf16.mxu0 %v8797_v31  ;;  %v3310_v63 = vld [vmem:[#allocation3] sm:$0xff] }
 0x22d   : > { %3091 = vst [vmem:[#allocation3 + $0x10] sm:$0xcc] %v3086_v40  ;;  %v3040_v60 = vrot.slane %v3037_v41, 4  ;;  %4249 = vrot.lane.b32.xlu0 %v4244_v27, %s8790_s10 }
 0x22e   : > { %4205 = vrot.lane.b32.xlu1 %v9753_v44, %s8793_s17  ;;  %v3087_v42 = vsel %vm819_vm0, %v3083_v28, %v3084_v56  ;;  %v4698_v56 = vrot.slane %v8403_v33, %v9129_v10 }
 0x22f   : > { %v3043_v46 = vsel %vm819_vm0, %v3039_v16, %v3040_v60  ;;  %v3088_v51 = vsel %vm910_vm2, %v3079_v24, %v3087_v42  ;;  %v9807_v48 = vpop.permute.xlu0 %3121  ;;  %7829 = vmatmul.mubr.msk.bf16.vlgmr.msra.gmra.mrb[12].mxu1 %vm1200_vm10, %v9792_v58  ;;  %v9876_v42 = vld.sshfl [vmem:[#allocation2 + $0x4e] sm:$0x3 pattern:$0x76325410] }
 0x230   : > { %v3044_v52 = vsel %vm865_vm3, %v3035_v47, %v3043_v46  ;;  %v3120_v53 = vpop.permute.xlu1 %3119  ;;  %3092 = vst [vmem:[#allocation3 + $0x18] sm:$0xcc] %v3088_v51  ;;  %v3126_v54 = vrot.slane %v9807_v48, 4  ;;  %3455 = vmatprep.mubr.bf16.mxu1 %v8797_v31 }
 0x231   : > { %3048 = vst [vmem:[#allocation3 + $0x18] sm:$0x33] %v3044_v52  ;;  %v3125_v55 = vrot.slane %v3120_v53, 4  ;;  %4336 = vrot.lane.b32.xlu0 %v4331_v9, %s8795_s13 }
 0x232   : > { %4292 = vrot.lane.b32.xlu1 %v9753_v44, %s8794_s16 }
 0x233   : > { %v3128_v22 = vsel %vm819_vm0, %v3125_v55, %v3126_v54  ;;  %v3166_v18 = vpop.permute.xlu0 %3165 }
 0x234   : > { %v3164_v61 = vpop.permute.xlu1 %3163  ;;  %v3129_v62 = vsel %vm954_vm4, %v3120_v53, %v3128_v22  ;;  %v3312_v0 = vld [vmem:[#allocation3 + $0x10] sm:$0xff]  ;;  %v3170_v2 = vrot.slane %v3166_v18, 4 }
 0x235   : > { %v8395_v1 = vld [vmem:[#allocation3 + $0x4] ss:$16 sps:$4 sm:$0xff]   ;;  %v3169_v3 = vrot.slane %v3164_v61, 4  ;;  %3134 = vst [vmem:[#allocation3 + $0x20] sm:$0x33] %v3129_v62  ;;  %v7838_v5 = vcombine.low %v3310_v63, %v3312_v0  ;;  %4377 = vrot.lane.b32.xlu0 %v9731_v43, %s8796_s18  ;;  %v9835_v43 = vrot.slane %v9803_v45, %v9129_v10 }
 0x236   : > { %7880 = vst.sshfl [vmem:[#allocation3] sm:$0xf pattern:$0x76325410] %v9680_v50  ;;  %4375 = vrot.lane.b32.xlu1 %v9712_v49, %s8796_s18  ;;  %3382 = vmatprep.subr.bf16.mxu0 %v8395_v1  ;;  %v3311_v50 = vld [vmem:[#allocation3 + $0x8] sm:$0xff] }
 0x237   : > { %v3172_v7 = vsel %vm819_vm0, %v3169_v3, %v3170_v2  ;;  %3383 = vmatpush1.bf16.msra.mxu0 %v7838_v5  ;;  %v3209_v8 = vpop.permute.xlu0 %3208 }
 0x238   : > { %v3207_v11 = vpop.permute.xlu1 %3206  ;;  %v3173_v12 = vsel %vm999_vm5, %v3164_v61, %v3172_v7  ;;  %v3213_v47 = vrot.slane %v3209_v8, 4  ;;  %v3313_v14 = vld [vmem:[#allocation3 + $0x18] sm:$0xff] }
 0x239   : > { %v8400_v15 = vld [vmem:[#allocation3 + $0xc] ss:$16 sps:$4 sm:$0xff]   ;;  %v3212_v16 = vrot.slane %v3207_v11, 4  ;;  %3178 = vst [vmem:[#allocation3 + $0x20] sm:$0xcc] %v3173_v12  ;;  %4612 = vrot.lane.b32.xlu0 %v9827_v6, %s8789_s12  ;;  %v7840_v49 = vcombine.low %v3311_v50, %v3313_v14 }
 0x23a   : > { %7881 = vst.sshfl [vmem:[#allocation3 + $0x8] sm:$0xf pattern:$0x76325410] %v9721_v57  ;;  %4379 = vrot.lane.b32.xlu1 %v9753_v44, %s8796_s18  ;;  %3423 = vmatprep.subr.bf16.mxu1 %v8400_v15  ;;  %v9854_v44 = vrot.slane %v9844_v29, %v9129_v10 }
 0x23b   : > { %v3215_v17 = vsel %vm819_vm0, %v3212_v16, %v3213_v47  ;;  %v3253_v20 = vpop.permute.xlu0 %3252  ;;  %3424 = vmatpush1.bf16.msra.mxu1 %v7840_v49  ;;  %v8402_v57 = vld [vmem:[#allocation2 + $0x4e] ss:$0 sps:$4 sm:$0x33]  }
 0x23c   : > { %v3251_v21 = vpop.permute.xlu1 %3250  ;;  %v3216_v23 = vsel %vm1043_vm6, %v3207_v11, %v3215_v17  ;;  %v3257_v25 = vrot.slane %v3253_v20, 4  ;;  %v4611_v32 = vrot.slane %v8402_v57, %v9129_v10  ;;  %v8414_v16 = vld [vmem:[#allocation2 + $0x4e] ss:$0 sps:$4 sm:$0x33]  }
 0x23d   : > { %v3256_v19 = vrot.slane %v3251_v21, 4  ;;  %3221 = vst [vmem:[#allocation3 + $0x30] sm:$0x33] %v3216_v23  ;;  %4655 = vrot.lane.b32.xlu0 %v9835_v43, %s8791_s23 }
 0x23e   : > { %4614 = vrot.lane.b32.xlu1 %v9835_v43, %s8789_s12 }
 0x23f   : > { %v3259_v24 = vsel %vm819_vm0, %v3256_v19, %v3257_v25  ;;  %v3168_v13 = vpop.permute.xlu0 %3167 }
 0x240   : > { %v3124_v26 = vpop.permute.xlu1 %3123  ;;  %v3260_v27 = vsel %vm1088_vm7, %v3251_v21, %v3259_v24  ;;  %v3171_v28 = vrot.slane %v3168_v13, 4 }
 0x241   : > { %v3127_v30 = vrot.slane %v3124_v26, 4  ;;  %3265 = vst [vmem:[#allocation3 + $0x30] sm:$0xcc] %v3260_v27  ;;  %4699 = vrot.lane.b32.xlu0 %v9827_v6, %s8792_s14  ;;  %v4785_v27 = vrot.slane %v8414_v16, %v9129_v10 }
 0x242   : > { %4657 = vrot.lane.b32.xlu1 %v9854_v44, %s8791_s23  ;;  %v3174_v36 = vsel %vm819_vm0, %v3170_v2, %v3171_v28 }
 0x243   : > { %v3130_v37 = vsel %vm819_vm0, %v3126_v54, %v3127_v30  ;;  %v3175_v38 = vsel %vm999_vm5, %v3166_v18, %v3174_v36  ;;  %v3255_v39 = vpop.permute.xlu0 %3254  ;;  %v8415_v36 = vld [vmem:[#allocation2 + $0x4e] ss:$0 sps:$4 sm:$0x33]  }
 0x244   : > { %v3131_v35 = vsel %vm954_vm4, %v9807_v48, %v3130_v37  ;;  %v3211_v34 = vpop.permute.xlu1 %3210  ;;  %3179 = vst [vmem:[#allocation3 + $0x28] sm:$0xcc] %v3175_v38  ;;  %v3258_v40 = vrot.slane %v3255_v39, 4 }
 0x245   : > { %3135 = vst [vmem:[#allocation3 + $0x28] sm:$0x33] %v3131_v35  ;;  %v3214_v41 = vrot.slane %v3211_v34, 4  ;;  %4616 = vrot.lane.b32.xlu0 %v4611_v32, %s8789_s12  ;;  %s10550_s12 = scalar_lea.hbm %s10626_s7, %s8153_s1 }
 0x246   : > { %4701 = vrot.lane.b32.xlu1 %v9835_v43, %s8792_s14  ;;  %v3261_v60 = vsel %vm819_vm0, %v3257_v25, %v3258_v40 }
 0x247   : > { %v3217_v9 = vsel %vm819_vm0, %v3213_v47, %v3214_v41  ;;  %v3262_v46 = vsel %vm1088_vm7, %v3253_v20, %v3261_v60  ;;  %v3296_v51 = vpop.permute.xlu0 %3295  ;;  %v4872_v60 = vrot.slane %v8415_v36, %v9129_v10 }
 0x248   : > { %v3218_v48 = vsel %vm1043_vm6, %v3209_v8, %v3217_v9  ;;  %v3294_v52 = vpop.permute.xlu1 %3293  ;;  %3266 = vst [vmem:[#allocation3 + $0x38] sm:$0xcc] %v3262_v46  ;;  %v3300_v53 = vrot.slane %v3296_v51, 4  ;;  %v8404_v54 = vld [vmem:[#allocation3 + $0x24] ss:$16 sps:$4 sm:$0xff]  }
 0x249   : > { %v8406_v55 = vld [vmem:[#allocation3 + $0x20] ss:$16 sps:$4 sm:$0xff]   ;;  %3222 = vst [vmem:[#allocation3 + $0x38] sm:$0x33] %v3218_v48  ;;  %v3299_v59 = vrot.slane %v3294_v52, 4  ;;  %4703 = vrot.lane.b32.xlu0 %v4698_v56, %s8792_s14  ;;  %3384 = vmatprep.subr.bf16.mxu0 %v8404_v54  ;;  %s8798_s14 = smov [#allocation18]  }
 0x24a   : > { %4659 = vrot.lane.b32.xlu1 %v9876_v42, %s8791_s23  ;;  %3385 = vmatpush1.bf16.msra.mxu0 %v8406_v55  ;;  %s8667_s23 = scalar_lea.vmem %s7527_s26, 1536 }
 0x24b   : > { %v3302_v22 = vsel %vm819_vm0, %v3299_v59, %v3300_v53  ;;  %v3531_v18 = vpop.permute.xlu0 %3530  ;;  %p8668_p5 = scmp.ne.s32.totalorder %s7527_s26, %s8667_s23 }
 0x24c   : > { %v3298_v61 = vpop.permute.xlu1 %3297  ;;  %v3303_v62 = vsel %vm1132_vm8, %v3294_v52, %v3302_v22  ;;  %v3536_v11 = vrot.slane %v3531_v18, 4 }
 0x24d   : > { %v3301_v63 = vrot.slane %v3298_v61, 4  ;;  %3308 = vst [vmem:[#allocation3 + $0x40] sm:$0x33] %v3303_v62  ;;  %4744 = vrot.lane.b32.xlu0 %v9854_v44, %s8793_s17  ;;  %p8669_p12 = pnand %p8668_p5, %p10650_p9 }
 0x24e   : > { %4742 = vrot.lane.b32.xlu1 %v9835_v43, %s8793_s17 }
 0x24f   : > { %v3304_v0 = vsel %vm819_vm0, %v3300_v53, %v3301_v63  ;;  %v3574_v1 = vpop.permute.xlu0 %3573  ;;  %p8670_p1 = pneg %p8669_p12 }
 0x250   : > { %v3305_v2 = vsel %vm1132_vm8, %v3296_v51, %v3304_v0  ;;  %v3533_v3 = vpop.permute.xlu1 %3532  ;;  %v8407_v5 = vld [vmem:[#allocation3 + $0x2c] ss:$16 sps:$4 sm:$0xff]   ;;  %v8409_v7 = vld [vmem:[#allocation3 + $0x28] ss:$16 sps:$4 sm:$0xff]   ;;  %v3579_v17 = vrot.slane %v3574_v1, 4 }
 0x251   : > { %3309 = vst [vmem:[#allocation3 + $0x48] sm:$0x33] %v3305_v2  ;;  %v3537_v8 = vrot.slane %v3533_v3, 4  ;;  %4788 = vrot.lane.b32.xlu0 %v9835_v43, %s8790_s10  ;;  %3425 = vmatprep.subr.bf16.mxu1 %v8407_v5 }
 0x252   : > { %4786 = vrot.lane.b32.xlu1 %v9827_v6, %s8790_s10  ;;  %3426 = vmatpush1.bf16.msra.mxu1 %v8409_v7 }
 0x253   : > { %v3539_v12 = vsel %vm819_vm0, %v3536_v11, %v3537_v8  ;;  %v3618_v47 = vpop.permute.xlu0 %3617 }
 0x254   : > { %v3540_v50 = vsel %vm821_vm1, %v3531_v18, %v3539_v12  ;;  %v3576_v14 = vpop.permute.xlu1 %3575  ;;  %v3318_v15 = vld [vmem:[#allocation3 + $0x40] sm:$0x33]  ;;  %v3623_v30 = vrot.slane %v3618_v47, 4 }
 0x255   : > { %3545 = vst [vmem:[#allocation3 + $0x50] sm:$0xcc] %v3540_v50  ;;  %v3580_v49 = vrot.slane %v3576_v14, 4  ;;  %4831 = vrot.lane.b32.xlu0 %v9854_v44, %s8794_s16  ;;  %v7847_v20 = vcombine.high %v3318_v15, %v3318_v15  ;;  %v7846_v21 = vcombine.low %v3318_v15, %v3318_v15 }
 0x256   : > { %4829 = vrot.lane.b32.xlu1 %v9835_v43, %s8794_s16 }
 0x257   : > { %v3582_v23 = vsel %vm819_vm0, %v3579_v17, %v3580_v49  ;;  %7850 = vmatprep.subr.msk.bf16.mxu0 %vm1204_vm9, %v7847_v20  ;;  %v3535_v25 = vpop.permute.xlu0 %3534  ;;  %v3371_v19 = vsel %vm1204_vm9, %v7846_v21, 0 }
 0x258   : > { %v3583_v57 = vsel %vm865_vm3, %v3574_v1, %v3582_v23  ;;  %v3620_v24 = vpop.permute.xlu1 %3619  ;;  %v3319_v13 = vld [vmem:[#allocation3 + $0x48] sm:$0x33]  ;;  %v3538_v26 = vrot.slane %v3535_v25, 4  ;;  %3387 = vmatpush1.bf16.msra.mxu0 %v3371_v19 }
 0x259   : > { %3588 = vst [vmem:[#allocation3 + $0x60] sm:$0x33] %v3583_v57  ;;  %v3624_v28 = vrot.slane %v3620_v24, 4  ;;  %v7849_v32 = vcombine.high %v3319_v13, %v3319_v13  ;;  %v7848_v33 = vcombine.low %v3319_v13, %v3319_v13  ;;  %4875 = vrot.lane.b32.xlu0 %v9835_v43, %s8795_s13 }
 0x25a   : > { %4873 = vrot.lane.b32.xlu1 %v9827_v6, %s8795_s13  ;;  %v3541_v37 = vsel %vm819_vm0, %v3537_v8, %v3538_v26 }
 0x25b   : > { %v3626_v38 = vsel %vm819_vm0, %v3623_v30, %v3624_v28  ;;  %7852 = vmatprep.subr.msk.bf16.mxu1 %vm1204_vm9, %v7849_v32  ;;  %v3542_v39 = vsel %vm821_vm1, %v3533_v3, %v3541_v37  ;;  %v3377_v35 = vsel %vm1204_vm9, %v7848_v33, 0  ;;  %v3622_v34 = vpop.permute.xlu0 %3621  ;;  %7851 = vmatmul.mubr.msk.bf16.vlgmr.msra.gmra.mrb[16].mxu0 %vm1200_vm10, %v9792_v58 }
 0x25c   : > { %v3627_v40 = vsel %vm910_vm2, %v3618_v47, %v3626_v38  ;;  %v3578_v41 = vpop.permute.xlu1 %3577  ;;  %3546 = vst [vmem:[#allocation3 + $0x58] sm:$0xcc] %v3542_v39  ;;  %3428 = vmatpush1.bf16.msra.mxu1 %v3377_v35  ;;  %v3625_v6 = vrot.slane %v3622_v34, 4  ;;  %3955 = vmatprep.mubr.bf16.mxu0 %v8797_v31  ;;  %v3851_v61 = vld [vmem:[#allocation3 + $0x50] sm:$0xff] }
 0x25d   : > { %3632 = vst [vmem:[#allocation3 + $0x60] sm:$0xcc] %v3627_v40  ;;  %v3581_v56 = vrot.slane %v3578_v41, 4  ;;  %4790 = vrot.lane.b32.xlu0 %v4785_v27, %s8790_s10  ;;  %s7507_s10 = scalar_lea.sflag [#allocation8], %s9101_s2 }
 0x25e   : > { %4746 = vrot.lane.b32.xlu1 %v9876_v42, %s8793_s17  ;;  %v3628_v9 = vsel %vm819_vm0, %v3624_v28, %v3625_v6  ;;  %s8671_s17 = sshll.u32 %s8798_s14, 4  ;;  %s8672_s17 = int_to_ptr.vmem [resolvable:$false] %s8671_s17 }
 0x25f   : > { %v3584_v46 = vsel %vm819_vm0, %v3580_v49, %v3581_v56  ;;  %v3629_v51 = vsel %vm910_vm2, %v3620_v24, %v3628_v9  ;;  %v9926_v48 = vpop.permute.xlu0 %3662  ;;  %7853 = vmatmul.mubr.msk.bf16.vlgmr.msra.gmra.mrb[16].mxu1 %vm1200_vm10, %v9792_v58  ;;  %p8674_p13 = scmp.lt.s32.totalorder %s7527_s26, %s8672_s17 }
 0x260   : > { %v3585_v52 = vsel %vm865_vm3, %v3576_v14, %v3584_v46  ;;  %v3661_v53 = vpop.permute.xlu1 %3660  ;;  %3633 = vst [vmem:[#allocation3 + $0x68] sm:$0xcc] %v3629_v51  ;;  %v3667_v10 = vrot.slane %v9926_v48, 4  ;;  %3996 = vmatprep.mubr.bf16.mxu1 %v8797_v31 }
 0x261   : > { %3589 = vst [vmem:[#allocation3 + $0x68] sm:$0x33] %v3585_v52  ;;  %v3666_v54 = vrot.slane %v3661_v53, 4  ;;  %4877 = vrot.lane.b32.xlu0 %v4872_v60, %s8795_s13 }
 0x262   : > { %4833 = vrot.lane.b32.xlu1 %v9876_v42, %s8794_s16  ;;  %s8673_s16 = scalar_lea.vmem %s8672_s17, 3072 }
 0x263   : > { %v3669_v55 = vsel %vm819_vm0, %v3666_v54, %v3667_v10  ;;  %v3707_v59 = vpop.permute.xlu0 %3706  ;;  %v3852_v12 = vld [vmem:[#allocation3 + $0x58] sm:$0xff]  ;;  %p8675_p0 = scmp.lt.s32.totalorder %s8673_s16, %s8667_s23 }
 0x264   : > { %v3705_v22 = vpop.permute.xlu1 %3704  ;;  %v3670_v18 = vsel %vm954_vm4, %v3661_v53, %v3669_v55  ;;  %v3853_v62 = vld [vmem:[#allocation3 + $0x60] sm:$0xff]  ;;  %v3711_v0 = vrot.slane %v3707_v59, 4 }
 0x265   : > { %v8416_v63 = vld [vmem:[#allocation3 + $0x54] ss:$16 sps:$4 sm:$0xff]   ;;  %v3710_v1 = vrot.slane %v3705_v22, 4  ;;  %3675 = vst [vmem:[#allocation3 + $0x70] sm:$0x33] %v3670_v18  ;;  %v7862_v2 = vcombine.low %v3851_v61, %v3853_v62  ;;  %4918 = vrot.lane.b32.xlu0 %v9854_v44, %s8796_s18  ;;  %p8676_p2 = por %p8675_p0, %p8674_p13 }
 0x266   : > { %7904 = vst.sshfl [vmem:[#allocation3 + $0x50] sm:$0xf pattern:$0x76325410] %v9803_v45  ;;  %4916 = vrot.lane.b32.xlu1 %v9835_v43, %s8796_s18  ;;  %3923 = vmatprep.subr.bf16.mxu0 %v8416_v63 }
 0x267   : > { %v3713_v3 = vsel %vm819_vm0, %v3710_v1, %v3711_v0  ;;  %3924 = vmatpush1.bf16.msra.mxu0 %v7862_v2  ;;  %v3750_v5 = vpop.permute.xlu0 %3749  ;;  %p8677_p3 = pnand %p8676_p2, %p8670_p1 }
 0x268   : > { %v3748_v7 = vpop.permute.xlu1 %3747  ;;  %v3714_v8 = vsel %vm999_vm5, %v3705_v22, %v3713_v3  ;;  %v3754_v11 = vrot.slane %v3750_v5, 4  ;;  %v3854_v47 = vld [vmem:[#allocation3 + $0x68] sm:$0xff] }
 0x269   : > { %v8418_v50 = vld [vmem:[#allocation3 + $0x5c] ss:$16 sps:$4 sm:$0xff]   ;;  %v3753_v45 = vrot.slane %v3748_v7, 4  ;;  %3719 = vst [vmem:[#allocation3 + $0x70] sm:$0xcc] %v3714_v8  ;;  %v7864_v44 = vcombine.low %v3852_v12, %v3854_v47 }
 0x26a   : > { %7905 = vst.sshfl [vmem:[#allocation3 + $0x58] sm:$0xf pattern:$0x76325410] %v9844_v29  ;;  %4920 = vrot.lane.b32.xlu1 %v9876_v42, %s8796_s18  ;;  %3964 = vmatprep.subr.bf16.mxu1 %v8418_v50 }
 0x26b   : > { %v3756_v43 = vsel %vm819_vm0, %v3753_v45, %v3754_v11  ;;  %v3794_v14 = vpop.permute.xlu0 %3793  ;;  %3965 = vmatpush1.bf16.msra.mxu1 %v7864_v44 }
 0x26c   : > { %v3792_v15 = vpop.permute.xlu1 %3791  ;;  %v3757_v16 = vsel %vm1043_vm6, %v3748_v7, %v3756_v43  ;;  %v3798_v49 = vrot.slane %v3794_v14, 4 }
 0x26d   : > { %v3797_v17 = vrot.slane %v3792_v15, 4  ;;  %3762 = vst [vmem:[#allocation3 + $0x80] sm:$0x33] %v3757_v16 }
 0x26e   : > { %v9951_v23 = vpop.f32.mrb[0].mxu0 }
 0x26f   : > { %v3800_v20 = vsel %vm819_vm0, %v3797_v17, %v3798_v49  ;;  %v3709_v21 = vpop.permute.xlu0 %3708  ;;  %v9954_v19 = vpop.f32.mrb[1].mxu0 }
 0x270   : > { %v3665_v29 = vpop.permute.xlu1 %3664  ;;  %v3801_v25 = vsel %vm1088_vm7, %v3792_v15, %v3800_v20  ;;  %v3712_v42 = vrot.slane %v3709_v21, 4  ;;  %v1255_v24 = vpop.f32.mrb[2].mxu0 }
 0x271   : > { %v3668_v57 = vrot.slane %v3665_v29, 4  ;;  %3806 = vst [vmem:[#allocation3 + $0x80] sm:$0xcc] %v3801_v25  ;;  %v1256_v26 = vpop.f32.mrb[3].mxu0 }
 0x272   : > { %v3715_v13 = vsel %vm819_vm0, %v3711_v0, %v3712_v42  ;;  %v9957_v27 = vpop.f32.mrb[0].mxu1 }
 0x273   : > { %v3671_v28 = vsel %vm819_vm0, %v3667_v10, %v3668_v57  ;;  %v3716_v30 = vsel %vm999_vm5, %v3707_v59, %v3715_v13  ;;  %v3796_v32 = vpop.permute.xlu0 %3795  ;;  %v9961_v33 = vpop.f32.mrb[1].mxu1 }
 0x274   : > { %v3672_v36 = vsel %vm954_vm4, %v9926_v48, %v3671_v28  ;;  %v3752_v37 = vpop.permute.xlu1 %3751  ;;  %3720 = vst [vmem:[#allocation3 + $0x78] sm:$0xcc] %v3716_v30  ;;  %v3799_v38 = vrot.slane %v3796_v32, 4  ;;  %v1296_v39 = vpop.f32.mrb[2].mxu1 }
 0x275   : > { %3676 = vst [vmem:[#allocation3 + $0x78] sm:$0x33] %v3672_v36  ;;  %v3755_v35 = vrot.slane %v3752_v37, 4  ;;  %v1297_v34 = vpop.f32.mrb[3].mxu1 }
 0x276   : > { %v3802_v40 = vsel %vm819_vm0, %v3798_v49, %v3799_v38 }
 0x277   : > { %v3758_v41 = vsel %vm819_vm0, %v3754_v11, %v3755_v35  ;;  %v3803_v6 = vsel %vm1088_vm7, %v3794_v14, %v3802_v40  ;;  %v3837_v56 = vpop.permute.xlu0 %3836 }
 0x278   : > { %v3759_v60 = vsel %vm1043_vm6, %v3750_v5, %v3758_v41  ;;  %v3835_v9 = vpop.permute.xlu1 %3834  ;;  %3807 = vst [vmem:[#allocation3 + $0x88] sm:$0xcc] %v3803_v6  ;;  %v3841_v46 = vrot.slane %v3837_v56, 4  ;;  %v8420_v51 = vld [vmem:[#allocation3 + $0x74] ss:$16 sps:$4 sm:$0xff]  }
 0x279   : > { %v8422_v48 = vld [vmem:[#allocation3 + $0x70] ss:$16 sps:$4 sm:$0xff]   ;;  %3763 = vst [vmem:[#allocation3 + $0x88] sm:$0x33] %v3759_v60  ;;  %v3840_v52 = vrot.slane %v3835_v9, 4  ;;  %3925 = vmatprep.subr.bf16.mxu0 %v8420_v51 }
 0x27a   : > { %3926 = vmatpush1.bf16.msra.mxu0 %v8422_v48 }
 0x27b   : > { %v3843_v53 = vsel %vm819_vm0, %v3840_v52, %v3841_v46  ;;  %v4072_v10 = vpop.permute.xlu0 %4071 }
 0x27c   : > { %v3839_v54 = vpop.permute.xlu1 %3838  ;;  %v3844_v55 = vsel %vm1132_vm8, %v3835_v9, %v3843_v53  ;;  %v4077_v2 = vrot.slane %v4072_v10, 4 }
 0x27d   : > { %v3842_v59 = vrot.slane %v3839_v54, 4  ;;  %3849 = vst [vmem:[#allocation3 + $0x90] sm:$0x33] %v3844_v55 }
 0x27f   : > { %v3845_v22 = vsel %vm819_vm0, %v3841_v46, %v3842_v59  ;;  %v4115_v18 = vpop.permute.xlu0 %4114 }
 0x280   : > { %v3846_v61 = vsel %vm1132_vm8, %v3837_v56, %v3845_v22  ;;  %v4074_v62 = vpop.permute.xlu1 %4073  ;;  %v8423_v63 = vld [vmem:[#allocation3 + $0x7c] ss:$16 sps:$4 sm:$0xff]   ;;  %v8425_v0 = vld [vmem:[#allocation3 + $0x78] ss:$16 sps:$4 sm:$0xff]   ;;  %v4120_v47 = vrot.slane %v4115_v18, 4 }
 0x281   : > { %3850 = vst [vmem:[#allocation3 + $0x98] sm:$0x33] %v3846_v61  ;;  %v4078_v1 = vrot.slane %v4074_v62, 4  ;;  %3966 = vmatprep.subr.bf16.mxu1 %v8423_v63 }
 0x282   : > { %3967 = vmatpush1.bf16.msra.mxu1 %v8425_v0 }
 0x283   : > { %v4080_v3 = vsel %vm819_vm0, %v4077_v2, %v4078_v1  ;;  %v4159_v5 = vpop.permute.xlu0 %4158 }
 0x284   : > { %v4081_v7 = vsel %vm821_vm1, %v4072_v10, %v4080_v3  ;;  %v4117_v8 = vpop.permute.xlu1 %4116  ;;  %v3859_v11 = vld [vmem:[#allocation3 + $0x90] sm:$0x33]  ;;  %v4164_v21 = vrot.slane %v4159_v5, 4 }
 0x285   : > { %4086 = vst [vmem:[#allocation3] sm:$0xcc] %v4081_v7  ;;  %v4121_v12 = vrot.slane %v4117_v8, 4  ;;  %v7871_v50 = vcombine.high %v3859_v11, %v3859_v11  ;;  %v7870_v45 = vcombine.low %v3859_v11, %v3859_v11 }
 0x287   : > { %v4123_v44 = vsel %vm819_vm0, %v4120_v47, %v4121_v12  ;;  %7874 = vmatprep.subr.msk.bf16.mxu0 %vm1204_vm9, %v7871_v50  ;;  %v4076_v43 = vpop.permute.xlu0 %4075  ;;  %v3912_v14 = vsel %vm1204_vm9, %v7870_v45, 0 }
 0x288   : > { %v4124_v15 = vsel %vm865_vm3, %v4115_v18, %v4123_v44  ;;  %v4161_v16 = vpop.permute.xlu1 %4160  ;;  %v3860_v49 = vld [vmem:[#allocation3 + $0x98] sm:$0x33]  ;;  %v4079_v17 = vrot.slane %v4076_v43, 4  ;;  %3928 = vmatpush1.bf16.msra.mxu0 %v3912_v14 }
 0x289   : > { %4129 = vst [vmem:[#allocation3 + $0x10] sm:$0x33] %v4124_v15  ;;  %v4165_v20 = vrot.slane %v4161_v16, 4  ;;  %v7873_v29 = vcombine.high %v3860_v49, %v3860_v49  ;;  %v7872_v25 = vcombine.low %v3860_v49, %v3860_v49 }
 0x28a   : > { %v4082_v42 = vsel %vm819_vm0, %v4078_v1, %v4079_v17 }
 0x28b   : > { %v4167_v57 = vsel %vm819_vm0, %v4164_v21, %v4165_v20  ;;  %7876 = vmatprep.subr.msk.bf16.mxu1 %vm1204_vm9, %v7873_v29  ;;  %v4083_v24 = vsel %vm821_vm1, %v4074_v62, %v4082_v42  ;;  %v3918_v13 = vsel %vm1204_vm9, %v7872_v25, 0  ;;  %7875 = vmatmul.mubr.msk.bf16.vlgmr.msra.gmra.mrb[20].mxu0 %vm1200_vm10, %v9792_v58  ;;  %v4163_v26 = vpop.permute.xlu0 %4162 }
 0x28c   : > { %v4168_v28 = vsel %vm910_vm2, %v4159_v5, %v4167_v57  ;;  %v4119_v30 = vpop.permute.xlu1 %4118  ;;  %4087 = vst [vmem:[#allocation3 + $0x8] sm:$0xcc] %v4083_v24  ;;  %3969 = vmatpush1.bf16.msra.mxu1 %v3918_v13  ;;  %v4166_v32 = vrot.slane %v4163_v26, 4  ;;  %4496 = vmatprep.mubr.bf16.mxu0 %v8797_v31 }
 0x28d   : > { %4173 = vst [vmem:[#allocation3 + $0x10] sm:$0xcc] %v4168_v28  ;;  %v4122_v36 = vrot.slane %v4119_v30, 4 }
 0x28e   : > { %v4169_v37 = vsel %vm819_vm0, %v4165_v20, %v4166_v32 }
 0x28f   : > { %v4125_v38 = vsel %vm819_vm0, %v4121_v12, %v4122_v36  ;;  %7877 = vmatmul.mubr.msk.bf16.vlgmr.msra.gmra.mrb[20].mxu1 %vm1200_vm10, %v9792_v58  ;;  %v4170_v39 = vsel %vm910_vm2, %v4161_v16, %v4169_v37  ;;  %v4204_v35 = vpop.permute.xlu0 %4203 }
 0x290   : > { %v4126_v34 = vsel %vm865_vm3, %v4117_v8, %v4125_v38  ;;  %v4202_v40 = vpop.permute.xlu1 %4201  ;;  %4174 = vst [vmem:[#allocation3 + $0x18] sm:$0xcc] %v4170_v39  ;;  %v4208_v41 = vrot.slane %v4204_v35, 4  ;;  %4537 = vmatprep.mubr.bf16.mxu1 %v8797_v31 }
 0x291   : > { %4130 = vst [vmem:[#allocation3 + $0x18] sm:$0x33] %v4126_v34  ;;  %v4207_v6 = vrot.slane %v4202_v40, 4 }
 0x293   : > { %v4210_v56 = vsel %vm819_vm0, %v4207_v6, %v4208_v41  ;;  %v4248_v60 = vpop.permute.xlu0 %4247 }
 0x294   : > { %v4246_v9 = vpop.permute.xlu1 %4245  ;;  %v4211_v46 = vsel %vm954_vm4, %v4202_v40, %v4210_v56  ;;  %v8430_v51 = vld [vmem:[#allocation3] ss:$16 sps:$4 sm:$0xff]   ;;  %v8432_v48 = vld [vmem:[#allocation3 + $0x4] ss:$16 sps:$4 sm:$0xff]   ;;  %v4252_v52 = vrot.slane %v4248_v60, 4 }
 0x295   : > { %v4251_v53 = vrot.slane %v4246_v9, 4  ;;  %4216 = vst [vmem:[#allocation3 + $0x20] sm:$0x33] %v4211_v46  ;;  %4464 = vmatprep.subr.bf16.mxu0 %v8432_v48 }
 0x296   : > { %4465 = vmatpush1.bf16.msra.mxu0 %v8430_v51 }
 0x297   : > { %v4254_v10 = vsel %vm819_vm0, %v4251_v53, %v4252_v52  ;;  %v4291_v54 = vpop.permute.xlu0 %4290 }
 0x298   : > { %v4289_v55 = vpop.permute.xlu1 %4288  ;;  %v4255_v59 = vsel %vm999_vm5, %v4246_v9, %v4254_v10  ;;  %v4295_v22 = vrot.slane %v4291_v54, 4  ;;  %v8433_v18 = vld [vmem:[#allocation3 + $0x8] ss:$16 sps:$4 sm:$0xff]   ;;  %v8435_v61 = vld [vmem:[#allocation3 + $0xc] ss:$16 sps:$4 sm:$0xff]  }
 0x299   : > { %v4294_v62 = vrot.slane %v4289_v55, 4  ;;  %4260 = vst [vmem:[#allocation3 + $0x20] sm:$0xcc] %v4255_v59  ;;  %4505 = vmatprep.subr.bf16.mxu1 %v8435_v61 }
 0x29a   : > { %4506 = vmatpush1.bf16.msra.mxu1 %v8433_v18 }
 0x29b   : > { %v4297_v63 = vsel %vm819_vm0, %v4294_v62, %v4295_v22  ;;  %v4335_v0 = vpop.permute.xlu0 %4334 }
 0x29c   : > { %v4333_v1 = vpop.permute.xlu1 %4332  ;;  %v4298_v2 = vsel %vm1043_vm6, %v4289_v55, %v4297_v63  ;;  %v4339_v3 = vrot.slane %v4335_v0, 4 }
 0x29d   : > { %v4338_v5 = vrot.slane %v4333_v1, 4  ;;  %4303 = vst [vmem:[#allocation3 + $0x30] sm:$0x33] %v4298_v2 }
 0x29e   : > { %v10001_v7 = vpop.f32.mrb[4].mxu0 }
 0x29f   : > { %v4341_v8 = vsel %vm819_vm0, %v4338_v5, %v4339_v3  ;;  %v4250_v11 = vpop.permute.xlu0 %4249  ;;  %v10004_v12 = vpop.f32.mrb[5].mxu0 }
 0x2a0   : > { %v4206_v47 = vpop.permute.xlu1 %4205  ;;  %v4342_v50 = vsel %vm1088_vm7, %v4333_v1, %v4341_v8  ;;  %v4253_v45 = vrot.slane %v4250_v11, 4  ;;  %v1797_v44 = vpop.f32.mrb[6].mxu0 }
 0x2a1   : > { %v4209_v43 = vrot.slane %v4206_v47, 4  ;;  %4347 = vst [vmem:[#allocation3 + $0x30] sm:$0xcc] %v4342_v50  ;;  %v1798_v14 = vpop.f32.mrb[7].mxu0 }
 0x2a2   : > { %v4256_v15 = vsel %vm819_vm0, %v4252_v52, %v4253_v45  ;;  %v10008_v16 = vpop.f32.mrb[4].mxu1 }
 0x2a3   : > { %v4212_v49 = vsel %vm819_vm0, %v4208_v41, %v4209_v43  ;;  %v4257_v17 = vsel %vm999_vm5, %v4248_v60, %v4256_v15  ;;  %v4337_v20 = vpop.permute.xlu0 %4336  ;;  %v10012_v21 = vpop.f32.mrb[5].mxu1 }
 0x2a4   : > { %v4213_v29 = vsel %vm954_vm4, %v4204_v35, %v4212_v49  ;;  %v4293_v25 = vpop.permute.xlu1 %4292  ;;  %4261 = vst [vmem:[#allocation3 + $0x28] sm:$0xcc] %v4257_v17  ;;  %v4340_v42 = vrot.slane %v4337_v20, 4  ;;  %v1838_v57 = vpop.f32.mrb[6].mxu1 }
 0x2a5   : > { %4217 = vst [vmem:[#allocation3 + $0x28] sm:$0x33] %v4213_v29  ;;  %v4296_v24 = vrot.slane %v4293_v25, 4  ;;  %v1839_v13 = vpop.f32.mrb[7].mxu1 }
 0x2a6   : > { %v4343_v26 = vsel %vm819_vm0, %v4339_v3, %v4340_v42 }
 0x2a7   : > { %v4299_v28 = vsel %vm819_vm0, %v4295_v22, %v4296_v24  ;;  %v4344_v30 = vsel %vm1088_vm7, %v4335_v0, %v4343_v26  ;;  %v4378_v32 = vpop.permute.xlu0 %4377 }
 0x2a8   : > { %v4300_v36 = vsel %vm1043_vm6, %v4291_v54, %v4299_v28  ;;  %v4376_v37 = vpop.permute.xlu1 %4375  ;;  %4348 = vst [vmem:[#allocation3 + $0x38] sm:$0xcc] %v4344_v30  ;;  %v4382_v38 = vrot.slane %v4378_v32, 4  ;;  %v8436_v39 = vld [vmem:[#allocation3 + $0x20] ss:$16 sps:$4 sm:$0xff]  }
 0x2a9   : > { %v8438_v35 = vld [vmem:[#allocation3 + $0x24] ss:$16 sps:$4 sm:$0xff]   ;;  %4304 = vst [vmem:[#allocation3 + $0x38] sm:$0x33] %v4300_v36  ;;  %v4381_v34 = vrot.slane %v4376_v37, 4 }
 0x2aa   : > { %4466 = vmatprep.subr.bf16.mxu0 %v8438_v35 }
 0x2ab   : > { %v4384_v40 = vsel %vm819_vm0, %v4381_v34, %v4382_v38  ;;  %v4613_v41 = vpop.permute.xlu0 %4612  ;;  %4467 = vmatpush1.bf16.msra.mxu0 %v8436_v39 }
 0x2ac   : > { %v4380_v6 = vpop.permute.xlu1 %4379  ;;  %v4385_v56 = vsel %vm1132_vm8, %v4376_v37, %v4384_v40  ;;  %v4618_v54 = vrot.slane %v4613_v41, 4 }
 0x2ad   : > { %v4383_v60 = vrot.slane %v4380_v6, 4  ;;  %4390 = vst [vmem:[#allocation3 + $0x40] sm:$0x33] %v4385_v56 }
 0x2af   : > { %v4386_v9 = vsel %vm819_vm0, %v4382_v38, %v4383_v60  ;;  %v4656_v46 = vpop.permute.xlu0 %4655 }
 0x2b0   : > { %v4387_v51 = vsel %vm1132_vm8, %v4378_v32, %v4386_v9  ;;  %v4615_v48 = vpop.permute.xlu1 %4614  ;;  %v8439_v52 = vld [vmem:[#allocation3 + $0x28] ss:$16 sps:$4 sm:$0xff]   ;;  %v8441_v53 = vld [vmem:[#allocation3 + $0x2c] ss:$16 sps:$4 sm:$0xff]   ;;  %v4661_v63 = vrot.slane %v4656_v46, 4 }
 0x2b1   : > { %4391 = vst [vmem:[#allocation3 + $0x48] sm:$0x33] %v4387_v51  ;;  %v4619_v10 = vrot.slane %v4615_v48, 4  ;;  %4507 = vmatprep.subr.bf16.mxu1 %v8441_v53 }
 0x2b2   : > { %4508 = vmatpush1.bf16.msra.mxu1 %v8439_v52 }
 0x2b3   : > { %v4621_v55 = vsel %vm819_vm0, %v4618_v54, %v4619_v10  ;;  %v4700_v59 = vpop.permute.xlu0 %4699 }
 0x2b4   : > { %v4622_v22 = vsel %vm821_vm1, %v4613_v41, %v4621_v55  ;;  %v4658_v18 = vpop.permute.xlu1 %4657  ;;  %v4400_v61 = vld [vmem:[#allocation3 + $0x40] sm:$0x33]  ;;  %v4705_v44 = vrot.slane %v4700_v59, 4 }
 0x2b5   : > { %4627 = vst [vmem:[#allocation3 + $0x50] sm:$0xcc] %v4622_v22  ;;  %v4662_v62 = vrot.slane %v4658_v18, 4  ;;  %v7895_v0 = vcombine.high %v4400_v61, %v4400_v61  ;;  %v7894_v1 = vcombine.low %v4400_v61, %v4400_v61 }
 0x2b7   : > { %v4664_v2 = vsel %vm819_vm0, %v4661_v63, %v4662_v62  ;;  %7898 = vmatprep.subr.msk.bf16.mxu0 %vm1204_vm9, %v7895_v0  ;;  %v4617_v3 = vpop.permute.xlu0 %4616  ;;  %v4453_v5 = vsel %vm1204_vm9, %v7894_v1, 0 }
 0x2b8   : > { %v4665_v8 = vsel %vm865_vm3, %v4656_v46, %v4664_v2  ;;  %v4702_v11 = vpop.permute.xlu1 %4701  ;;  %v4401_v47 = vld [vmem:[#allocation3 + $0x48] sm:$0x33]  ;;  %v4620_v50 = vrot.slane %v4617_v3, 4  ;;  %4469 = vmatpush1.bf16.msra.mxu0 %v4453_v5 }
 0x2b9   : > { %4670 = vst [vmem:[#allocation3 + $0x60] sm:$0x33] %v4665_v8  ;;  %v4706_v45 = vrot.slane %v4702_v11, 4  ;;  %v7897_v43 = vcombine.high %v4401_v47, %v4401_v47  ;;  %v7896_v14 = vcombine.low %v4401_v47, %v4401_v47 }
 0x2ba   : > { %v4623_v15 = vsel %vm819_vm0, %v4619_v10, %v4620_v50 }
 0x2bb   : > { %v4708_v49 = vsel %vm819_vm0, %v4705_v44, %v4706_v45  ;;  %7900 = vmatprep.subr.msk.bf16.mxu1 %vm1204_vm9, %v7897_v43  ;;  %v4624_v17 = vsel %vm821_vm1, %v4615_v48, %v4623_v15  ;;  %v4459_v20 = vsel %vm1204_vm9, %v7896_v14, 0  ;;  %7899 = vmatmul.mubr.msk.bf16.vlgmr.msra.gmra.mrb[24].mxu0 %vm1200_vm10, %v9792_v58  ;;  %v4704_v29 = vpop.permute.xlu0 %4703 }
 0x2bc   : > { %v4709_v25 = vsel %vm910_vm2, %v4700_v59, %v4708_v49  ;;  %v4660_v42 = vpop.permute.xlu1 %4659  ;;  %4628 = vst [vmem:[#allocation3 + $0x58] sm:$0xcc] %v4624_v17  ;;  %4510 = vmatpush1.bf16.msra.mxu1 %v4459_v20  ;;  %v4707_v57 = vrot.slane %v4704_v29, 4  ;;  %5037 = vmatprep.mubr.bf16.mxu0 %v8797_v31 }
 0x2bd   : > { %4714 = vst [vmem:[#allocation3 + $0x60] sm:$0xcc] %v4709_v25  ;;  %v4663_v24 = vrot.slane %v4660_v42, 4 }
 0x2be   : > { %v4710_v13 = vsel %vm819_vm0, %v4706_v45, %v4707_v57 }
 0x2bf   : > { %v4666_v26 = vsel %vm819_vm0, %v4662_v62, %v4663_v24  ;;  %7901 = vmatmul.mubr.msk.bf16.vlgmr.msra.gmra.mrb[24].mxu1 %vm1200_vm10, %v9792_v58  ;;  %v4711_v28 = vsel %vm910_vm2, %v4702_v11, %v4710_v13  ;;  %v4745_v30 = vpop.permute.xlu0 %4744 }
 0x2c0   : > { %v4667_v32 = vsel %vm865_vm3, %v4658_v18, %v4666_v26  ;;  %v4743_v36 = vpop.permute.xlu1 %4742  ;;  %4715 = vst [vmem:[#allocation3 + $0x68] sm:$0xcc] %v4711_v28  ;;  %v4749_v37 = vrot.slane %v4745_v30, 4  ;;  %5078 = vmatprep.mubr.bf16.mxu1 %v8797_v31 }
 0x2c1   : > { %4671 = vst [vmem:[#allocation3 + $0x68] sm:$0x33] %v4667_v32  ;;  %v4748_v38 = vrot.slane %v4743_v36, 4 }
 0x2c3   : > { %v4751_v39 = vsel %vm819_vm0, %v4748_v38, %v4749_v37  ;;  %v4789_v35 = vpop.permute.xlu0 %4788 }
 0x2c4   : > { %v4787_v34 = vpop.permute.xlu1 %4786  ;;  %v4752_v40 = vsel %vm954_vm4, %v4743_v36, %v4751_v39  ;;  %v8446_v41 = vld [vmem:[#allocation3 + $0x50] ss:$16 sps:$4 sm:$0xff]   ;;  %v8448_v58 = vld [vmem:[#allocation3 + $0x54] ss:$16 sps:$4 sm:$0xff]   ;;  %v4793_v6 = vrot.slane %v4789_v35, 4 }
 0x2c5   : > { %v4792_v56 = vrot.slane %v4787_v34, 4  ;;  %4757 = vst [vmem:[#allocation3 + $0x70] sm:$0x33] %v4752_v40  ;;  %5005 = vmatprep.subr.bf16.mxu0 %v8448_v58 }
 0x2c6   : > { %5006 = vmatpush1.bf16.msra.mxu0 %v8446_v41 }
 0x2c7   : > { %v4795_v60 = vsel %vm819_vm0, %v4792_v56, %v4793_v6  ;;  %v4832_v9 = vpop.permute.xlu0 %4831 }
 0x2c8   : > { %v4830_v46 = vpop.permute.xlu1 %4829  ;;  %v4796_v51 = vsel %vm999_vm5, %v4787_v34, %v4795_v60  ;;  %v4836_v48 = vrot.slane %v4832_v9, 4  ;;  %v8449_v52 = vld [vmem:[#allocation3 + $0x58] ss:$16 sps:$4 sm:$0xff]   ;;  %v8451_v53 = vld [vmem:[#allocation3 + $0x5c] ss:$16 sps:$4 sm:$0xff]  }
 0x2c9   : > { %v4835_v10 = vrot.slane %v4830_v46, 4  ;;  %4801 = vst [vmem:[#allocation3 + $0x70] sm:$0xcc] %v4796_v51  ;;  %5046 = vmatprep.subr.bf16.mxu1 %v8451_v53 }
 0x2ca   : > { %5047 = vmatpush1.bf16.msra.mxu1 %v8449_v52 }
 0x2cb   : > { %v4838_v54 = vsel %vm819_vm0, %v4835_v10, %v4836_v48  ;;  %v4876_v55 = vpop.permute.xlu0 %4875 }
 0x2cc   : > { %v4874_v59 = vpop.permute.xlu1 %4873  ;;  %v4839_v22 = vsel %vm1043_vm6, %v4830_v46, %v4838_v54  ;;  %v4880_v18 = vrot.slane %v4876_v55, 4 }
 0x2cd   : > { %v4879_v61 = vrot.slane %v4874_v59, 4  ;;  %4844 = vst [vmem:[#allocation3 + $0x80] sm:$0x33] %v4839_v22 }
 0x2ce   : > { %v10051_v62 = vpop.f32.mrb[8].mxu0 }
 0x2cf   : > { %v4882_v63 = vsel %vm819_vm0, %v4879_v61, %v4880_v18  ;;  %v4791_v0 = vpop.permute.xlu0 %4790  ;;  %v10054_v1 = vpop.f32.mrb[9].mxu0  ;;  %v10104_v61 = vld [vmem:[#allocation11] sm:$0xf] }
 0x2d0   : > { %v4747_v2 = vpop.permute.xlu1 %4746  ;;  %v4883_v3 = vsel %vm1088_vm7, %v4874_v59, %v4882_v63  ;;  %v4794_v5 = vrot.slane %v4791_v0, 4  ;;  %v2338_v8 = vpop.f32.mrb[10].mxu0  ;;  %v8119_v59 = vpack.c.bf16 %v9957_v27, %v9957_v27 }
 0x2d1   : > { %v4750_v11 = vrot.slane %v4747_v2, 4  ;;  %4888 = vst [vmem:[#allocation3 + $0x80] sm:$0xcc] %v4883_v3  ;;  %v2339_v47 = vpop.f32.mrb[11].mxu0 }
 0x2d2   : > { %v4797_v50 = vsel %vm819_vm0, %v4793_v6, %v4794_v5  ;;  %v10058_v45 = vpop.f32.mrb[8].mxu1  ;;  %v5190_v27 = vsel %vm819_vm0, %v8119_v59, 0 }
 0x2d3   : > { %v4753_v44 = vsel %vm819_vm0, %v4749_v37, %v4750_v11  ;;  %v4798_v43 = vsel %vm999_vm5, %v4789_v35, %v4797_v50  ;;  %v4878_v14 = vpop.permute.xlu0 %4877  ;;  %v10062_v15 = vpop.f32.mrb[9].mxu1 }
 0x2d4   : > { %v4754_v49 = vsel %vm954_vm4, %v4745_v30, %v4753_v44  ;;  %v4834_v17 = vpop.permute.xlu1 %4833  ;;  %4802 = vst [vmem:[#allocation3 + $0x78] sm:$0xcc] %v4798_v43  ;;  %v4881_v20 = vrot.slane %v4878_v14, 4  ;;  %v2379_v29 = vpop.f32.mrb[10].mxu1  ;;  %v10129_v2 = vpack.c.bf16 %v10062_v15, %v10062_v15 }
 0x2d5   : > { %4758 = vst [vmem:[#allocation3 + $0x78] sm:$0x33] %v4754_v49  ;;  %v4837_v25 = vrot.slane %v4834_v17, 4  ;;  %v2380_v42 = vpop.f32.mrb[11].mxu1 }
 0x2d6   : > { %v4884_v57 = vsel %vm819_vm0, %v4880_v18, %v4881_v20  ;;  %v8464_v18 = vld [vmem:[#allocation9] sm:$0xf] }
 0x2d7   : > { %v4840_v24 = vsel %vm819_vm0, %v4836_v48, %v4837_v25  ;;  %v4885_v13 = vsel %vm1088_vm7, %v4876_v55, %v4884_v57  ;;  %v4919_v26 = vpop.permute.xlu0 %4918  ;;  %v8118_v48 = vpack.c.bf16 %v9954_v19, %v9954_v19  ;;  %v10087_v19 = vpack.c.bf16 %v10004_v12, %v10004_v12 }
 0x2d8   : > { %v4841_v28 = vsel %vm1043_vm6, %v4832_v9, %v4840_v24  ;;  %v4917_v32 = vpop.permute.xlu1 %4916  ;;  %4889 = vst [vmem:[#allocation3 + $0x88] sm:$0xcc] %v4885_v13  ;;  %v4923_v36 = vrot.slane %v4919_v26, 4  ;;  %v8452_v30 = vld [vmem:[#allocation3 + $0x70] ss:$16 sps:$4 sm:$0xff]   ;;  %v8117_v9 = vpack.c.bf16 %v9951_v23, %v9951_v23  ;;  %v8120_v23 = vpack.c.bf16 %v9961_v33, %v9961_v33 }
 0x2d9   : > { %v8454_v37 = vld [vmem:[#allocation3 + $0x74] ss:$16 sps:$4 sm:$0xff]   ;;  %4845 = vst [vmem:[#allocation3 + $0x88] sm:$0x33] %v4841_v28  ;;  %v4922_v38 = vrot.slane %v4917_v32, 4  ;;  %v8121_v33 = vpack.c.bf16 %v10001_v7, %v10001_v7  ;;  %v10098_v12 = vpack.c.bf16 %v10012_v21, %v10012_v21  ;;  %v8123_v7 = vpack.c.bf16 %v10008_v16, %v10008_v16 }
 0x2da   : > { %5007 = vmatprep.subr.bf16.mxu0 %v8454_v37  ;;  %v5184_v10 = vsel %vm819_vm0, %v8117_v9, 0  ;;  %v10116_v21 = vpack.c.bf16 %v10054_v1, %v10054_v1  ;;  %v8125_v16 = vpack.c.bf16 %v10051_v62, %v10051_v62  ;;  %v8127_v62 = vpack.c.bf16 %v10058_v45, %v10058_v45 }
 0x2db   : > { %v4925_v39 = vsel %vm819_vm0, %v4922_v38, %v4923_v36  ;;  %5008 = vmatpush1.bf16.msra.mxu0 %v8452_v30  ;;  %v10108_v63 = vsel %vm819_vm0, %v8121_v33, 0  ;;  %v10123_v0 = vsel %vm819_vm0, %v8123_v7, 0 }
 0x2dc   : > { %v4921_v35 = vpop.permute.xlu1 %4920  ;;  %v4926_v34 = vsel %vm1132_vm8, %v4917_v32, %v4925_v39  ;;  %v10138_v1 = vsel %vm819_vm0, %v8125_v16, 0  ;;  %v10149_v3 = vsel %vm819_vm0, %v8127_v62, 0 }
 0x2dd   : > { %v4924_v40 = vrot.slane %v4921_v35, 4  ;;  %4931 = vst [vmem:[#allocation3 + $0x90] sm:$0x33] %v4926_v34  ;;  %v7197_v34 = vld [vmem:[#allocation12] sm:$0xff] }
 0x2de   : > { %7206 = vperm.xlu0 %8278, %v7197_v34  }
 0x2df   : > { %v4927_v41 = vsel %vm819_vm0, %v4923_v36, %v4924_v40 }
 0x2e0   : > { %v4928_v58 = vsel %vm1132_vm8, %v4919_v26, %v4927_v41  ;;  %v8455_v6 = vld [vmem:[#allocation3 + $0x78] ss:$16 sps:$4 sm:$0xff]   ;;  %v8457_v56 = vld [vmem:[#allocation3 + $0x7c] ss:$16 sps:$4 sm:$0xff]  }
 0x2e1   : > { %4932 = vst [vmem:[#allocation3 + $0x98] sm:$0x33] %v4928_v58  ;;  %5048 = vmatprep.subr.bf16.mxu1 %v8457_v56 }
 0x2e2   : > { %5049 = vmatpush1.bf16.msra.mxu1 %v8455_v6 }
 0x2e4   : > { %v4941_v60 = vld [vmem:[#allocation3 + $0x90] sm:$0x33] }
 0x2e5   : > { %v7919_v46 = vcombine.high %v4941_v60, %v4941_v60  ;;  %v7918_v51 = vcombine.low %v4941_v60, %v4941_v60 }
 0x2e7   : > { %7922 = vmatprep.subr.msk.bf16.mxu0 %vm1204_vm9, %v7919_v46  ;;  %v4994_v52 = vsel %vm1204_vm9, %v7918_v51, 0 }
 0x2e8   : > { %v4942_v53 = vld [vmem:[#allocation3 + $0x98] sm:$0x33]  ;;  %5010 = vmatpush1.bf16.msra.mxu0 %v4994_v52 }
 0x2e9   : > { %v7921_v54 = vcombine.high %v4942_v53, %v4942_v53  ;;  %v7920_v55 = vcombine.low %v4942_v53, %v4942_v53  ;;  %7952 = vmatprep.subr.msk.bf16.mxu0 %vm819_vm0, %v8118_v48 }
 0x2eb   : > { %7924 = vmatprep.subr.msk.bf16.mxu1 %vm1204_vm9, %v7921_v54  ;;  %v5000_v22 = vsel %vm1204_vm9, %v7920_v55, 0  ;;  %7923 = vmatmul.mubr.msk.bf16.vlgmr.msra.gmra.mrb[28].mxu0 %vm1200_vm10, %v8464_v18  ;;  %v5796_v55 = vld [vmem:[#allocation11 + $0x4] sm:$0xf] }
 0x2ec   : > { %5051 = vmatpush1.bf16.msra.mxu1 %v5000_v22  ;;  %5256 = vmatpush1.bf16.msra.mxu0 %v5184_v10 }
 0x2ed   : > { %7954 = vmatprep.subr.msk.bf16.mxu1 %vm819_vm0, %v8120_v23  ;;  %5287 = vmatprep.mubr.bf16.mxu0 %v8797_v31 }
 0x2ee   : > { %7956 = vmatprep.subr.msk.bf16.mxu0 %vm819_vm0, %v10087_v19 }
 0x2ef   : > { %7925 = vmatmul.mubr.msk.bf16.vlgmr.msra.gmra.mrb[28].mxu1 %vm1200_vm10, %v8464_v18 }
 0x2f0   : > { %5297 = vmatpush1.bf16.msra.mxu1 %v5190_v27  ;;  %5328 = vmatprep.mubr.bf16.mxu1 %v8797_v31 }
 0x2f1   : > { %7958 = vmatprep.subr.msk.bf16.mxu1 %vm819_vm0, %v10098_v12 }
 0x2f3   : > { %7953 = vmatmul.mubr.msk.bf16.vlgmr.msra.gmra.mrb[32].mxu0 %vm5178_vm11, %v10104_v61 }
 0x2f4   : > { %5338 = vmatpush1.bf16.msra.mxu0 %v10108_v63  ;;  %5369 = vmatprep.mubr.bf16.mxu0 %v8797_v31 }
 0x2f5   : > { %7960 = vmatprep.subr.msk.bf16.mxu0 %vm819_vm0, %v10116_v21 }
 0x2f7   : > { %7955 = vmatmul.mubr.msk.bf16.vlgmr.msra.gmra.mrb[32].mxu1 %vm5178_vm11, %v10104_v61 }
 0x2f8   : > { %5379 = vmatpush1.bf16.msra.mxu1 %v10123_v0  ;;  %5410 = vmatprep.mubr.bf16.mxu1 %v8797_v31 }
 0x2f9   : > { %7962 = vmatprep.subr.msk.bf16.mxu1 %vm819_vm0, %v10129_v2 }
 0x2fb   : > { %7957 = vmatmul.mubr.msk.bf16.vlgmr.msra.gmra.mrb[36].mxu0 %vm5178_vm11, %v10104_v61 }
 0x2fc   : > { %5420 = vmatpush1.bf16.msra.mxu0 %v10138_v1  ;;  %5451 = vmatprep.mubr.bf16.mxu0 %v8797_v31 }
 0x2fe   : > { %v2875_v5 = vpop.f32.mrb[12].mxu0 }
 0x2ff   : > { %7959 = vmatmul.mubr.msk.bf16.vlgmr.msra.gmra.mrb[36].mxu1 %vm5178_vm11, %v10104_v61  ;;  %v8129_v8 = vpack.c.bf16 %v2875_v5, %v2875_v5  ;;  %v2877_v11 = vpop.f32.mrb[13].mxu0 }
 0x300   : > { %5461 = vmatpush1.bf16.msra.mxu1 %v10149_v3  ;;  %v10154_v47 = vpack.c.bf16 %v2877_v11, %v2877_v11  ;;  %v2879_v50 = vpop.f32.mrb[14].mxu0  ;;  %5492 = vmatprep.mubr.bf16.mxu1 %v8797_v31 }
 0x301   : > { %v10158_v45 = vsel %vm819_vm0, %v8129_v8, 0  ;;  %v2880_v44 = vpop.f32.mrb[15].mxu0 }
 0x302   : > { %v2916_v43 = vpop.f32.mrb[12].mxu1  ;;  %7964 = vmatprep.subr.msk.bf16.mxu0 %vm819_vm0, %v10154_v47 }
 0x303   : > { %v8131_v14 = vpack.c.bf16 %v2916_v43, %v2916_v43  ;;  %v2918_v15 = vpop.f32.mrb[13].mxu1  ;;  %7961 = vmatmul.mubr.msk.bf16.vlgmr.msra.gmra.mrb[40].mxu0 %vm5178_vm11, %v10104_v61 }
 0x304   : > { %v10164_v49 = vpack.c.bf16 %v2918_v15, %v2918_v15  ;;  %v2920_v17 = vpop.f32.mrb[14].mxu1  ;;  %5502 = vmatpush1.bf16.msra.mxu0 %v10158_v45  ;;  %5533 = vmatprep.mubr.bf16.mxu0 %v8797_v31 }
 0x305   : > { %v10169_v20 = vsel %vm819_vm0, %v8131_v14, 0  ;;  %v2921_v29 = vpop.f32.mrb[15].mxu1 }
 0x306   : > { %7966 = vmatprep.subr.msk.bf16.mxu1 %vm819_vm0, %v10164_v49 }
 0x307   : > { %7963 = vmatmul.mubr.msk.bf16.vlgmr.msra.gmra.mrb[40].mxu1 %vm5178_vm11, %v10104_v61 }
 0x308   : > { %5543 = vmatpush1.bf16.msra.mxu1 %v10169_v20  ;;  %5574 = vmatprep.mubr.bf16.mxu1 %v8797_v31 }
 0x30b   : > { %7965 = vmatmul.mubr.msk.bf16.vlgmr.msra.gmra.mrb[44].mxu0 %vm5178_vm11, %v10104_v61 }
 0x30c   : > { %5615 = vmatprep.mubr.bf16.mxu0 %v8797_v31 }
 0x30f   : > { %7967 = vmatmul.mubr.msk.bf16.vlgmr.msra.gmra.mrb[44].mxu1 %vm5178_vm11, %v10104_v61 }
 0x310   : > { %5656 = vmatprep.mubr.bf16.mxu1 %v8797_v31 }
 0x32e   : > { %v3416_v25 = vpop.f32.mrb[16].mxu0 }
 0x32f   : > { %v8133_v42 = vpack.c.bf16 %v3416_v25, %v3416_v25  ;;  %v3418_v57 = vpop.f32.mrb[17].mxu0 }
 0x330   : > { %v10183_v24 = vpack.c.bf16 %v3418_v57, %v3418_v57  ;;  %v3420_v13 = vpop.f32.mrb[18].mxu0 }
 0x331   : > { %v10186_v26 = vsel %vm819_vm0, %v8133_v42, 0  ;;  %v3421_v28 = vpop.f32.mrb[19].mxu0 }
 0x332   : > { %v3457_v32 = vpop.f32.mrb[16].mxu1  ;;  %7968 = vmatprep.subr.msk.bf16.mxu0 %vm819_vm0, %v10183_v24 }
 0x333   : > { %v8135_v36 = vpack.c.bf16 %v3457_v32, %v3457_v32  ;;  %v3459_v30 = vpop.f32.mrb[17].mxu1  ;;  %5584 = vmatpush1.bf16.msra.mxu0 %v10186_v26 }
 0x334   : > { %v10191_v37 = vpack.c.bf16 %v3459_v30, %v3459_v30  ;;  %v3461_v38 = vpop.f32.mrb[18].mxu1 }
 0x335   : > { %v10194_v39 = vsel %vm819_vm0, %v8135_v36, 0  ;;  %v3462_v35 = vpop.f32.mrb[19].mxu1 }
 0x336   : > { %7970 = vmatprep.subr.msk.bf16.mxu1 %vm819_vm0, %v10191_v37  ;;  %7969 = vmatmul.mubr.msk.bf16.vlgmr.msra.gmra.mrb[48].mxu0 %vm5178_vm11, %v10104_v61 }
 0x337   : > { %5625 = vmatpush1.bf16.msra.mxu1 %v10194_v39  ;;  %5697 = vmatprep.mubr.bf16.mxu0 %v8797_v31 }
 0x33a   : > { %7971 = vmatmul.mubr.msk.bf16.vlgmr.msra.gmra.mrb[48].mxu1 %vm5178_vm11, %v10104_v61 }
 0x33b   : > { %5738 = vmatprep.mubr.bf16.mxu1 %v8797_v31 }
 0x35e   : > { %v3957_v40 = vpop.f32.mrb[20].mxu0 }
 0x35f   : > { %v8137_v41 = vpack.c.bf16 %v3957_v40, %v3957_v40  ;;  %v3959_v58 = vpop.f32.mrb[21].mxu0 }
 0x360   : > { %v10205_v6 = vpack.c.bf16 %v3959_v58, %v3959_v58  ;;  %v3961_v56 = vpop.f32.mrb[22].mxu0 }
 0x361   : > { %v10208_v60 = vsel %vm819_vm0, %v8137_v41, 0  ;;  %v3962_v9 = vpop.f32.mrb[23].mxu0 }
 0x362   : > { %v3998_v46 = vpop.f32.mrb[20].mxu1  ;;  %7972 = vmatprep.subr.msk.bf16.mxu0 %vm819_vm0, %v10205_v6 }
 0x363   : > { %v8139_v51 = vpack.c.bf16 %v3998_v46, %v3998_v46  ;;  %v4000_v48 = vpop.f32.mrb[21].mxu1  ;;  %5666 = vmatpush1.bf16.msra.mxu0 %v10208_v60 }
 0x364   : > { %v10213_v52 = vpack.c.bf16 %v4000_v48, %v4000_v48  ;;  %v4002_v53 = vpop.f32.mrb[22].mxu1  ;;  %8000 = vmatprep.subr.msk.bf16.mxu0 %vm819_vm0, %v10087_v19 }
 0x365   : > { %v10218_v10 = vsel %vm819_vm0, %v8139_v51, 0  ;;  %v4003_v54 = vpop.f32.mrb[23].mxu1 }
 0x366   : > { %7974 = vmatprep.subr.msk.bf16.mxu1 %vm819_vm0, %v10213_v52  ;;  %7973 = vmatmul.mubr.msk.bf16.vlgmr.msra.gmra.mrb[52].mxu0 %vm5178_vm11, %v10104_v61 }
 0x367   : > { %5707 = vmatpush1.bf16.msra.mxu1 %v10218_v10  ;;  %5945 = vmatpush1.bf16.msra.mxu0 %v10108_v63 }
 0x368   : > { %8002 = vmatprep.subr.msk.bf16.mxu1 %vm819_vm0, %v10098_v12  ;;  %8004 = vmatprep.subr.msk.bf16.mxu0 %vm819_vm0, %v10116_v21 }
 0x369   : > { %5976 = vmatprep.mubr.bf16.mxu0 %v8797_v31 }
 0x36a   : > { %7975 = vmatmul.mubr.msk.bf16.vlgmr.msra.gmra.mrb[52].mxu1 %vm5178_vm11, %v10104_v61 }
 0x36b   : > { %5986 = vmatpush1.bf16.msra.mxu1 %v10123_v0  ;;  %6017 = vmatprep.mubr.bf16.mxu1 %v8797_v31 }
 0x36c   : > { %8006 = vmatprep.subr.msk.bf16.mxu1 %vm819_vm0, %v10129_v2 }
 0x36e   : > { %8001 = vmatmul.mubr.msk.bf16.vlgmr.msra.gmra.mrb[56].mxu0 %vm5178_vm11, %v5796_v55 }
 0x36f   : > { %6027 = vmatpush1.bf16.msra.mxu0 %v10138_v1  ;;  %6058 = vmatprep.mubr.bf16.mxu0 %v8797_v31 }
 0x370   : > { %8008 = vmatprep.subr.msk.bf16.mxu0 %vm819_vm0, %v10154_v47 }
 0x372   : > { %8003 = vmatmul.mubr.msk.bf16.vlgmr.msra.gmra.mrb[56].mxu1 %vm5178_vm11, %v5796_v55 }
 0x373   : > { %6068 = vmatpush1.bf16.msra.mxu1 %v10149_v3  ;;  %6099 = vmatprep.mubr.bf16.mxu1 %v8797_v31 }
 0x374   : > { %8010 = vmatprep.subr.msk.bf16.mxu1 %vm819_vm0, %v10164_v49 }
 0x376   : > { %8005 = vmatmul.mubr.msk.bf16.vlgmr.msra.gmra.mrb[60].mxu0 %vm5178_vm11, %v5796_v55 }
 0x377   : > { %6109 = vmatpush1.bf16.msra.mxu0 %v10158_v45  ;;  %6140 = vmatprep.mubr.bf16.mxu0 %v8797_v31 }
 0x378   : > { %8012 = vmatprep.subr.msk.bf16.mxu0 %vm819_vm0, %v10183_v24 }
 0x37a   : > { %8007 = vmatmul.mubr.msk.bf16.vlgmr.msra.gmra.mrb[60].mxu1 %vm5178_vm11, %v5796_v55 }
 0x37b   : > { %6150 = vmatpush1.bf16.msra.mxu1 %v10169_v20  ;;  %6181 = vmatprep.mubr.bf16.mxu1 %v8797_v31 }
 0x37c   : > { %8014 = vmatprep.subr.msk.bf16.mxu1 %vm819_vm0, %v10191_v37 }
 0x37e   : > { %8009 = vmatmul.mubr.msk.bf16.vlgmr.msra.gmra.mrb[64].mxu0 %vm5178_vm11, %v5796_v55 }
 0x37f   : > { %6191 = vmatpush1.bf16.msra.mxu0 %v10186_v26  ;;  %6222 = vmatprep.mubr.bf16.mxu0 %v8797_v31 }
 0x380   : > { %8016 = vmatprep.subr.msk.bf16.mxu0 %vm819_vm0, %v10205_v6 }
 0x382   : > { %8011 = vmatmul.mubr.msk.bf16.vlgmr.msra.gmra.mrb[64].mxu1 %vm5178_vm11, %v5796_v55 }
 0x383   : > { %6232 = vmatpush1.bf16.msra.mxu1 %v10194_v39  ;;  %6263 = vmatprep.mubr.bf16.mxu1 %v8797_v31 }
 0x384   : > { %8018 = vmatprep.subr.msk.bf16.mxu1 %vm819_vm0, %v10213_v52 }
 0x386   : > { %8013 = vmatmul.mubr.msk.bf16.vlgmr.msra.gmra.mrb[68].mxu0 %vm5178_vm11, %v5796_v55 }
 0x387   : > { %6273 = vmatpush1.bf16.msra.mxu0 %v10208_v60  ;;  %6304 = vmatprep.mubr.bf16.mxu0 %v8797_v31 }
 0x38a   : > { %8015 = vmatmul.mubr.msk.bf16.vlgmr.msra.gmra.mrb[68].mxu1 %vm5178_vm11, %v5796_v55 }
 0x38b   : > { %6314 = vmatpush1.bf16.msra.mxu1 %v10218_v10  ;;  %6345 = vmatprep.mubr.bf16.mxu1 %v8797_v31 }
 0x38e   : > { %v4498_v59 = vpop.f32.mrb[24].mxu0  ;;  %8017 = vmatmul.mubr.msk.bf16.vlgmr.msra.gmra.mrb[72].mxu0 %vm5178_vm11, %v5796_v55 }
 0x38f   : > { %v8141_v23 = vpack.c.bf16 %v4498_v59, %v4498_v59  ;;  %v4500_v19 = vpop.f32.mrb[25].mxu0  ;;  %6386 = vmatprep.mubr.bf16.mxu0 %v8797_v31 }
 0x390   : > { %v8142_v22 = vpack.c.bf16 %v4500_v19, %v4500_v19  ;;  %v4502_v18 = vpop.f32.mrb[26].mxu0 }
 0x391   : > { %v5933_v27 = vsel %vm819_vm0, %v8141_v23, 0  ;;  %v4503_v33 = vpop.f32.mrb[27].mxu0 }
 0x392   : > { %v4539_v12 = vpop.f32.mrb[24].mxu1  ;;  %8019 = vmatmul.mubr.msk.bf16.vlgmr.msra.gmra.mrb[72].mxu1 %vm5178_vm11, %v5796_v55  ;;  %8020 = vmatprep.subr.msk.bf16.mxu0 %vm819_vm0, %v8142_v22 }
 0x393   : > { %v8143_v61 = vpack.c.bf16 %v4539_v12, %v4539_v12  ;;  %v4541_v63 = vpop.f32.mrb[25].mxu1  ;;  %6355 = vmatpush1.bf16.msra.mxu0 %v5933_v27  ;;  %6427 = vmatprep.mubr.bf16.mxu1 %v8797_v31 }
 0x394   : > { %v8144_v7 = vpack.c.bf16 %v4541_v63, %v4541_v63  ;;  %v4543_v0 = vpop.f32.mrb[26].mxu1  ;;  %8048 = vmatprep.subr.msk.bf16.mxu0 %vm819_vm0, %v10116_v21  ;;  %v6509_v21 = vld [vmem:[#allocation11 + $0x8] sm:$0xf] }
 0x395   : > { %v5939_v16 = vsel %vm819_vm0, %v8143_v61, 0  ;;  %v4544_v62 = vpop.f32.mrb[27].mxu1 }
 0x396   : > { %8022 = vmatprep.subr.msk.bf16.mxu1 %vm819_vm0, %v8144_v7  ;;  %8021 = vmatmul.mubr.msk.bf16.vlgmr.msra.gmra.mrb[76].mxu0 %vm5178_vm11, %v5796_v55 }
 0x397   : > { %6396 = vmatpush1.bf16.msra.mxu1 %v5939_v16  ;;  %6658 = vmatpush1.bf16.msra.mxu0 %v10138_v1 }
 0x398   : > { %8050 = vmatprep.subr.msk.bf16.mxu1 %vm819_vm0, %v10129_v2  ;;  %8052 = vmatprep.subr.msk.bf16.mxu0 %vm819_vm0, %v10154_v47 }
 0x399   : > { %6689 = vmatprep.mubr.bf16.mxu0 %v8797_v31 }
 0x39a   : > { %8023 = vmatmul.mubr.msk.bf16.vlgmr.msra.gmra.mrb[76].mxu1 %vm5178_vm11, %v5796_v55 }
 0x39b   : > { %6699 = vmatpush1.bf16.msra.mxu1 %v10149_v3  ;;  %6730 = vmatprep.mubr.bf16.mxu1 %v8797_v31 }
 0x39c   : > { %8054 = vmatprep.subr.msk.bf16.mxu1 %vm819_vm0, %v10164_v49 }
 0x39e   : > { %8049 = vmatmul.mubr.msk.bf16.vlgmr.msra.gmra.mrb[80].mxu0 %vm5178_vm11, %v6509_v21 }
 0x39f   : > { %6740 = vmatpush1.bf16.msra.mxu0 %v10158_v45  ;;  %6771 = vmatprep.mubr.bf16.mxu0 %v8797_v31 }
 0x3a0   : > { %8056 = vmatprep.subr.msk.bf16.mxu0 %vm819_vm0, %v10183_v24 }
 0x3a2   : > { %8051 = vmatmul.mubr.msk.bf16.vlgmr.msra.gmra.mrb[80].mxu1 %vm5178_vm11, %v6509_v21 }
 0x3a3   : > { %6781 = vmatpush1.bf16.msra.mxu1 %v10169_v20  ;;  %6812 = vmatprep.mubr.bf16.mxu1 %v8797_v31 }
 0x3a4   : > { %8058 = vmatprep.subr.msk.bf16.mxu1 %vm819_vm0, %v10191_v37 }
 0x3a6   : > { %8053 = vmatmul.mubr.msk.bf16.vlgmr.msra.gmra.mrb[84].mxu0 %vm5178_vm11, %v6509_v21 }
 0x3a7   : > { %6822 = vmatpush1.bf16.msra.mxu0 %v10186_v26  ;;  %6853 = vmatprep.mubr.bf16.mxu0 %v8797_v31 }
 0x3a8   : > { %8060 = vmatprep.subr.msk.bf16.mxu0 %vm819_vm0, %v10205_v6 }
 0x3aa   : > { %8055 = vmatmul.mubr.msk.bf16.vlgmr.msra.gmra.mrb[84].mxu1 %vm5178_vm11, %v6509_v21 }
 0x3ab   : > { %6863 = vmatpush1.bf16.msra.mxu1 %v10194_v39  ;;  %6894 = vmatprep.mubr.bf16.mxu1 %v8797_v31 }
 0x3ac   : > { %8062 = vmatprep.subr.msk.bf16.mxu1 %vm819_vm0, %v10213_v52 }
 0x3ae   : > { %8057 = vmatmul.mubr.msk.bf16.vlgmr.msra.gmra.mrb[88].mxu0 %vm5178_vm11, %v6509_v21 }
 0x3af   : > { %6904 = vmatpush1.bf16.msra.mxu0 %v10208_v60  ;;  %6935 = vmatprep.mubr.bf16.mxu0 %v8797_v31 }
 0x3b0   : > { %8064 = vmatprep.subr.msk.bf16.mxu0 %vm819_vm0, %v8142_v22 }
 0x3b2   : > { %8059 = vmatmul.mubr.msk.bf16.vlgmr.msra.gmra.mrb[88].mxu1 %vm5178_vm11, %v6509_v21 }
 0x3b3   : > { %6945 = vmatpush1.bf16.msra.mxu1 %v10218_v10  ;;  %6976 = vmatprep.mubr.bf16.mxu1 %v8797_v31 }
 0x3b4   : > { %8066 = vmatprep.subr.msk.bf16.mxu1 %vm819_vm0, %v8144_v7 }
 0x3b6   : > { %8061 = vmatmul.mubr.msk.bf16.vlgmr.msra.gmra.mrb[92].mxu0 %vm5178_vm11, %v6509_v21 }
 0x3b7   : > { %6986 = vmatpush1.bf16.msra.mxu0 %v5933_v27  ;;  %7017 = vmatprep.mubr.bf16.mxu0 %v8797_v31 }
 0x3ba   : > { %8063 = vmatmul.mubr.msk.bf16.vlgmr.msra.gmra.mrb[92].mxu1 %vm5178_vm11, %v6509_v21 }
 0x3bb   : > { %7027 = vmatpush1.bf16.msra.mxu1 %v5939_v16  ;;  %7058 = vmatprep.mubr.bf16.mxu1 %v8797_v31 }
 0x3be   : > { %v5039_v2 = vpop.f32.mrb[28].mxu0  ;;  %8065 = vmatmul.mubr.msk.bf16.vlgmr.msra.gmra.mrb[96].mxu0 %vm5178_vm11, %v6509_v21 }
 0x3bf   : > { %v8145_v1 = vpack.c.bf16 %v5039_v2, %v5039_v2  ;;  %v5041_v3 = vpop.f32.mrb[29].mxu0  ;;  %7099 = vmatprep.mubr.bf16.mxu0 %v8797_v31 }
 0x3c0   : > { %v8146_v5 = vpack.c.bf16 %v5041_v3, %v5041_v3  ;;  %v5043_v8 = vpop.f32.mrb[30].mxu0 }
 0x3c1   : > { %v6646_v11 = vsel %vm819_vm0, %v8145_v1, 0  ;;  %v5044_v47 = vpop.f32.mrb[31].mxu0 }
 0x3c2   : > { %v5080_v50 = vpop.f32.mrb[28].mxu1  ;;  %8067 = vmatmul.mubr.msk.bf16.vlgmr.msra.gmra.mrb[96].mxu1 %vm5178_vm11, %v6509_v21  ;;  %8068 = vmatprep.subr.msk.bf16.mxu0 %vm819_vm0, %v8146_v5 }
 0x3c3   : > { %v8147_v45 = vpack.c.bf16 %v5080_v50, %v5080_v50  ;;  %v5082_v44 = vpop.f32.mrb[29].mxu1  ;;  %7068 = vmatpush1.bf16.msra.mxu0 %v6646_v11  ;;  %7140 = vmatprep.mubr.bf16.mxu1 %v8797_v31 }
 0x3c4   : > { %v8148_v43 = vpack.c.bf16 %v5082_v44, %v5082_v44  ;;  %v5084_v14 = vpop.f32.mrb[30].mxu1 }
 0x3c5   : > { %v6652_v15 = vsel %vm819_vm0, %v8147_v45, 0  ;;  %v5085_v49 = vpop.f32.mrb[31].mxu1 }
 0x3c6   : > { %8070 = vmatprep.subr.msk.bf16.mxu1 %vm819_vm0, %v8148_v43  ;;  %8069 = vmatmul.mubr.msk.bf16.vlgmr.msra.gmra.mrb[100].mxu0 %vm5178_vm11, %v6509_v21  ;;  %v5289_v17 = vpop.f32.mrb[32].mxu0 }
 0x3c7   : > { %7109 = vmatpush1.bf16.msra.mxu1 %v6652_v15  ;;  %v5291_v20 = vpop.f32.mrb[33].mxu0 }
 0x3c8   : > { %v5293_v29 = vpop.f32.mrb[34].mxu0 }
 0x3c9   : > { %v5294_v25 = vpop.f32.mrb[35].mxu0 }
 0x3ca   : > { %8071 = vmatmul.mubr.msk.bf16.vlgmr.msra.gmra.mrb[100].mxu1 %vm5178_vm11, %v6509_v21  ;;  %v5330_v42 = vpop.f32.mrb[32].mxu1 }
 0x3cb   : > { %v5332_v57 = vpop.f32.mrb[33].mxu1 }
 0x3cc   : > { %v5334_v24 = vpop.f32.mrb[34].mxu1 }
 0x3cd   : > { %v5335_v13 = vpop.f32.mrb[35].mxu1 }
 0x3ce   : > { %v5371_v26 = vpop.f32.mrb[36].mxu0 }
 0x3cf   : > { %v5373_v28 = vpop.f32.mrb[37].mxu0 }
 0x3d0   : > { %v5375_v32 = vpop.f32.mrb[38].mxu0 }
 0x3d1   : > { %v5376_v36 = vpop.f32.mrb[39].mxu0 }
 0x3d2   : > { %v5412_v30 = vpop.f32.mrb[36].mxu1 }
 0x3d3   : > { %v5414_v37 = vpop.f32.mrb[37].mxu1 }
 0x3d4   : > { %v5416_v38 = vpop.f32.mrb[38].mxu1 }
 0x3d5   : > { %v5417_v39 = vpop.f32.mrb[39].mxu1 }
 0x3d6   : > { %v5453_v35 = vpop.f32.mrb[40].mxu0 }
 0x3d7   : > { %v5455_v34 = vpop.f32.mrb[41].mxu0 }
 0x3d8   : > { %v5457_v40 = vpop.f32.mrb[42].mxu0 }
 0x3d9   : > { %v5458_v41 = vpop.f32.mrb[43].mxu0 }
 0x3da   : > { %v5494_v58 = vpop.f32.mrb[40].mxu1 }
 0x3db   : > { %v5496_v6 = vpop.f32.mrb[41].mxu1 }
 0x3dc   : > { %v5498_v56 = vpop.f32.mrb[42].mxu1 }
 0x3dd   : > { %v5499_v60 = vpop.f32.mrb[43].mxu1 }
 0x3de   : > { %v5535_v9 = vpop.f32.mrb[44].mxu0 }
 0x3df   : > { %v5537_v46 = vpop.f32.mrb[45].mxu0 }
 0x3e0   : > { %v5539_v51 = vpop.f32.mrb[46].mxu0 }
 0x3e1   : > { %v5540_v48 = vpop.f32.mrb[47].mxu0 }
 0x3e2   : > { %v10337_v52 = vpop.f32.mrb[44].mxu1 }
 0x3e3   : > { %v10339_v53 = vpop.f32.mrb[45].mxu1 }
 0x3e4   : > { %v5580_v10 = vpop.f32.mrb[46].mxu1 }
 0x3e5   : > { %v5581_v54 = vpop.f32.mrb[47].mxu1 }
 0x409   : > { %v10341_v55 = vpop.f32.mrb[48].mxu0 }
 0x40a   : > { %v10343_v59 = vpop.f32.mrb[49].mxu0 }
 0x40b   : > { %v5621_v23 = vpop.f32.mrb[50].mxu0 }
 0x40c   : > { %v5622_v19 = vpop.f32.mrb[51].mxu0 }
 0x40d   : > { %v10345_v22 = vpop.f32.mrb[48].mxu1 }
 0x40e   : > { %v10347_v18 = vpop.f32.mrb[49].mxu1 }
 0x40f   : > { %v5662_v27 = vpop.f32.mrb[50].mxu1 }
 0x410   : > { %v5663_v33 = vpop.f32.mrb[51].mxu1 }
 0x439   : > { %v10349_v12 = vpop.f32.mrb[52].mxu0 }
 0x43a   : > { %v10351_v61 = vpop.f32.mrb[53].mxu0 }
 0x43b   : > { %v5703_v63 = vpop.f32.mrb[54].mxu0 }
 0x43c   : > { %v5704_v7 = vpop.f32.mrb[55].mxu0 }
 0x43d   : > { %v10353_v0 = vpop.f32.mrb[52].mxu1 }
 0x43e   : > { %v10355_v16 = vpop.f32.mrb[53].mxu1 }
 0x43f   : > { %v5744_v62 = vpop.f32.mrb[54].mxu1 }
 0x440   : > { %v5745_v21 = vpop.f32.mrb[55].mxu1 }
 0x441   : > { %v5978_v2 = vpop.f32.mrb[56].mxu0 }
 0x442   : > { %v10357_v1 = vadd.f32 %v5978_v2, %v5289_v17  ;;  %v5980_v3 = vpop.f32.mrb[57].mxu0 }
 0x443   : > { %v10359_v5 = vadd.f32 %v5980_v3, %v5291_v20  ;;  %v5982_v8 = vpop.f32.mrb[58].mxu0 }
 0x444   : > { %v5983_v11 = vpop.f32.mrb[59].mxu0 }
 0x445   : > { %v6019_v47 = vpop.f32.mrb[56].mxu1 }
 0x446   : > { %v10361_v50 = vadd.f32 %v6019_v47, %v5330_v42  ;;  %v6021_v45 = vpop.f32.mrb[57].mxu1  ;;  %v7198_v47 = vld [vmem:[#allocation14] sm:$0xf] }
 0x447   : > { %v10363_v44 = vadd.f32 %v6021_v45, %v5332_v57  ;;  %v6023_v43 = vpop.f32.mrb[58].mxu1  ;;  %vm7199_vm12 = vcmp.gt.f32.partialorder %v7198_v47, 0.0 }
 0x448   : > { %v6024_v14 = vpop.f32.mrb[59].mxu1 }
 0x449   : > { %v6060_v15 = vpop.f32.mrb[60].mxu0 }
 0x44a   : > { %v10365_v49 = vadd.f32 %v6060_v15, %v5371_v26  ;;  %v6062_v29 = vpop.f32.mrb[61].mxu0 }
 0x44b   : > { %v10367_v25 = vadd.f32 %v6062_v29, %v5373_v28  ;;  %v6064_v17 = vpop.f32.mrb[62].mxu0 }
 0x44c   : > { %v6065_v24 = vpop.f32.mrb[63].mxu0 }
 0x44d   : > { %v6101_v20 = vpop.f32.mrb[60].mxu1  ;;  %v7231_v24 = vsel %vm7199_vm12, 1, %v8797_v31  ;;  %v7246_v31 = vsub.s32 3, %v9123_v4 }
 0x44e   : > { %v10369_v13 = vadd.f32 %v6101_v20, %v5412_v30  ;;  %v6103_v32 = vpop.f32.mrb[61].mxu1 }
 0x44f   : > { %v10371_v36 = vadd.f32 %v6103_v32, %v5414_v37  ;;  %v6105_v42 = vpop.f32.mrb[62].mxu1 }
 0x450   : > { %v6106_v38 = vpop.f32.mrb[63].mxu1 }
 0x451   : > { %v6142_v57 = vpop.f32.mrb[64].mxu0 }
 0x452   : > { %v10373_v39 = vadd.f32 %v6142_v57, %v5453_v35  ;;  %v6144_v40 = vpop.f32.mrb[65].mxu0 }
 0x453   : > { %v10375_v41 = vadd.f32 %v6144_v40, %v5455_v34  ;;  %v6146_v26 = vpop.f32.mrb[66].mxu0 }
 0x454   : > { %v6147_v56 = vpop.f32.mrb[67].mxu0 }
 0x455   : > { %v6183_v28 = vpop.f32.mrb[64].mxu1 }
 0x456   : > { %v10377_v60 = vadd.f32 %v6183_v28, %v5494_v58  ;;  %v6185_v51 = vpop.f32.mrb[65].mxu1  ;;  %v10424_v28 = vpop.permute.xlu0 %7206 }
 0x457   : > { %v10379_v48 = vadd.f32 %v6185_v51, %v5496_v6  ;;  %v6187_v30 = vpop.f32.mrb[66].mxu1 }
 0x458   : > { %v6188_v10 = vpop.f32.mrb[67].mxu1 }
 0x459   : > { %v6224_v37 = vpop.f32.mrb[68].mxu0 }
 0x45a   : > { %v10381_v54 = vadd.f32 %v6224_v37, %v5535_v9  ;;  %v6226_v23 = vpop.f32.mrb[69].mxu0 }
 0x45b   : > { %v10383_v19 = vadd.f32 %v6226_v23, %v5537_v46  ;;  %v6228_v35 = vpop.f32.mrb[70].mxu0  ;;  %v10433_v23 = vrot.slane %v7231_v24, %v7246_v31 }
 0x45c   : > { %v6229_v27 = vpop.f32.mrb[71].mxu0 }
 0x45d   : > { %v6265_v34 = vpop.f32.mrb[68].mxu1  ;;  %vm7251_vm0 = vcmp.eq.s32.totalorder %v10433_v23, 1 }
 0x45e   : > { %v10386_v33 = vadd.f32 %v6265_v34, %v10337_v52  ;;  %v6267_v63 = vpop.f32.mrb[69].mxu1 }
 0x45f   : > { %v10389_v58 = vadd.f32 %v6267_v63, %v10339_v53  ;;  %v6269_v6 = vpop.f32.mrb[70].mxu1 }
 0x460   : > { %v6270_v7 = vpop.f32.mrb[71].mxu1 }
 0x461   : > { %v6306_v62 = vpop.f32.mrb[72].mxu0 }
 0x462   : > { %v10392_v21 = vadd.f32 %v6306_v62, %v10341_v55  ;;  %v6308_v9 = vpop.f32.mrb[73].mxu0 }
 0x463   : > { %v10395_v46 = vadd.f32 %v6308_v9, %v10343_v59  ;;  %v6310_v2 = vpop.f32.mrb[74].mxu0 }
 0x464   : > { %v6311_v3 = vpop.f32.mrb[75].mxu0 }
 0x465   : > { %v6347_v8 = vpop.f32.mrb[72].mxu1 }
 0x466   : > { %v10398_v52 = vadd.f32 %v6347_v8, %v10345_v22  ;;  %v6349_v11 = vpop.f32.mrb[73].mxu1  ;;  %v7234_v22 = vsub.s32 0, %v9123_v4 }
 0x467   : > { %v10401_v53 = vadd.f32 %v6349_v11, %v10347_v18  ;;  %v6351_v45 = vpop.f32.mrb[74].mxu1  ;;  %v7238_v18 = vsub.s32 1, %v9123_v4 }
 0x468   : > { %v6352_v43 = vpop.f32.mrb[75].mxu1  ;;  %v10419_v57 = vrot.slane %v7231_v24, %v7234_v22 }
 0x469   : > { %v6388_v14 = vpop.f32.mrb[76].mxu0  ;;  %v10421_v26 = vrot.slane %v7231_v24, %v7238_v18 }
 0x46a   : > { %v10404_v55 = vadd.f32 %v6388_v14, %v10349_v12  ;;  %v6390_v59 = vpop.f32.mrb[77].mxu0  ;;  %v7242_v12 = vsub.s32 2, %v9123_v4  ;;  %vm7248_vm13 = vcmp.eq.s32.totalorder %v10419_v57, 1 }
 0x46b   : > { %v10407_v15 = vadd.f32 %v6390_v59, %v10351_v61  ;;  %v6392_v29 = vpop.f32.mrb[78].mxu0  ;;  %vm7249_vm14 = vcmp.eq.s32.totalorder %v10421_v26, 1 }
 0x46c   : > { %v6393_v17 = vpop.f32.mrb[79].mxu0  ;;  %v10427_v30 = vrot.slane %v7231_v24, %v7242_v12 }
 0x46d   : > { %v6429_v20 = vpop.f32.mrb[76].mxu1 }
 0x46e   : > { %v10413_v32 = vadd.f32 %v6429_v20, %v10353_v0  ;;  %v6431_v42 = vpop.f32.mrb[77].mxu1  ;;  %vm7250_vm15 = vcmp.eq.s32.totalorder %v10427_v30, 1 }
 0x46f   : > { %v10417_v38 = vadd.f32 %v6431_v42, %v10355_v16  ;;  %v6433_v61 = vpop.f32.mrb[78].mxu1 }
 0x470   : > { %v6434_v40 = vpop.f32.mrb[79].mxu1 }
 0x471   : > { %v6691_v56 = vpop.f32.mrb[80].mxu0 }
 0x472   : > { %v7149_v0 = vadd.f32 %v6691_v56, %v10357_v1  ;;  %v6693_v51 = vpop.f32.mrb[81].mxu0 }
 0x473   : > { %v7150_v16 = vadd.f32 %v6693_v51, %v10359_v5  ;;  %v6695_v10 = vpop.f32.mrb[82].mxu0 }
 0x474   : > { %v6696_v37 = vpop.f32.mrb[83].mxu0  ;;  %v7209_v4 = vadd.f32 %v10424_v28, %v7149_v0 }
 0x475   : > { %v6732_v35 = vpop.f32.mrb[80].mxu1  ;;  %v7210_v27 = vadd.f32 %v10424_v28, %v7150_v16 }
 0x476   : > { %v7151_v1 = vadd.f32 %v6732_v35, %v10361_v50  ;;  %v6734_v34 = vpop.f32.mrb[81].mxu1  ;;  %v7252_v5 = vsel %vm7248_vm13, %v7209_v4, 0.0 }
 0x477   : > { %v7152_v63 = vadd.f32 %v6734_v34, %v10363_v44  ;;  %v6736_v6 = vpop.f32.mrb[82].mxu1  ;;  %v8105_v7 = vpack.c.bf16 %v7210_v27, %v7209_v4  ;;  %v7253_v62 = vsel %vm7249_vm14, %v7210_v27, 0.0  ;;  %v7262_v9 = vmul.f32 %v7252_v5, %v7252_v5 }
 0x478   : > { %v6737_v2 = vpop.f32.mrb[83].mxu1  ;;  %v7211_v3 = vadd.f32 %v10424_v28, %v7151_v1  ;;  %v7256_v50 = vadd.f32 %v7253_v62, %v7252_v5  ;;  %v7263_v8 = vmul.f32 %v7253_v62, %v7253_v62 }
 0x479   : > { %v6773_v11 = vpop.f32.mrb[84].mxu0  ;;  %v7212_v47 = vadd.f32 %v10424_v28, %v7152_v63  ;;  %7229 = vst [vmem:[%s10447_s19] sm:$0xff] %v8105_v7 }
 0x47a   : > { %v7153_v44 = vadd.f32 %v6773_v11, %v10365_v49  ;;  %v6775_v45 = vpop.f32.mrb[85].mxu0  ;;  %v7254_v43 = vsel %vm7250_vm15, %v7211_v3, 0.0  ;;  %v7266_v14 = vadd.f32 %v7263_v8, %v7262_v9 }
 0x47b   : > { %v7154_v59 = vadd.f32 %v6775_v45, %v10367_v25  ;;  %v6777_v29 = vpop.f32.mrb[86].mxu0  ;;  %v7255_v22 = vsel %vm7251_vm0, %v7212_v47, 0.0  ;;  %v7257_v17 = vadd.f32 %v7256_v50, %v7254_v43  ;;  %v8106_v24 = vpack.c.bf16 %v7212_v47, %v7211_v3 }
 0x47c   : > { %v7276_v18 = vadd.f32 %v10424_v28, %v7153_v44  ;;  %v6778_v20 = vpop.f32.mrb[87].mxu0  ;;  %v7264_v42 = vmul.f32 %v7254_v43, %v7254_v43  ;;  %v7265_v12 = vmul.f32 %v7255_v22, %v7255_v22 }
 0x47d   : > { %v6814_v49 = vpop.f32.mrb[84].mxu1  ;;  %v7277_v61 = vadd.f32 %v10424_v28, %v7154_v59  ;;  %v7258_v40 = vadd.f32 %v7257_v17, %v7255_v22  ;;  %7230 = vst [vmem:[%s10447_s19 + $0x8] sm:$0xff] %v8106_v24 }
 0x47e   : > { %v7298_v25 = vsel %vm7248_vm13, %v7276_v18, 0.0  ;;  %v7155_v31 = vadd.f32 %v6814_v49, %v10369_v13  ;;  %v6816_v56 = vpop.f32.mrb[85].mxu1  ;;  %v7267_v0 = vadd.f32 %v7266_v14, %v7264_v42 }
 0x47f   : > { %v7308_v51 = vmul.f32 %v7298_v25, %v7298_v25  ;;  %v8107_v16 = vpack.c.bf16 %v7277_v61, %v7276_v18  ;;  %v7299_v10 = vsel %vm7249_vm14, %v7277_v61, 0.0  ;;  %v7156_v37 = vadd.f32 %v6816_v56, %v10371_v36  ;;  %7259 = vadd.xlane.f32.xlu1 %v7258_v40  ;;  %v6818_v4 = vpop.f32.mrb[86].mxu1 }
 0x480   : > { %v7278_v35 = vadd.f32 %v10424_v28, %v7155_v31  ;;  %v7302_v27 = vadd.f32 %v7299_v10, %v7298_v25  ;;  %v7309_v1 = vmul.f32 %v7299_v10, %v7299_v10  ;;  %v7268_v34 = vadd.f32 %v7267_v0, %v7265_v12  ;;  %v6819_v5 = vpop.f32.mrb[87].mxu1 }
 0x481   : > { %7296 = vst [vmem:[%s10447_s19 + $0x10] sm:$0xff] %v8107_v16  ;;  %v7279_v13 = vadd.f32 %v10424_v28, %v7156_v37  ;;  %v6855_v63 = vpop.f32.mrb[88].mxu0 }
 0x482   : > { %v7300_v6 = vsel %vm7250_vm15, %v7278_v35, 0.0  ;;  %v7312_v7 = vadd.f32 %v7309_v1, %v7308_v51  ;;  %7269 = vadd.xlane.f32.xlu0 %v7268_v34  ;;  %v7157_v36 = vadd.f32 %v6855_v63, %v10373_v39  ;;  %v6857_v62 = vpop.f32.mrb[89].mxu0 }
 0x483   : > { %v7310_v9 = vmul.f32 %v7300_v6, %v7300_v6  ;;  %v8108_v2 = vpack.c.bf16 %v7279_v13, %v7278_v35  ;;  %v7301_v3 = vsel %vm7251_vm0, %v7279_v13, 0.0  ;;  %v7158_v50 = vadd.f32 %v6857_v62, %v10375_v41  ;;  %v6859_v8 = vpop.f32.mrb[90].mxu0 }
 0x484   : > { %v7311_v11 = vmul.f32 %v7301_v3, %v7301_v3  ;;  %v7322_v47 = vadd.f32 %v10424_v28, %v7157_v36  ;;  %v6860_v44 = vpop.f32.mrb[91].mxu0  ;;  %v7303_v45 = vadd.f32 %v7302_v27, %v7300_v6 }
 0x485   : > { %7297 = vst [vmem:[%s10447_s19 + $0x18] sm:$0xff] %v8108_v2  ;;  %v6896_v43 = vpop.f32.mrb[88].mxu1  ;;  %v7323_v14 = vadd.f32 %v10424_v28, %v7158_v50  ;;  %v7313_v59 = vadd.f32 %v7312_v7, %v7310_v9 }
 0x486   : > { %v7344_v39 = vsel %vm7248_vm13, %v7322_v47, 0.0  ;;  %v7159_v29 = vadd.f32 %v6896_v43, %v10377_v60  ;;  %v6898_v22 = vpop.f32.mrb[89].mxu1  ;;  %v7304_v17 = vadd.f32 %v7303_v45, %v7301_v3 }
 0x487   : > { %v7354_v41 = vmul.f32 %v7344_v39, %v7344_v39  ;;  %v8109_v24 = vpack.c.bf16 %v7323_v14, %v7322_v47  ;;  %v7345_v18 = vsel %vm7249_vm14, %v7323_v14, 0.0  ;;  %v7160_v20 = vadd.f32 %v6898_v22, %v10379_v48  ;;  %v6900_v42 = vpop.f32.mrb[90].mxu1 }
 0x488   : > { %v7324_v12 = vadd.f32 %v10424_v28, %v7159_v29  ;;  %v7348_v49 = vadd.f32 %v7345_v18, %v7344_v39  ;;  %v7355_v61 = vmul.f32 %v7345_v18, %v7345_v18  ;;  %7305 = vadd.xlane.f32.xlu1 %v7304_v17  ;;  %v7314_v40 = vadd.f32 %v7313_v59, %v7311_v11  ;;  %v6901_v25 = vpop.f32.mrb[91].mxu1 }
 0x489   : > { %7342 = vst [vmem:[%s10447_s19 + $0x20] sm:$0xff] %v8109_v24  ;;  %v7325_v60 = vadd.f32 %v10424_v28, %v7160_v20  ;;  %v6937_v31 = vpop.f32.mrb[92].mxu0 }
 0x48a   : > { %v7346_v56 = vsel %vm7250_vm15, %v7324_v12, 0.0  ;;  %v7358_v0 = vadd.f32 %v7355_v61, %v7354_v41  ;;  %7315 = vadd.xlane.f32.xlu0 %v7314_v40  ;;  %v7161_v48 = vadd.f32 %v6937_v31, %v10381_v54  ;;  %v6939_v51 = vpop.f32.mrb[93].mxu0 }
 0x48b   : > { %v7356_v16 = vmul.f32 %v7346_v56, %v7346_v56  ;;  %v8110_v10 = vpack.c.bf16 %v7325_v60, %v7324_v12  ;;  %v7347_v37 = vsel %vm7251_vm0, %v7325_v60, 0.0  ;;  %v7162_v4 = vadd.f32 %v6939_v51, %v10383_v19  ;;  %v6941_v35 = vpop.f32.mrb[94].mxu0 }
 0x48c   : > { %v7357_v27 = vmul.f32 %v7347_v37, %v7347_v37  ;;  %v7368_v1 = vadd.f32 %v10424_v28, %v7161_v48  ;;  %v6942_v34 = vpop.f32.mrb[95].mxu0  ;;  %v7349_v5 = vadd.f32 %v7348_v49, %v7346_v56 }
 0x48d   : > { %7343 = vst [vmem:[%s10447_s19 + $0x28] sm:$0xff] %v8110_v10  ;;  %v6978_v13 = vpop.f32.mrb[92].mxu1  ;;  %v7369_v63 = vadd.f32 %v10424_v28, %v7162_v4  ;;  %v7359_v6 = vadd.f32 %v7358_v0, %v7356_v16 }
 0x48e   : > { %v7390_v54 = vsel %vm7248_vm13, %v7368_v1, 0.0  ;;  %v7163_v7 = vadd.f32 %v6978_v13, %v10386_v33  ;;  %v6980_v36 = vpop.f32.mrb[93].mxu1  ;;  %v7350_v62 = vadd.f32 %v7349_v5, %v7347_v37 }
 0x48f   : > { %v7400_v19 = vmul.f32 %v7390_v54, %v7390_v54  ;;  %v8111_v9 = vpack.c.bf16 %v7369_v63, %v7368_v1  ;;  %v7391_v2 = vsel %vm7249_vm14, %v7369_v63, 0.0  ;;  %v7164_v3 = vadd.f32 %v6980_v36, %v10389_v58  ;;  %v6982_v50 = vpop.f32.mrb[94].mxu1 }
 0x490   : > { %v7370_v8 = vadd.f32 %v10424_v28, %v7163_v7  ;;  %v7394_v11 = vadd.f32 %v7391_v2, %v7390_v54  ;;  %v7401_v47 = vmul.f32 %v7391_v2, %v7391_v2  ;;  %7351 = vadd.xlane.f32.xlu1 %v7350_v62  ;;  %v7360_v44 = vadd.f32 %v7359_v6, %v7357_v27  ;;  %v6983_v45 = vpop.f32.mrb[95].mxu1 }
 0x491   : > { %7388 = vst [vmem:[%s10447_s19 + $0x30] sm:$0xff] %v8111_v9  ;;  %v7371_v33 = vadd.f32 %v10424_v28, %v7164_v3  ;;  %v7019_v43 = vpop.f32.mrb[96].mxu0 }
 0x492   : > { %v7392_v14 = vsel %vm7250_vm15, %v7370_v8, 0.0  ;;  %v7404_v59 = vadd.f32 %v7401_v47, %v7400_v19  ;;  %7361 = vadd.xlane.f32.xlu0 %v7360_v44  ;;  %v7165_v58 = vadd.f32 %v7019_v43, %v10392_v21  ;;  %v7021_v39 = vpop.f32.mrb[97].mxu0 }
 0x493   : > { %v7402_v29 = vmul.f32 %v7392_v14, %v7392_v14  ;;  %v8112_v22 = vpack.c.bf16 %v7371_v33, %v7370_v8  ;;  %v7393_v17 = vsel %vm7251_vm0, %v7371_v33, 0.0  ;;  %v7166_v41 = vadd.f32 %v7021_v39, %v10395_v46  ;;  %v7023_v24 = vpop.f32.mrb[98].mxu0 }
 0x494   : > { %v7403_v18 = vmul.f32 %v7393_v17, %v7393_v17  ;;  %v7414_v20 = vadd.f32 %v10424_v28, %v7165_v58  ;;  %v7024_v42 = vpop.f32.mrb[99].mxu0  ;;  %v7395_v12 = vadd.f32 %v7394_v11, %v7392_v14 }
 0x495   : > { %7389 = vst [vmem:[%s10447_s19 + $0x38] sm:$0xff] %v8112_v22  ;;  %v7060_v49 = vpop.f32.mrb[96].mxu1  ;;  %v7415_v61 = vadd.f32 %v10424_v28, %v7166_v41  ;;  %v7405_v40 = vadd.f32 %v7404_v59, %v7402_v29 }
 0x496   : > { %v7436_v21 = vsel %vm7248_vm13, %v7414_v20, 0.0  ;;  %v7167_v25 = vadd.f32 %v7060_v49, %v10398_v52  ;;  %v7062_v60 = vpop.f32.mrb[97].mxu1  ;;  %v7396_v31 = vadd.f32 %v7395_v12, %v7393_v17 }
 0x497   : > { %v7446_v46 = vmul.f32 %v7436_v21, %v7436_v21  ;;  %v8113_v56 = vpack.c.bf16 %v7415_v61, %v7414_v20  ;;  %v7437_v0 = vsel %vm7249_vm14, %v7415_v61, 0.0  ;;  %v7168_v48 = vadd.f32 %v7062_v60, %v10401_v53  ;;  %v7064_v51 = vpop.f32.mrb[98].mxu1 }
 0x498   : > { %v7416_v16 = vadd.f32 %v10424_v28, %v7167_v25  ;;  %v7440_v10 = vadd.f32 %v7437_v0, %v7436_v21  ;;  %v7447_v37 = vmul.f32 %v7437_v0, %v7437_v0  ;;  %7397 = vadd.xlane.f32.xlu1 %v7396_v31  ;;  %v7406_v4 = vadd.f32 %v7405_v40, %v7403_v18  ;;  %v7065_v35 = vpop.f32.mrb[99].mxu1 }
 0x499   : > { %7434 = vst [vmem:[%s10447_s19 + $0x40] sm:$0xff] %v8113_v56  ;;  %v7417_v52 = vadd.f32 %v10424_v28, %v7168_v48  ;;  %v7101_v27 = vpop.f32.mrb[100].mxu0 }
 0x49a   : > { %v7438_v1 = vsel %vm7250_vm15, %v7416_v16, 0.0  ;;  %v7450_v34 = vadd.f32 %v7447_v37, %v7446_v46  ;;  %7407 = vadd.xlane.f32.xlu0 %v7406_v4  ;;  %v7169_v53 = vadd.f32 %v7101_v27, %v10404_v55  ;;  %v7103_v5 = vpop.f32.mrb[101].mxu0 }
 0x49b   : > { %v7448_v13 = vmul.f32 %v7438_v1, %v7438_v1  ;;  %v8114_v63 = vpack.c.bf16 %v7417_v52, %v7416_v16  ;;  %v7439_v6 = vsel %vm7251_vm0, %v7417_v52, 0.0  ;;  %v7170_v54 = vadd.f32 %v7103_v5, %v10407_v15  ;;  %v7105_v7 = vpop.f32.mrb[102].mxu0 }
 0x49c   : > { %v7449_v36 = vmul.f32 %v7439_v6, %v7439_v6  ;;  %v7460_v62 = vadd.f32 %v10424_v28, %v7169_v53  ;;  %v7106_v19 = vpop.f32.mrb[103].mxu0  ;;  %v7441_v9 = vadd.f32 %v7440_v10, %v7438_v1 }
 0x49d   : > { %7435 = vst [vmem:[%s10447_s19 + $0x48] sm:$0xff] %v8114_v63  ;;  %v7142_v2 = vpop.f32.mrb[100].mxu1  ;;  %v7461_v3 = vadd.f32 %v10424_v28, %v7170_v54  ;;  %v7451_v50 = vadd.f32 %v7450_v34, %v7448_v13 }
 0x49e   : > { %v7482_v55 = vsel %vm7248_vm13, %v7460_v62, 0.0  ;;  %v7171_v8 = vadd.f32 %v7142_v2, %v10413_v32  ;;  %v7144_v11 = vpop.f32.mrb[101].mxu1  ;;  %v7442_v47 = vadd.f32 %v7441_v9, %v7439_v6 }
 0x49f   : > { %v7492_v15 = vmul.f32 %v7482_v55, %v7482_v55  ;;  %v8115_v44 = vpack.c.bf16 %v7461_v3, %v7460_v62  ;;  %v7483_v45 = vsel %vm7249_vm14, %v7461_v3, 0.0  ;;  %v7172_v33 = vadd.f32 %v7144_v11, %v10417_v38  ;;  %v7146_v43 = vpop.f32.mrb[102].mxu1 }
 0x4a0   : > { %v7462_v14 = vadd.f32 %v10424_v28, %v7171_v8  ;;  %v7486_v59 = vadd.f32 %v7483_v45, %v7482_v55  ;;  %v7493_v58 = vmul.f32 %v7483_v45, %v7483_v45  ;;  %7443 = vadd.xlane.f32.xlu1 %v7442_v47  ;;  %v7452_v57 = vadd.f32 %v7451_v50, %v7449_v36  ;;  %v7147_v39 = vpop.f32.mrb[103].mxu1 }
 0x4a1   : > { %7480 = vst [vmem:[%s10447_s19 + $0x50] sm:$0xff] %v8115_v44  ;;  %v7463_v32 = vadd.f32 %v10424_v28, %v7172_v33 }
 0x4a2   : > { %v7484_v26 = vsel %vm7250_vm15, %v7462_v14, 0.0  ;;  %v7496_v29 = vadd.f32 %v7493_v58, %v7492_v15  ;;  %7453 = vadd.xlane.f32.xlu0 %v7452_v57 }
 0x4a3   : > { %v7494_v38 = vmul.f32 %v7484_v26, %v7484_v26  ;;  %v8116_v22 = vpack.c.bf16 %v7463_v32, %v7462_v14  ;;  %v7485_v17 = vsel %vm7251_vm0, %v7463_v32, 0.0  ;;  %v7487_v41 = vadd.f32 %v7486_v59, %v7484_v26 }
 0x4a4   : > { %v7495_v24 = vmul.f32 %v7485_v17, %v7485_v17 }
 0x4a5   : > { %7481 = vst [vmem:[%s10447_s19 + $0x58] sm:$0xff] %v8116_v22  ;;  %v7488_v18 = vadd.f32 %v7487_v41, %v7485_v17  ;;  %v7497_v20 = vadd.f32 %v7496_v29, %v7494_v38 }
 0x4a7   : > { %7489 = vadd.xlane.f32.xlu1 %v7488_v18  ;;  %v7498_v28 = vadd.f32 %v7497_v20, %v7495_v24 }
 0x4a9   : > { %7499 = vadd.xlane.f32.xlu0 %v7498_v28 }
 0x4aa   : > { %8680 = shalt.err (!%p8677_p3)
}
 0x4ab   : > { %s8681_s13 = scalar_lea.hbm %s10550_s12, 1536  ;;  %s8685_s19 = scalar_lea.hbm %s10626_s7, 3072 }
 0x4ac   : > { %p8682_p10 = scmp.ne.s32.totalorder %s10550_s12, %s8681_s13  ;;  %p8686_p8 = scmp.lt.u32.totalorder %s10550_s12, %s10626_s7 }
 0x4ad   : > { %p8687_p6 = scmp.lt.u32.totalorder %s8685_s19, %s8681_s13  ;;  %p8689_p5 = scmp.lt.u32.totalorder %s8681_s13, %s10550_s12 }
 0x4ae   : > { %p8683_p4 = pnand %p8682_p10, %p10650_p9 }
 0x4af   : > { %p8688_p7 = por %p8687_p6, %p8686_p8 }
 0x4b0   : > { %p8684_p11 = pneg %p8683_p4 }
 0x4b1   : > { %p8690_p12 = por %p8689_p5, %p8688_p7 }
 0x4b3   : > { %p8691_p1 = pnand %p8690_p12, %p8684_p11 }
 0x4b5   : > { %8694 = shalt.err (!%p8691_p1)
}
 0x4b6   : > { %8180 = dma.vmem_to_hbm [thread:$0]  (%p10650_p9), %s7527_s26, 1536, %s10550_s12, %s7507_s10   ;;  %vm7502_vm1 = vcmask 7168   ;;  %vm7504_vm2 = vcmask 15360  }
 0x4b7   : > { %s7715_s22 = sshll.u32 %s9101_s2, 3  ;;  %s8086_s26 = sshll.u32 %s8866_s11, 7 }
 0x4b8   : > { %s409_s12 = scalar_lea.vmem [#allocation19], %s7715_s22  ;;  %s10575_s17 = scalar_lea.hbm %s10627_s8, %s8086_s26 }
 0x4b9   : > { %s7539_s10 = sshll.u32 %s409_s12, 4  ;;  %s7512_s11 = scalar_lea.sflag [#allocation20], %s9101_s2  ;;  %s10577_s10 = int_to_ptr.vmem [resolvable:$true] %s7539_s10 }
 0x4ba   : > { %s8695_s16 = scalar_lea.vmem %s10577_s10, 128  ;;  %s8799_s13 = smov [#allocation19]  }
 0x4bb   : > { %p8696_p13 = scmp.ne.s32.totalorder %s10577_s10, %s8695_s16  ;;  %s8699_s18 = sshll.u32 %s8799_s13, 4  ;;  %s8700_s18 = int_to_ptr.vmem [resolvable:$false] %s8699_s18 }
 0x4bc   : > { %s8701_s21 = scalar_lea.vmem %s8700_s18, 256  ;;  %p8702_p3 = scmp.lt.s32.totalorder %s10577_s10, %s8700_s18 }
 0x4bd   : > { %p8697_p0 = pnand %p8696_p13, %p10650_p9  ;;  %p8703_p10 = scmp.lt.s32.totalorder %s8701_s21, %s8695_s16 }
 0x4bf   : > { %p8698_p2 = pneg %p8697_p0  ;;  %p8704_p4 = por %p8703_p10, %p8702_p3 }
 0x4c1   : > { %p8705_p11 = pnand %p8704_p4, %p8698_p2 }
 0x50c   : > { %v7260_v30 = vpop.xlane.xlu1 %7259 }
 0x50f   : > { %v7270_v23 = vpop.xlane.xlu0 %7269 }
 0x515   : > { %v7306_v42 = vpop.xlane.xlu1 %7305 }
 0x516   : > { %v7307_v25 = vadd.f32 %v7306_v42, %v7260_v30 }
 0x517   : > { %v7316_v12 = vpop.xlane.xlu0 %7315 }
 0x518   : > { %v7317_v60 = vadd.f32 %v7316_v12, %v7270_v23 }
 0x51d   : > { %v7352_v49 = vpop.xlane.xlu1 %7351 }
 0x51e   : > { %v7353_v46 = vadd.f32 %v7352_v49, %v7307_v25 }
 0x51f   : > { %v7362_v61 = vpop.xlane.xlu0 %7361 }
 0x520   : > { %v7363_v56 = vadd.f32 %v7362_v61, %v7317_v60 }
 0x525   : > { %v7398_v40 = vpop.xlane.xlu1 %7397 }
 0x526   : > { %v7399_v48 = vadd.f32 %v7398_v40, %v7353_v46 }
 0x527   : > { %v7408_v21 = vpop.xlane.xlu0 %7407 }
 0x528   : > { %v7409_v51 = vadd.f32 %v7408_v21, %v7363_v56 }
 0x52d   : > { %v7444_v31 = vpop.xlane.xlu1 %7443 }
 0x52e   : > { %v7445_v10 = vadd.f32 %v7444_v31, %v7399_v48 }
 0x52f   : > { %v7454_v0 = vpop.xlane.xlu0 %7453 }
 0x530   : > { %v7455_v37 = vadd.f32 %v7454_v0, %v7409_v51 }
 0x534   : > { %v7490_v16 = vpop.xlane.xlu1 %7489 }
 0x535   : > { %v7491_v35 = vadd.f32 %v7490_v16, %v7445_v10 }
 0x536   : > { %v7500_v4 = vpop.xlane.xlu0 %7499 }
 0x537   : > { %v7501_v52 = vadd.f32 %v7500_v4, %v7455_v37 }
 0x539   : > { %v7503_v27 = vsel %vm7502_vm1, %v7491_v35, %v7501_v52 }
 0x53a   : > { %7505 = vst.msk [vmem:[%s409_s12] sm:$0xff] %vm7504_vm2, %v7503_v27 }
 0x53b   : > { %8708 = shalt.err (!%p8705_p11)
}
 0x53c   : > { %s8709_s2 = scalar_lea.hbm %s10575_s17, 128  ;;  %s8713_s24 = scalar_lea.hbm %s10627_s8, 256 }
 0x53d   : > { %p8710_p8 = scmp.ne.s32.totalorder %s10575_s17, %s8709_s2  ;;  %p8714_p5 = scmp.lt.u32.totalorder %s10575_s17, %s10627_s8 }
 0x53e   : > { %p8715_p12 = scmp.lt.u32.totalorder %s8713_s24, %s8709_s2  ;;  %p8717_p13 = scmp.lt.u32.totalorder %s8709_s2, %s10575_s17 }
 0x53f   : > { %p8711_p6 = pnand %p8710_p8, %p10650_p9 }
 0x540   : > { %p8716_p1 = por %p8715_p12, %p8714_p5 }
 0x541   : > { %p8712_p7 = pneg %p8711_p6 }
 0x542   : > { %p8718_p0 = por %p8717_p13, %p8716_p1 }
 0x544   : > { %p8719_p2 = pnand %p8718_p0, %p8712_p7 }
 0x546   : > { %8722 = shalt.err (!%p8719_p2)
}
 0x547   : > { %8181 = dma.vmem_to_hbm [thread:$0]  (%p10650_p9), %s10577_s10, 128, %s10575_s17, %s7512_s11  }
 0x548 PF: > { %s7551_s12 = sand.u32 1, %s8765_s27   ;;  %p10651_p3 = scmp.ne.s32.totalorder %s10641_s20, 0 }
 0x549   : > { %p10652_p10 = scmp.ge.s32.totalorder %s8777_s30, 2  ;;  %s7552_s23 = scalar_lea.sflag [#allocation8], %s7551_s12 }
 0x54b   : > { %p8208_p4 = pnand %p10652_p10, %p10651_p3 }
 0x54d   : > { %8756 = dma.done.wait (!%p8208_p4), %s7552_s23, 1536  }
 0x54e   : > { %8758 = vsyncadd (!%p8208_p4), %s7552_s23, 4294965760  ;;  %s7561_s14 = scalar_lea.sflag [#allocation20], %s7551_s12 }
 0x54f   : > { %8760 = dma.done.wait (!%p8208_p4), %s7561_s14, 128  }
 0x550   : > { %8762 = vsyncadd (!%p8208_p4), %s7561_s14, 4294967168  ;;  %p28_p9 = scmp.ge.s32.totalorder %s9031_s25, 4   ;;  %s10653_s27 = smov %s8769_s28 }
 0x551   : > { %s10654_s28 = smov %s8773_s29  ;;  %s10655_s29 = smov %s9042_s9 }
 0x552   : > { %s10656_s30 = smov %s9031_s25  ;;  %30 = sbr.rel (!%p28_p9) target bundleno = 13 (0xd), region = 137 }
 0x559   :  { %7566 = vsyncpa [#allocation7], 1 }
 0x55a   :  { %7568 = vsyncpa [#allocation7 + $0x1], 1 }
 0x55b   :  { %7569 = vsyncpa [#allocation10], 1 }
 0x55c   :  { %7570 = vsyncpa [#allocation13], 1 }
 0x55d   :  { %7571 = vsyncpa [#allocation16], 1 }
 0x55e   :  { %7572 = vsyncpa [#allocation8], 1 }
 0x55f   :  { %7574 = vsyncpa [#allocation8 + $0x1], 1 }
 0x560   :  { %7575 = vsyncpa [#allocation20], 1 }
 0x561   :  { %7577 = vsyncpa [#allocation20 + $0x1], 1 }

</bundles_post_ra>
